<compile_context>
chip_gen: v7x
topology: tpu7x:2x2x1
jax: 0.10.0
libtpu: 0.0.40
codegen_flags: <defaults>
</compile_context>

<pallas_src>
import functools

import jax
import jax.numpy as jnp
import numpy as np
from jax.experimental import pallas as pl
from jax.experimental.pallas import tpu as pltpu

_CP = 128            # lane width of activations / weight N dim
_RES_OFF = _CP // 2  # residual branch packed at lanes [64 : 64+c_out)


# ----------------------------- static selector build ------------------------

def _conv_out(n, k, stride, pad):
    return (n + 2 * pad - k) // stride + 1


def _tap_selectors(h_in, w_in, k, stride, pad):
    """0/1 matrices S[t]: patches_t = S[t] @ X, rows in (h, w) row-major order."""
    h_out, w_out = _conv_out(h_in, k, stride, pad), _conv_out(w_in, k, stride, pad)
    sel = np.zeros((k * k, h_out * w_out, h_in * w_in), np.float32)
    for di in range(k):
        for dj in range(k):
            t = di * k + dj
            for ho in range(h_out):
                hi = ho * stride + di - pad
                if not (0 <= hi < h_in):
                    continue
                for wo in range(w_out):
                    wi = wo * stride + dj - pad
                    if not (0 <= wi < w_in):
                        continue
                    sel[t, ho * w_out + wo, hi * w_in + wi] = 1.0
    return sel, h_out, w_out


# ------------------------------- Pallas kernel -------------------------------

def _make_fused_kernel(plan, n_sel, cp, bt):
    n_blocks = len(plan)

    def kernel(*refs):
        x_ref = refs[0]
        sel_refs = refs[1:1 + n_sel]
        w_refs = refs[1 + n_sel:1 + n_sel + n_blocks]
        bias_ref, wf_ref, bf_ref, alpha_ref = refs[1 + n_sel + n_blocks:-1]
        o_ref = refs[-1]

        for s in range(bt):                               # static sub-batch unroll
            x = x_ref[s]                                   # (H0*W0, Cp) bf16
            for l, (mode, sel_idx, rows) in enumerate(plan):
                xb = x if x.dtype == jnp.bfloat16 else x.astype(jnp.bfloat16)
                w_ref = w_refs[l]
                if mode == "sel":
                    sel_ref = sel_refs[sel_idx]
                    n_taps, m_out, _ = sel_ref.shape
                    acc = jnp.zeros((m_out, cp), jnp.float32)
                    for t in range(n_taps):
                        # in-kernel im2col: 0/1 selector picks the stride-2 tap rows
                        patch = jnp.dot(sel_ref[t], xb,
                                        preferred_element_type=jnp.float32)
                        acc = acc + jnp.dot(patch.astype(jnp.bfloat16), w_ref[t],
                                            preferred_element_type=jnp.float32)
                else:                                      # "rows": 1x1-output blocks
                    acc = jnp.zeros((1, cp), jnp.float32)
                    for j, r in enumerate(rows):
                        acc = acc + jnp.dot(xb[r:r + 1, :], w_ref[j],
                                            preferred_element_type=jnp.float32)

                t_full = acc + bias_ref[l]                 # (conv+b3 | res+b1) slab
                a = alpha_ref[0, l]                        # PReLU slope (SMEM scalar)
                act = jnp.where(t_full > 0.0, t_full, a * t_full)
                # Bring residual lanes [64:96) onto the conv lanes [0:32) with one
                # lane roll; the stray rolled-in lanes hit all-zero weight rows in
                # the next matmul, so they are inert.
                x = act + pltpu.roll(t_full, cp // 2, axis=1)

            # head: Linear -> PReLU (final spatial is 1x1, so x is (1, Cp))
            y = jnp.dot(x.astype(jnp.bfloat16), wf_ref[...],
                        preferred_element_type=jnp.float32) + bf_ref[...]
            a = alpha_ref[0, n_blocks]
            o_ref[s] = jnp.where(y > 0.0, y, a * y)

    return kernel


# --------------------------------- forward -----------------------------------

@functools.partial(jax.jit, static_argnames=("plan", "classes"))
def cnn_regressor_forward(params, x_nchw, *, plan, classes=1):
    b, c, h, w = x_nchw.shape
    cp = _CP
    hw0 = h * w
    selectors = params["selectors"]
    weights = params["weights"]
    n_sel = len(selectors)

    # Sub-batch per grid step for larger batches (amortizes per-step overhead) while
    # keeping grid >= 2 so "parallel" sharding keeps both v7x TensorCores busy.
    bt = 1
    for cand in (8, 4, 2):
        if b % cand == 0 and b // cand >= 2:
            bt = cand
            break

    # NCHW -> (B, H*W, Cp) bf16: lane-pad channels once and cast to the MXU input
    # dtype (the kernel would cast anyway, so this adds no extra rounding).
    xh = jnp.transpose(x_nchw, (0, 2, 3, 1)).reshape(b, hw0, c)
    xh = jnp.pad(xh, ((0, 0), (0, 0), (0, cp - c))).astype(jnp.bfloat16)

    def const_spec(a):
        # Constant block index -> Pallas fetches the block once for the whole grid.
        return pl.BlockSpec(a.shape, lambda i, _n=a.ndim: (0,) * _n)

    in_specs = [pl.BlockSpec((bt, hw0, cp), lambda i: (i, 0, 0))]
    in_specs += [const_spec(s) for s in selectors]
    in_specs += [const_spec(wl) for wl in weights]
    in_specs += [const_spec(params["bias"]), const_spec(params["wf"]),
                 const_spec(params["bf"]),
                 pl.BlockSpec(params["alphas"].shape, lambda i: (0, 0),
                              memory_space=pltpu.MemorySpace.SMEM)]

    out = pl.pallas_call(
        _make_fused_kernel(plan, n_sel, cp, bt),
        grid=(b // bt,),
        in_specs=in_specs,
        out_specs=pl.BlockSpec((bt, 1, cp), lambda i: (i, 0, 0)),
        out_shape=jax.ShapeDtypeStruct((b, 1, cp), jnp.float32),
        compiler_params=pltpu.CompilerParams(
            dimension_semantics=("parallel",),
            vmem_limit_bytes=16 * 1024 * 1024),
    )(xh, *selectors, *weights, params["bias"], params["wf"], params["bf"],
      params["alphas"])

    return out[:, 0, :classes]


# ------------------------------ parameter init --------------------------------

def init_params(key, in_shape, classes=1, channels=None, strides=None, kernel_size=3):
    channels = list(channels) if channels is not None else [32] * 6
    strides = list(strides) if strides is not None else [2] * 6
    c0, h, w = in_shape
    k = kernel_size
    pad = k // 2
    n_blocks = len(channels)
    cp = _CP
    center_tap = (k // 2) * k + (k // 2)
    assert max(channels) <= _RES_OFF, "conv|res lane packing needs c_out <= 64"

    def bf16_round(a):  # kernel stores bf16; reference uses identical rounded values
        return np.asarray(jnp.asarray(a, jnp.float32).astype(jnp.bfloat16)
                          .astype(jnp.float32))

    selectors, weights, plan, raw_blocks = [], [], [], []
    bias = np.zeros((n_blocks, 1, cp), np.float32)
    alphas = np.full((1, n_blocks + 1), 0.25, np.float32)     # PReLU default init

    c_in = c0
    for l, (c_out, s) in enumerate(zip(channels, strides)):
        key, r1, r2, r3, r4 = jax.random.split(key, 5)
        fan3 = k * k * c_in
        w3 = bf16_round(jax.random.normal(r1, (k * k, c_in, c_out), jnp.float32)
                        / float(np.sqrt(fan3)))
        b3v = np.asarray(0.01 * jax.random.normal(r2, (c_out,), jnp.float32))
        w1 = bf16_round(jax.random.normal(r3, (c_in, c_out), jnp.float32)
                        / float(np.sqrt(c_in)))
        b1v = np.asarray(0.01 * jax.random.normal(r4, (c_out,), jnp.float32))

        sel_full, h_out, w_out = _tap_selectors(h, w, k, s, pad)
        valid = [t for t in range(k * k) if sel_full[t].any()]   # prune dead taps
        j_center = valid.index(center_tap)

        # packed per-tap weight: conv -> lanes [0:c_out), 1x1 residual folded into
        # the center tap at lanes [RES_OFF : RES_OFF+c_out)
        wt = np.zeros((len(valid), cp, cp), np.float32)
        for j, t in enumerate(valid):
            wt[j, :c_in, :c_out] = w3[t]
        wt[j_center, :c_in, _RES_OFF:_RES_OFF + c_out] = w1
        weights.append(jnp.asarray(wt, jnp.bfloat16))

        if h_out == 1 and w_out == 1 and h <= 2 and w <= 2:
            # every live tap reads exactly one full input row -> no gather needed
            rows = tuple(int(np.argmax(sel_full[t][0])) for t in valid)
            plan.append(("rows", -1, rows))
        else:
            plan.append(("sel", len(selectors), ()))
            selectors.append(jnp.asarray(sel_full[valid], jnp.bfloat16))

        bias[l, 0, :c_out] = b3v
        bias[l, 0, _RES_OFF:_RES_OFF + c_out] = b1v
        raw_blocks.append(dict(w3=w3, b3=b3v, w1=w1, b1=b1v,
                               alpha=np.float32(0.25), stride=s))
        c_in, h, w = c_out, h_out, w_out

    # TODO(synk): general (c, h, w)-ordered flatten when the final spatial is > 1x1.
    assert h == 1 and w == 1, "default config reduces 16x16 to 1x1; others unsupported"
    feat = c_in
    key, r1, r2 = jax.random.split(key, 3)
    wf_raw = bf16_round(jax.random.normal(r1, (feat, classes), jnp.float32)
                        / float(np.sqrt(feat)))
    bf_raw = np.asarray(0.01 * jax.random.normal(r2, (1, classes), jnp.float32))
    wf = np.zeros((cp, cp), np.float32)
    bf = np.zeros((1, cp), np.float32)
    wf[:feat, :classes] = wf_raw
    bf[:, :classes] = bf_raw

    params = dict(selectors=tuple(selectors), weights=tuple(weights),
                  bias=jnp.asarray(bias), wf=jnp.asarray(wf, jnp.bfloat16),
                  bf=jnp.asarray(bf), alphas=jnp.asarray(alphas))
    raw = dict(blocks=raw_blocks, wf=wf_raw, bf=bf_raw, alpha_f=np.float32(0.25),
               kernel_size=k, pad=pad)
    return params, raw, tuple(plan)


# ------------------------------ pure-JAX reference ----------------------------

def reference_forward(raw, x_nchw):
    k, pad = raw["kernel_size"], raw["pad"]
    h = x_nchw
    for blk in raw["blocks"]:
        _, c_in, c_out = blk["w3"].shape
        s = blk["stride"]
        w3 = jnp.transpose(jnp.asarray(blk["w3"]).reshape(k, k, c_in, c_out),
                           (3, 2, 0, 1))
        conv = jax.lax.conv_general_dilated(
            h, w3, (s, s), [(pad, pad), (pad, pad)],
            dimension_numbers=("NCHW", "OIHW", "NCHW"))
        conv = conv + blk["b3"].reshape(1, -1, 1, 1)
        act = jnp.where(conv > 0, conv, blk["alpha"] * conv)
        w1 = jnp.transpose(jnp.asarray(blk["w1"]), (1, 0))[:, :, None, None]
        res = jax.lax.conv_general_dilated(
            h, w1, (s, s), [(0, 0), (0, 0)],
            dimension_numbers=("NCHW", "OIHW", "NCHW"))
        res = res + blk["b1"].reshape(1, -1, 1, 1)
        h = act + res
    feats = h.reshape(h.shape[0], -1)
    y = feats @ raw["wf"] + raw["bf"]
    return jnp.where(y > 0, y, raw["alpha_f"] * y)


# ------------------------------------ main ------------------------------------

if __name__ == "__main__":
    key = jax.random.PRNGKey(0)
    pkey, xkey = jax.random.split(key)

    in_shape = (4, 16, 16)                                  # (C, H, W)
    batch = 2
    params, raw, plan = init_params(pkey, in_shape, classes=1)

    x = jax.random.normal(xkey, (batch,) + in_shape, dtype=jnp.float32)  # NCHW

    y = cnn_regressor_forward(params, x, plan=plan, classes=1)
    jax.block_until_ready(y)

    assert y.shape == (batch, 1), y.shape
    assert y.dtype == jnp.float32
    assert bool(jnp.all(jnp.isfinite(y)))

    y_ref = reference_forward(raw, x)
    # bf16 MXU operands (f32 accumulation, f32 element-wise, identical bf16-rounded
    # weights on both sides) -> slightly relaxed tolerance vs the old f32-only path.
    np.testing.assert_allclose(np.asarray(y), np.asarray(y_ref), rtol=2e-2, atol=2e-2)

    print("KERNEL_OK")
</pallas_src>

<mosaic_0001>
module attributes {stable_mosaic.version = 11 : i64} {
  func.func @kernel(%arg0: i32, %arg1: memref<1x256x128xbf16, #tpu.memory_space<vmem>>, %arg2: memref<9x64x256xbf16, #tpu.memory_space<vmem>>, %arg3: memref<9x16x64xbf16, #tpu.memory_space<vmem>>, %arg4: memref<9x4x16xbf16, #tpu.memory_space<vmem>>, %arg5: memref<9x128x128xbf16, #tpu.memory_space<vmem>>, %arg6: memref<9x128x128xbf16, #tpu.memory_space<vmem>>, %arg7: memref<9x128x128xbf16, #tpu.memory_space<vmem>>, %arg8: memref<4x128x128xbf16, #tpu.memory_space<vmem>>, %arg9: memref<1x128x128xbf16, #tpu.memory_space<vmem>>, %arg10: memref<1x128x128xbf16, #tpu.memory_space<vmem>>, %arg11: memref<6x1x128xf32, #tpu.memory_space<vmem>>, %arg12: memref<128x128xbf16, #tpu.memory_space<vmem>>, %arg13: memref<1x128xf32, #tpu.memory_space<vmem>>, %arg14: memref<1x7xf32, #tpu.memory_space<smem>>, %arg15: memref<1x1x128xf32, #tpu.memory_space<vmem>>) attributes {dimension_semantics = [#tpu.dimension_semantics<parallel>], iteration_bounds = array<i64: 2>, scalar_prefetch = 0 : i64, scratch_operands = 0 : i64, tpu.core_type = #tpu.core_type<tc>, window_params = [{transform_indices = @transform_0, window_bounds = array<i64: 1, 256, 128>}, {pipeline_mode = #tpu.pipeline_mode<synchronous>, transform_indices = @transform_1, window_bounds = array<i64: 9, 64, 256>}, {pipeline_mode = #tpu.pipeline_mode<synchronous>, transform_indices = @transform_2, window_bounds = array<i64: 9, 16, 64>}, {pipeline_mode = #tpu.pipeline_mode<synchronous>, transform_indices = @transform_3, window_bounds = array<i64: 9, 4, 16>}, {pipeline_mode = #tpu.pipeline_mode<synchronous>, transform_indices = @transform_4, window_bounds = array<i64: 9, 128, 128>}, {pipeline_mode = #tpu.pipeline_mode<synchronous>, transform_indices = @transform_5, window_bounds = array<i64: 9, 128, 128>}, {pipeline_mode = #tpu.pipeline_mode<synchronous>, transform_indices = @transform_6, window_bounds = array<i64: 9, 128, 128>}, {pipeline_mode = #tpu.pipeline_mode<synchronous>, transform_indices = @transform_7, window_bounds = array<i64: 4, 128, 128>}, {pipeline_mode = #tpu.pipeline_mode<synchronous>, transform_indices = @transform_8, window_bounds = array<i64: 1, 128, 128>}, {pipeline_mode = #tpu.pipeline_mode<synchronous>, transform_indices = @transform_9, window_bounds = array<i64: 1, 128, 128>}, {pipeline_mode = #tpu.pipeline_mode<synchronous>, transform_indices = @transform_10, window_bounds = array<i64: 6, 1, 128>}, {pipeline_mode = #tpu.pipeline_mode<synchronous>, transform_indices = @transform_11, window_bounds = array<i64: 128, 128>}, {pipeline_mode = #tpu.pipeline_mode<synchronous>, transform_indices = @transform_12, window_bounds = array<i64: 1, 128>}, {transform_indices = @transform_13, window_bounds = array<i64: 1, 7>}, {transform_indices = @transform_14, window_bounds = array<i64: 1, 1, 128>}]} {
    %c0 = arith.constant 0 : index
    %c0_0 = arith.constant 0 : index
    %c0_1 = arith.constant 0 : index
    %0 = vector.load %arg1[%c0, %c0_0, %c0_1] : memref<1x256x128xbf16, #tpu.memory_space<vmem>>, vector<1x256x128xbf16>
    %1 = vector.shape_cast %0 : vector<1x256x128xbf16> to vector<256x128xbf16>
    %cst = arith.constant 0.000000e+00 : f32
    %2 = vector.broadcast %cst : f32 to vector<64x128xf32>
    %c0_2 = arith.constant 0 : index
    %c0_3 = arith.constant 0 : index
    %c0_4 = arith.constant 0 : index
    %3 = vector.load %arg2[%c0_2, %c0_3, %c0_4] : memref<9x64x256xbf16, #tpu.memory_space<vmem>>, vector<1x64x256xbf16>
    %4 = vector.shape_cast %3 : vector<1x64x256xbf16> to vector<64x256xbf16>
    %cst_5 = arith.constant dense<0.000000e+00> : vector<64x128xf32>
    %5 = tpu.matmul %4, %1, %cst_5 {dimension_numbers = #tpu.dot_dimension_numbers<[1], [0], [0], [1], [0, 0, 1, 1], [], []>} : vector<64x256xbf16>, vector<256x128xbf16>, vector<64x128xf32> -> vector<64x128xf32>
    %6 = arith.truncf %5 : vector<64x128xf32> to vector<64x128xbf16>
    %c0_6 = arith.constant 0 : index
    %c0_7 = arith.constant 0 : index
    %c0_8 = arith.constant 0 : index
    %7 = vector.load %arg5[%c0_6, %c0_7, %c0_8] : memref<9x128x128xbf16, #tpu.memory_space<vmem>>, vector<1x128x128xbf16>
    %8 = vector.shape_cast %7 : vector<1x128x128xbf16> to vector<128x128xbf16>
    %cst_9 = arith.constant dense<0.000000e+00> : vector<64x128xf32>
    %9 = tpu.matmul %6, %8, %cst_9 {dimension_numbers = #tpu.dot_dimension_numbers<[1], [0], [0], [1], [0, 0, 1, 1], [], []>} : vector<64x128xbf16>, vector<128x128xbf16>, vector<64x128xf32> -> vector<64x128xf32>
    %10 = arith.addf %2, %9 : vector<64x128xf32>
    %c1 = arith.constant 1 : index
    %c0_10 = arith.constant 0 : index
    %c0_11 = arith.constant 0 : index
    %11 = vector.load %arg2[%c1, %c0_10, %c0_11] : memref<9x64x256xbf16, #tpu.memory_space<vmem>>, vector<1x64x256xbf16>
    %12 = vector.shape_cast %11 : vector<1x64x256xbf16> to vector<64x256xbf16>
    %cst_12 = arith.constant dense<0.000000e+00> : vector<64x128xf32>
    %13 = tpu.matmul %12, %1, %cst_12 {dimension_numbers = #tpu.dot_dimension_numbers<[1], [0], [0], [1], [0, 0, 1, 1], [], []>} : vector<64x256xbf16>, vector<256x128xbf16>, vector<64x128xf32> -> vector<64x128xf32>
    %14 = arith.truncf %13 : vector<64x128xf32> to vector<64x128xbf16>
    %c1_13 = arith.constant 1 : index
    %c0_14 = arith.constant 0 : index
    %c0_15 = arith.constant 0 : index
    %15 = vector.load %arg5[%c1_13, %c0_14, %c0_15] : memref<9x128x128xbf16, #tpu.memory_space<vmem>>, vector<1x128x128xbf16>
    %16 = vector.shape_cast %15 : vector<1x128x128xbf16> to vector<128x128xbf16>
    %cst_16 = arith.constant dense<0.000000e+00> : vector<64x128xf32>
    %17 = tpu.matmul %14, %16, %cst_16 {dimension_numbers = #tpu.dot_dimension_numbers<[1], [0], [0], [1], [0, 0, 1, 1], [], []>} : vector<64x128xbf16>, vector<128x128xbf16>, vector<64x128xf32> -> vector<64x128xf32>
    %18 = arith.addf %10, %17 : vector<64x128xf32>
    %c2 = arith.constant 2 : index
    %c0_17 = arith.constant 0 : index
    %c0_18 = arith.constant 0 : index
    %19 = vector.load %arg2[%c2, %c0_17, %c0_18] : memref<9x64x256xbf16, #tpu.memory_space<vmem>>, vector<1x64x256xbf16>
    %20 = vector.shape_cast %19 : vector<1x64x256xbf16> to vector<64x256xbf16>
    %cst_19 = arith.constant dense<0.000000e+00> : vector<64x128xf32>
    %21 = tpu.matmul %20, %1, %cst_19 {dimension_numbers = #tpu.dot_dimension_numbers<[1], [0], [0], [1], [0, 0, 1, 1], [], []>} : vector<64x256xbf16>, vector<256x128xbf16>, vector<64x128xf32> -> vector<64x128xf32>
    %22 = arith.truncf %21 : vector<64x128xf32> to vector<64x128xbf16>
    %c2_20 = arith.constant 2 : index
    %c0_21 = arith.constant 0 : index
    %c0_22 = arith.constant 0 : index
    %23 = vector.load %arg5[%c2_20, %c0_21, %c0_22] : memref<9x128x128xbf16, #tpu.memory_space<vmem>>, vector<1x128x128xbf16>
    %24 = vector.shape_cast %23 : vector<1x128x128xbf16> to vector<128x128xbf16>
    %cst_23 = arith.constant dense<0.000000e+00> : vector<64x128xf32>
    %25 = tpu.matmul %22, %24, %cst_23 {dimension_numbers = #tpu.dot_dimension_numbers<[1], [0], [0], [1], [0, 0, 1, 1], [], []>} : vector<64x128xbf16>, vector<128x128xbf16>, vector<64x128xf32> -> vector<64x128xf32>
    %26 = arith.addf %18, %25 : vector<64x128xf32>
    %c3 = arith.constant 3 : index
    %c0_24 = arith.constant 0 : index
    %c0_25 = arith.constant 0 : index
    %27 = vector.load %arg2[%c3, %c0_24, %c0_25] : memref<9x64x256xbf16, #tpu.memory_space<vmem>>, vector<1x64x256xbf16>
    %28 = vector.shape_cast %27 : vector<1x64x256xbf16> to vector<64x256xbf16>
    %cst_26 = arith.constant dense<0.000000e+00> : vector<64x128xf32>
    %29 = tpu.matmul %28, %1, %cst_26 {dimension_numbers = #tpu.dot_dimension_numbers<[1], [0], [0], [1], [0, 0, 1, 1], [], []>} : vector<64x256xbf16>, vector<256x128xbf16>, vector<64x128xf32> -> vector<64x128xf32>
    %30 = arith.truncf %29 : vector<64x128xf32> to vector<64x128xbf16>
    %c3_27 = arith.constant 3 : index
    %c0_28 = arith.constant 0 : index
    %c0_29 = arith.constant 0 : index
    %31 = vector.load %arg5[%c3_27, %c0_28, %c0_29] : memref<9x128x128xbf16, #tpu.memory_space<vmem>>, vector<1x128x128xbf16>
    %32 = vector.shape_cast %31 : vector<1x128x128xbf16> to vector<128x128xbf16>
    %cst_30 = arith.constant dense<0.000000e+00> : vector<64x128xf32>
    %33 = tpu.matmul %30, %32, %cst_30 {dimension_numbers = #tpu.dot_dimension_numbers<[1], [0], [0], [1], [0, 0, 1, 1], [], []>} : vector<64x128xbf16>, vector<128x128xbf16>, vector<64x128xf32> -> vector<64x128xf32>
    %34 = arith.addf %26, %33 : vector<64x128xf32>
    %c4 = arith.constant 4 : index
    %c0_31 = arith.constant 0 : index
    %c0_32 = arith.constant 0 : index
    %35 = vector.load %arg2[%c4, %c0_31, %c0_32] : memref<9x64x256xbf16, #tpu.memory_space<vmem>>, vector<1x64x256xbf16>
    %36 = vector.shape_cast %35 : vector<1x64x256xbf16> to vector<64x256xbf16>
    %cst_33 = arith.constant dense<0.000000e+00> : vector<64x128xf32>
    %37 = tpu.matmul %36, %1, %cst_33 {dimension_numbers = #tpu.dot_dimension_numbers<[1], [0], [0], [1], [0, 0, 1, 1], [], []>} : vector<64x256xbf16>, vector<256x128xbf16>, vector<64x128xf32> -> vector<64x128xf32>
    %38 = arith.truncf %37 : vector<64x128xf32> to vector<64x128xbf16>
    %c4_34 = arith.constant 4 : index
    %c0_35 = arith.constant 0 : index
    %c0_36 = arith.constant 0 : index
    %39 = vector.load %arg5[%c4_34, %c0_35, %c0_36] : memref<9x128x128xbf16, #tpu.memory_space<vmem>>, vector<1x128x128xbf16>
    %40 = vector.shape_cast %39 : vector<1x128x128xbf16> to vector<128x128xbf16>
    %cst_37 = arith.constant dense<0.000000e+00> : vector<64x128xf32>
    %41 = tpu.matmul %38, %40, %cst_37 {dimension_numbers = #tpu.dot_dimension_numbers<[1], [0], [0], [1], [0, 0, 1, 1], [], []>} : vector<64x128xbf16>, vector<128x128xbf16>, vector<64x128xf32> -> vector<64x128xf32>
    %42 = arith.addf %34, %41 : vector<64x128xf32>
    %c5 = arith.constant 5 : index
    %c0_38 = arith.constant 0 : index
    %c0_39 = arith.constant 0 : index
    %43 = vector.load %arg2[%c5, %c0_38, %c0_39] : memref<9x64x256xbf16, #tpu.memory_space<vmem>>, vector<1x64x256xbf16>
    %44 = vector.shape_cast %43 : vector<1x64x256xbf16> to vector<64x256xbf16>
    %cst_40 = arith.constant dense<0.000000e+00> : vector<64x128xf32>
    %45 = tpu.matmul %44, %1, %cst_40 {dimension_numbers = #tpu.dot_dimension_numbers<[1], [0], [0], [1], [0, 0, 1, 1], [], []>} : vector<64x256xbf16>, vector<256x128xbf16>, vector<64x128xf32> -> vector<64x128xf32>
    %46 = arith.truncf %45 : vector<64x128xf32> to vector<64x128xbf16>
    %c5_41 = arith.constant 5 : index
    %c0_42 = arith.constant 0 : index
    %c0_43 = arith.constant 0 : index
    %47 = vector.load %arg5[%c5_41, %c0_42, %c0_43] : memref<9x128x128xbf16, #tpu.memory_space<vmem>>, vector<1x128x128xbf16>
    %48 = vector.shape_cast %47 : vector<1x128x128xbf16> to vector<128x128xbf16>
    %cst_44 = arith.constant dense<0.000000e+00> : vector<64x128xf32>
    %49 = tpu.matmul %46, %48, %cst_44 {dimension_numbers = #tpu.dot_dimension_numbers<[1], [0], [0], [1], [0, 0, 1, 1], [], []>} : vector<64x128xbf16>, vector<128x128xbf16>, vector<64x128xf32> -> vector<64x128xf32>
    %50 = arith.addf %42, %49 : vector<64x128xf32>
    %c6 = arith.constant 6 : index
    %c0_45 = arith.constant 0 : index
    %c0_46 = arith.constant 0 : index
    %51 = vector.load %arg2[%c6, %c0_45, %c0_46] : memref<9x64x256xbf16, #tpu.memory_space<vmem>>, vector<1x64x256xbf16>
    %52 = vector.shape_cast %51 : vector<1x64x256xbf16> to vector<64x256xbf16>
    %cst_47 = arith.constant dense<0.000000e+00> : vector<64x128xf32>
    %53 = tpu.matmul %52, %1, %cst_47 {dimension_numbers = #tpu.dot_dimension_numbers<[1], [0], [0], [1], [0, 0, 1, 1], [], []>} : vector<64x256xbf16>, vector<256x128xbf16>, vector<64x128xf32> -> vector<64x128xf32>
    %54 = arith.truncf %53 : vector<64x128xf32> to vector<64x128xbf16>
    %c6_48 = arith.constant 6 : index
    %c0_49 = arith.constant 0 : index
    %c0_50 = arith.constant 0 : index
    %55 = vector.load %arg5[%c6_48, %c0_49, %c0_50] : memref<9x128x128xbf16, #tpu.memory_space<vmem>>, vector<1x128x128xbf16>
    %56 = vector.shape_cast %55 : vector<1x128x128xbf16> to vector<128x128xbf16>
    %cst_51 = arith.constant dense<0.000000e+00> : vector<64x128xf32>
    %57 = tpu.matmul %54, %56, %cst_51 {dimension_numbers = #tpu.dot_dimension_numbers<[1], [0], [0], [1], [0, 0, 1, 1], [], []>} : vector<64x128xbf16>, vector<128x128xbf16>, vector<64x128xf32> -> vector<64x128xf32>
    %58 = arith.addf %50, %57 : vector<64x128xf32>
    %c7 = arith.constant 7 : index
    %c0_52 = arith.constant 0 : index
    %c0_53 = arith.constant 0 : index
    %59 = vector.load %arg2[%c7, %c0_52, %c0_53] : memref<9x64x256xbf16, #tpu.memory_space<vmem>>, vector<1x64x256xbf16>
    %60 = vector.shape_cast %59 : vector<1x64x256xbf16> to vector<64x256xbf16>
    %cst_54 = arith.constant dense<0.000000e+00> : vector<64x128xf32>
    %61 = tpu.matmul %60, %1, %cst_54 {dimension_numbers = #tpu.dot_dimension_numbers<[1], [0], [0], [1], [0, 0, 1, 1], [], []>} : vector<64x256xbf16>, vector<256x128xbf16>, vector<64x128xf32> -> vector<64x128xf32>
    %62 = arith.truncf %61 : vector<64x128xf32> to vector<64x128xbf16>
    %c7_55 = arith.constant 7 : index
    %c0_56 = arith.constant 0 : index
    %c0_57 = arith.constant 0 : index
    %63 = vector.load %arg5[%c7_55, %c0_56, %c0_57] : memref<9x128x128xbf16, #tpu.memory_space<vmem>>, vector<1x128x128xbf16>
    %64 = vector.shape_cast %63 : vector<1x128x128xbf16> to vector<128x128xbf16>
    %cst_58 = arith.constant dense<0.000000e+00> : vector<64x128xf32>
    %65 = tpu.matmul %62, %64, %cst_58 {dimension_numbers = #tpu.dot_dimension_numbers<[1], [0], [0], [1], [0, 0, 1, 1], [], []>} : vector<64x128xbf16>, vector<128x128xbf16>, vector<64x128xf32> -> vector<64x128xf32>
    %66 = arith.addf %58, %65 : vector<64x128xf32>
    %c8 = arith.constant 8 : index
    %c0_59 = arith.constant 0 : index
    %c0_60 = arith.constant 0 : index
    %67 = vector.load %arg2[%c8, %c0_59, %c0_60] : memref<9x64x256xbf16, #tpu.memory_space<vmem>>, vector<1x64x256xbf16>
    %68 = vector.shape_cast %67 : vector<1x64x256xbf16> to vector<64x256xbf16>
    %cst_61 = arith.constant dense<0.000000e+00> : vector<64x128xf32>
    %69 = tpu.matmul %68, %1, %cst_61 {dimension_numbers = #tpu.dot_dimension_numbers<[1], [0], [0], [1], [0, 0, 1, 1], [], []>} : vector<64x256xbf16>, vector<256x128xbf16>, vector<64x128xf32> -> vector<64x128xf32>
    %70 = arith.truncf %69 : vector<64x128xf32> to vector<64x128xbf16>
    %c8_62 = arith.constant 8 : index
    %c0_63 = arith.constant 0 : index
    %c0_64 = arith.constant 0 : index
    %71 = vector.load %arg5[%c8_62, %c0_63, %c0_64] : memref<9x128x128xbf16, #tpu.memory_space<vmem>>, vector<1x128x128xbf16>
    %72 = vector.shape_cast %71 : vector<1x128x128xbf16> to vector<128x128xbf16>
    %cst_65 = arith.constant dense<0.000000e+00> : vector<64x128xf32>
    %73 = tpu.matmul %70, %72, %cst_65 {dimension_numbers = #tpu.dot_dimension_numbers<[1], [0], [0], [1], [0, 0, 1, 1], [], []>} : vector<64x128xbf16>, vector<128x128xbf16>, vector<64x128xf32> -> vector<64x128xf32>
    %74 = arith.addf %66, %73 : vector<64x128xf32>
    %c0_66 = arith.constant 0 : index
    %c0_67 = arith.constant 0 : index
    %c0_68 = arith.constant 0 : index
    %75 = vector.load %arg11[%c0_66, %c0_67, %c0_68] : memref<6x1x128xf32, #tpu.memory_space<vmem>>, vector<1x1x128xf32>
    %76 = vector.shape_cast %75 : vector<1x1x128xf32> to vector<1x128xf32>
    %77 = vector.broadcast %76 : vector<1x128xf32> to vector<64x128xf32>
    %78 = arith.addf %74, %77 : vector<64x128xf32>
    %c0_69 = arith.constant 0 : index
    %c0_70 = arith.constant 0 : index
    %79 = memref.load %arg14[%c0_69, %c0_70] : memref<1x7xf32, #tpu.memory_space<smem>>
    %cst_71 = arith.constant 0.000000e+00 : f32
    %80 = vector.broadcast %cst_71 : f32 to vector<64x128xf32>
    %81 = arith.cmpf ogt, %78, %80 : vector<64x128xf32>
    %82 = vector.broadcast %79 : f32 to vector<64x128xf32>
    %83 = arith.mulf %82, %78 : vector<64x128xf32>
    %84 = arith.select %81, %78, %83 : vector<64x128xi1>, vector<64x128xf32>
    %c64_i32 = arith.constant 64 : i32
    %85 = tpu.dynamic_rotate %78 by %c64_i32 dim 1 : vector<64x128xf32>, i32 -> vector<64x128xf32>
    %86 = arith.addf %84, %85 : vector<64x128xf32>
    %87 = arith.truncf %86 : vector<64x128xf32> to vector<64x128xbf16>
    %cst_72 = arith.constant 0.000000e+00 : f32
    %88 = vector.broadcast %cst_72 : f32 to vector<16x128xf32>
    %c0_73 = arith.constant 0 : index
    %c0_74 = arith.constant 0 : index
    %c0_75 = arith.constant 0 : index
    %89 = vector.load %arg3[%c0_73, %c0_74, %c0_75] : memref<9x16x64xbf16, #tpu.memory_space<vmem>>, vector<1x16x64xbf16>
    %90 = vector.shape_cast %89 : vector<1x16x64xbf16> to vector<16x64xbf16>
    %cst_76 = arith.constant dense<0.000000e+00> : vector<16x128xf32>
    %91 = tpu.matmul %90, %87, %cst_76 {dimension_numbers = #tpu.dot_dimension_numbers<[1], [0], [0], [1], [0, 0, 1, 1], [], []>} : vector<16x64xbf16>, vector<64x128xbf16>, vector<16x128xf32> -> vector<16x128xf32>
    %92 = arith.truncf %91 : vector<16x128xf32> to vector<16x128xbf16>
    %c0_77 = arith.constant 0 : index
    %c0_78 = arith.constant 0 : index
    %c0_79 = arith.constant 0 : index
    %93 = vector.load %arg6[%c0_77, %c0_78, %c0_79] : memref<9x128x128xbf16, #tpu.memory_space<vmem>>, vector<1x128x128xbf16>
    %94 = vector.shape_cast %93 : vector<1x128x128xbf16> to vector<128x128xbf16>
    %cst_80 = arith.constant dense<0.000000e+00> : vector<16x128xf32>
    %95 = tpu.matmul %92, %94, %cst_80 {dimension_numbers = #tpu.dot_dimension_numbers<[1], [0], [0], [1], [0, 0, 1, 1], [], []>} : vector<16x128xbf16>, vector<128x128xbf16>, vector<16x128xf32> -> vector<16x128xf32>
    %96 = arith.addf %88, %95 : vector<16x128xf32>
    %c1_81 = arith.constant 1 : index
    %c0_82 = arith.constant 0 : index
    %c0_83 = arith.constant 0 : index
    %97 = vector.load %arg3[%c1_81, %c0_82, %c0_83] : memref<9x16x64xbf16, #tpu.memory_space<vmem>>, vector<1x16x64xbf16>
    %98 = vector.shape_cast %97 : vector<1x16x64xbf16> to vector<16x64xbf16>
    %cst_84 = arith.constant dense<0.000000e+00> : vector<16x128xf32>
    %99 = tpu.matmul %98, %87, %cst_84 {dimension_numbers = #tpu.dot_dimension_numbers<[1], [0], [0], [1], [0, 0, 1, 1], [], []>} : vector<16x64xbf16>, vector<64x128xbf16>, vector<16x128xf32> -> vector<16x128xf32>
    %100 = arith.truncf %99 : vector<16x128xf32> to vector<16x128xbf16>
    %c1_85 = arith.constant 1 : index
    %c0_86 = arith.constant 0 : index
    %c0_87 = arith.constant 0 : index
    %101 = vector.load %arg6[%c1_85, %c0_86, %c0_87] : memref<9x128x128xbf16, #tpu.memory_space<vmem>>, vector<1x128x128xbf16>
    %102 = vector.shape_cast %101 : vector<1x128x128xbf16> to vector<128x128xbf16>
    %cst_88 = arith.constant dense<0.000000e+00> : vector<16x128xf32>
    %103 = tpu.matmul %100, %102, %cst_88 {dimension_numbers = #tpu.dot_dimension_numbers<[1], [0], [0], [1], [0, 0, 1, 1], [], []>} : vector<16x128xbf16>, vector<128x128xbf16>, vector<16x128xf32> -> vector<16x128xf32>
    %104 = arith.addf %96, %103 : vector<16x128xf32>
    %c2_89 = arith.constant 2 : index
    %c0_90 = arith.constant 0 : index
    %c0_91 = arith.constant 0 : index
    %105 = vector.load %arg3[%c2_89, %c0_90, %c0_91] : memref<9x16x64xbf16, #tpu.memory_space<vmem>>, vector<1x16x64xbf16>
    %106 = vector.shape_cast %105 : vector<1x16x64xbf16> to vector<16x64xbf16>
    %cst_92 = arith.constant dense<0.000000e+00> : vector<16x128xf32>
    %107 = tpu.matmul %106, %87, %cst_92 {dimension_numbers = #tpu.dot_dimension_numbers<[1], [0], [0], [1], [0, 0, 1, 1], [], []>} : vector<16x64xbf16>, vector<64x128xbf16>, vector<16x128xf32> -> vector<16x128xf32>
    %108 = arith.truncf %107 : vector<16x128xf32> to vector<16x128xbf16>
    %c2_93 = arith.constant 2 : index
    %c0_94 = arith.constant 0 : index
    %c0_95 = arith.constant 0 : index
    %109 = vector.load %arg6[%c2_93, %c0_94, %c0_95] : memref<9x128x128xbf16, #tpu.memory_space<vmem>>, vector<1x128x128xbf16>
    %110 = vector.shape_cast %109 : vector<1x128x128xbf16> to vector<128x128xbf16>
    %cst_96 = arith.constant dense<0.000000e+00> : vector<16x128xf32>
    %111 = tpu.matmul %108, %110, %cst_96 {dimension_numbers = #tpu.dot_dimension_numbers<[1], [0], [0], [1], [0, 0, 1, 1], [], []>} : vector<16x128xbf16>, vector<128x128xbf16>, vector<16x128xf32> -> vector<16x128xf32>
    %112 = arith.addf %104, %111 : vector<16x128xf32>
    %c3_97 = arith.constant 3 : index
    %c0_98 = arith.constant 0 : index
    %c0_99 = arith.constant 0 : index
    %113 = vector.load %arg3[%c3_97, %c0_98, %c0_99] : memref<9x16x64xbf16, #tpu.memory_space<vmem>>, vector<1x16x64xbf16>
    %114 = vector.shape_cast %113 : vector<1x16x64xbf16> to vector<16x64xbf16>
    %cst_100 = arith.constant dense<0.000000e+00> : vector<16x128xf32>
    %115 = tpu.matmul %114, %87, %cst_100 {dimension_numbers = #tpu.dot_dimension_numbers<[1], [0], [0], [1], [0, 0, 1, 1], [], []>} : vector<16x64xbf16>, vector<64x128xbf16>, vector<16x128xf32> -> vector<16x128xf32>
    %116 = arith.truncf %115 : vector<16x128xf32> to vector<16x128xbf16>
    %c3_101 = arith.constant 3 : index
    %c0_102 = arith.constant 0 : index
    %c0_103 = arith.constant 0 : index
    %117 = vector.load %arg6[%c3_101, %c0_102, %c0_103] : memref<9x128x128xbf16, #tpu.memory_space<vmem>>, vector<1x128x128xbf16>
    %118 = vector.shape_cast %117 : vector<1x128x128xbf16> to vector<128x128xbf16>
    %cst_104 = arith.constant dense<0.000000e+00> : vector<16x128xf32>
    %119 = tpu.matmul %116, %118, %cst_104 {dimension_numbers = #tpu.dot_dimension_numbers<[1], [0], [0], [1], [0, 0, 1, 1], [], []>} : vector<16x128xbf16>, vector<128x128xbf16>, vector<16x128xf32> -> vector<16x128xf32>
    %120 = arith.addf %112, %119 : vector<16x128xf32>
    %c4_105 = arith.constant 4 : index
    %c0_106 = arith.constant 0 : index
    %c0_107 = arith.constant 0 : index
    %121 = vector.load %arg3[%c4_105, %c0_106, %c0_107] : memref<9x16x64xbf16, #tpu.memory_space<vmem>>, vector<1x16x64xbf16>
    %122 = vector.shape_cast %121 : vector<1x16x64xbf16> to vector<16x64xbf16>
    %cst_108 = arith.constant dense<0.000000e+00> : vector<16x128xf32>
    %123 = tpu.matmul %122, %87, %cst_108 {dimension_numbers = #tpu.dot_dimension_numbers<[1], [0], [0], [1], [0, 0, 1, 1], [], []>} : vector<16x64xbf16>, vector<64x128xbf16>, vector<16x128xf32> -> vector<16x128xf32>
    %124 = arith.truncf %123 : vector<16x128xf32> to vector<16x128xbf16>
    %c4_109 = arith.constant 4 : index
    %c0_110 = arith.constant 0 : index
    %c0_111 = arith.constant 0 : index
    %125 = vector.load %arg6[%c4_109, %c0_110, %c0_111] : memref<9x128x128xbf16, #tpu.memory_space<vmem>>, vector<1x128x128xbf16>
    %126 = vector.shape_cast %125 : vector<1x128x128xbf16> to vector<128x128xbf16>
    %cst_112 = arith.constant dense<0.000000e+00> : vector<16x128xf32>
    %127 = tpu.matmul %124, %126, %cst_112 {dimension_numbers = #tpu.dot_dimension_numbers<[1], [0], [0], [1], [0, 0, 1, 1], [], []>} : vector<16x128xbf16>, vector<128x128xbf16>, vector<16x128xf32> -> vector<16x128xf32>
    %128 = arith.addf %120, %127 : vector<16x128xf32>
    %c5_113 = arith.constant 5 : index
    %c0_114 = arith.constant 0 : index
    %c0_115 = arith.constant 0 : index
    %129 = vector.load %arg3[%c5_113, %c0_114, %c0_115] : memref<9x16x64xbf16, #tpu.memory_space<vmem>>, vector<1x16x64xbf16>
    %130 = vector.shape_cast %129 : vector<1x16x64xbf16> to vector<16x64xbf16>
    %cst_116 = arith.constant dense<0.000000e+00> : vector<16x128xf32>
    %131 = tpu.matmul %130, %87, %cst_116 {dimension_numbers = #tpu.dot_dimension_numbers<[1], [0], [0], [1], [0, 0, 1, 1], [], []>} : vector<16x64xbf16>, vector<64x128xbf16>, vector<16x128xf32> -> vector<16x128xf32>
    %132 = arith.truncf %131 : vector<16x128xf32> to vector<16x128xbf16>
    %c5_117 = arith.constant 5 : index
    %c0_118 = arith.constant 0 : index
    %c0_119 = arith.constant 0 : index
    %133 = vector.load %arg6[%c5_117, %c0_118, %c0_119] : memref<9x128x128xbf16, #tpu.memory_space<vmem>>, vector<1x128x128xbf16>
    %134 = vector.shape_cast %133 : vector<1x128x128xbf16> to vector<128x128xbf16>
    %cst_120 = arith.constant dense<0.000000e+00> : vector<16x128xf32>
    %135 = tpu.matmul %132, %134, %cst_120 {dimension_numbers = #tpu.dot_dimension_numbers<[1], [0], [0], [1], [0, 0, 1, 1], [], []>} : vector<16x128xbf16>, vector<128x128xbf16>, vector<16x128xf32> -> vector<16x128xf32>
    %136 = arith.addf %128, %135 : vector<16x128xf32>
    %c6_121 = arith.constant 6 : index
    %c0_122 = arith.constant 0 : index
    %c0_123 = arith.constant 0 : index
    %137 = vector.load %arg3[%c6_121, %c0_122, %c0_123] : memref<9x16x64xbf16, #tpu.memory_space<vmem>>, vector<1x16x64xbf16>
    %138 = vector.shape_cast %137 : vector<1x16x64xbf16> to vector<16x64xbf16>
    %cst_124 = arith.constant dense<0.000000e+00> : vector<16x128xf32>
    %139 = tpu.matmul %138, %87, %cst_124 {dimension_numbers = #tpu.dot_dimension_numbers<[1], [0], [0], [1], [0, 0, 1, 1], [], []>} : vector<16x64xbf16>, vector<64x128xbf16>, vector<16x128xf32> -> vector<16x128xf32>
    %140 = arith.truncf %139 : vector<16x128xf32> to vector<16x128xbf16>
    %c6_125 = arith.constant 6 : index
    %c0_126 = arith.constant 0 : index
    %c0_127 = arith.constant 0 : index
    %141 = vector.load %arg6[%c6_125, %c0_126, %c0_127] : memref<9x128x128xbf16, #tpu.memory_space<vmem>>, vector<1x128x128xbf16>
    %142 = vector.shape_cast %141 : vector<1x128x128xbf16> to vector<128x128xbf16>
    %cst_128 = arith.constant dense<0.000000e+00> : vector<16x128xf32>
    %143 = tpu.matmul %140, %142, %cst_128 {dimension_numbers = #tpu.dot_dimension_numbers<[1], [0], [0], [1], [0, 0, 1, 1], [], []>} : vector<16x128xbf16>, vector<128x128xbf16>, vector<16x128xf32> -> vector<16x128xf32>
    %144 = arith.addf %136, %143 : vector<16x128xf32>
    %c7_129 = arith.constant 7 : index
    %c0_130 = arith.constant 0 : index
    %c0_131 = arith.constant 0 : index
    %145 = vector.load %arg3[%c7_129, %c0_130, %c0_131] : memref<9x16x64xbf16, #tpu.memory_space<vmem>>, vector<1x16x64xbf16>
    %146 = vector.shape_cast %145 : vector<1x16x64xbf16> to vector<16x64xbf16>
    %cst_132 = arith.constant dense<0.000000e+00> : vector<16x128xf32>
    %147 = tpu.matmul %146, %87, %cst_132 {dimension_numbers = #tpu.dot_dimension_numbers<[1], [0], [0], [1], [0, 0, 1, 1], [], []>} : vector<16x64xbf16>, vector<64x128xbf16>, vector<16x128xf32> -> vector<16x128xf32>
    %148 = arith.truncf %147 : vector<16x128xf32> to vector<16x128xbf16>
    %c7_133 = arith.constant 7 : index
    %c0_134 = arith.constant 0 : index
    %c0_135 = arith.constant 0 : index
    %149 = vector.load %arg6[%c7_133, %c0_134, %c0_135] : memref<9x128x128xbf16, #tpu.memory_space<vmem>>, vector<1x128x128xbf16>
    %150 = vector.shape_cast %149 : vector<1x128x128xbf16> to vector<128x128xbf16>
    %cst_136 = arith.constant dense<0.000000e+00> : vector<16x128xf32>
    %151 = tpu.matmul %148, %150, %cst_136 {dimension_numbers = #tpu.dot_dimension_numbers<[1], [0], [0], [1], [0, 0, 1, 1], [], []>} : vector<16x128xbf16>, vector<128x128xbf16>, vector<16x128xf32> -> vector<16x128xf32>
    %152 = arith.addf %144, %151 : vector<16x128xf32>
    %c8_137 = arith.constant 8 : index
    %c0_138 = arith.constant 0 : index
    %c0_139 = arith.constant 0 : index
    %153 = vector.load %arg3[%c8_137, %c0_138, %c0_139] : memref<9x16x64xbf16, #tpu.memory_space<vmem>>, vector<1x16x64xbf16>
    %154 = vector.shape_cast %153 : vector<1x16x64xbf16> to vector<16x64xbf16>
    %cst_140 = arith.constant dense<0.000000e+00> : vector<16x128xf32>
    %155 = tpu.matmul %154, %87, %cst_140 {dimension_numbers = #tpu.dot_dimension_numbers<[1], [0], [0], [1], [0, 0, 1, 1], [], []>} : vector<16x64xbf16>, vector<64x128xbf16>, vector<16x128xf32> -> vector<16x128xf32>
    %156 = arith.truncf %155 : vector<16x128xf32> to vector<16x128xbf16>
    %c8_141 = arith.constant 8 : index
    %c0_142 = arith.constant 0 : index
    %c0_143 = arith.constant 0 : index
    %157 = vector.load %arg6[%c8_141, %c0_142, %c0_143] : memref<9x128x128xbf16, #tpu.memory_space<vmem>>, vector<1x128x128xbf16>
    %158 = vector.shape_cast %157 : vector<1x128x128xbf16> to vector<128x128xbf16>
    %cst_144 = arith.constant dense<0.000000e+00> : vector<16x128xf32>
    %159 = tpu.matmul %156, %158, %cst_144 {dimension_numbers = #tpu.dot_dimension_numbers<[1], [0], [0], [1], [0, 0, 1, 1], [], []>} : vector<16x128xbf16>, vector<128x128xbf16>, vector<16x128xf32> -> vector<16x128xf32>
    %160 = arith.addf %152, %159 : vector<16x128xf32>
    %c1_145 = arith.constant 1 : index
    %c0_146 = arith.constant 0 : index
    %c0_147 = arith.constant 0 : index
    %161 = vector.load %arg11[%c1_145, %c0_146, %c0_147] : memref<6x1x128xf32, #tpu.memory_space<vmem>>, vector<1x1x128xf32>
    %162 = vector.shape_cast %161 : vector<1x1x128xf32> to vector<1x128xf32>
    %163 = vector.broadcast %162 : vector<1x128xf32> to vector<16x128xf32>
    %164 = arith.addf %160, %163 : vector<16x128xf32>
    %c0_148 = arith.constant 0 : index
    %c1_149 = arith.constant 1 : index
    %165 = memref.load %arg14[%c0_148, %c1_149] : memref<1x7xf32, #tpu.memory_space<smem>>
    %cst_150 = arith.constant 0.000000e+00 : f32
    %166 = vector.broadcast %cst_150 : f32 to vector<16x128xf32>
    %167 = arith.cmpf ogt, %164, %166 : vector<16x128xf32>
    %168 = vector.broadcast %165 : f32 to vector<16x128xf32>
    %169 = arith.mulf %168, %164 : vector<16x128xf32>
    %170 = arith.select %167, %164, %169 : vector<16x128xi1>, vector<16x128xf32>
    %c64_i32_151 = arith.constant 64 : i32
    %171 = tpu.dynamic_rotate %164 by %c64_i32_151 dim 1 : vector<16x128xf32>, i32 -> vector<16x128xf32>
    %172 = arith.addf %170, %171 : vector<16x128xf32>
    %173 = arith.truncf %172 : vector<16x128xf32> to vector<16x128xbf16>
    %cst_152 = arith.constant 0.000000e+00 : f32
    %174 = vector.broadcast %cst_152 : f32 to vector<4x128xf32>
    %c0_153 = arith.constant 0 : index
    %c0_154 = arith.constant 0 : index
    %c0_155 = arith.constant 0 : index
    %175 = vector.load %arg4[%c0_153, %c0_154, %c0_155] : memref<9x4x16xbf16, #tpu.memory_space<vmem>>, vector<1x4x16xbf16>
    %176 = vector.shape_cast %175 : vector<1x4x16xbf16> to vector<4x16xbf16>
    %cst_156 = arith.constant dense<0.000000e+00> : vector<4x128xf32>
    %177 = tpu.matmul %176, %173, %cst_156 {dimension_numbers = #tpu.dot_dimension_numbers<[1], [0], [0], [1], [0, 0, 1, 1], [], []>} : vector<4x16xbf16>, vector<16x128xbf16>, vector<4x128xf32> -> vector<4x128xf32>
    %178 = arith.truncf %177 : vector<4x128xf32> to vector<4x128xbf16>
    %c0_157 = arith.constant 0 : index
    %c0_158 = arith.constant 0 : index
    %c0_159 = arith.constant 0 : index
    %179 = vector.load %arg7[%c0_157, %c0_158, %c0_159] : memref<9x128x128xbf16, #tpu.memory_space<vmem>>, vector<1x128x128xbf16>
    %180 = vector.shape_cast %179 : vector<1x128x128xbf16> to vector<128x128xbf16>
    %cst_160 = arith.constant dense<0.000000e+00> : vector<4x128xf32>
    %181 = tpu.matmul %178, %180, %cst_160 {dimension_numbers = #tpu.dot_dimension_numbers<[1], [0], [0], [1], [0, 0, 1, 1], [], []>} : vector<4x128xbf16>, vector<128x128xbf16>, vector<4x128xf32> -> vector<4x128xf32>
    %182 = arith.addf %174, %181 : vector<4x128xf32>
    %c1_161 = arith.constant 1 : index
    %c0_162 = arith.constant 0 : index
    %c0_163 = arith.constant 0 : index
    %183 = vector.load %arg4[%c1_161, %c0_162, %c0_163] : memref<9x4x16xbf16, #tpu.memory_space<vmem>>, vector<1x4x16xbf16>
    %184 = vector.shape_cast %183 : vector<1x4x16xbf16> to vector<4x16xbf16>
    %cst_164 = arith.constant dense<0.000000e+00> : vector<4x128xf32>
    %185 = tpu.matmul %184, %173, %cst_164 {dimension_numbers = #tpu.dot_dimension_numbers<[1], [0], [0], [1], [0, 0, 1, 1], [], []>} : vector<4x16xbf16>, vector<16x128xbf16>, vector<4x128xf32> -> vector<4x128xf32>
    %186 = arith.truncf %185 : vector<4x128xf32> to vector<4x128xbf16>
    %c1_165 = arith.constant 1 : index
    %c0_166 = arith.constant 0 : index
    %c0_167 = arith.constant 0 : index
    %187 = vector.load %arg7[%c1_165, %c0_166, %c0_167] : memref<9x128x128xbf16, #tpu.memory_space<vmem>>, vector<1x128x128xbf16>
    %188 = vector.shape_cast %187 : vector<1x128x128xbf16> to vector<128x128xbf16>
    %cst_168 = arith.constant dense<0.000000e+00> : vector<4x128xf32>
    %189 = tpu.matmul %186, %188, %cst_168 {dimension_numbers = #tpu.dot_dimension_numbers<[1], [0], [0], [1], [0, 0, 1, 1], [], []>} : vector<4x128xbf16>, vector<128x128xbf16>, vector<4x128xf32> -> vector<4x128xf32>
    %190 = arith.addf %182, %189 : vector<4x128xf32>
    %c2_169 = arith.constant 2 : index
    %c0_170 = arith.constant 0 : index
    %c0_171 = arith.constant 0 : index
    %191 = vector.load %arg4[%c2_169, %c0_170, %c0_171] : memref<9x4x16xbf16, #tpu.memory_space<vmem>>, vector<1x4x16xbf16>
    %192 = vector.shape_cast %191 : vector<1x4x16xbf16> to vector<4x16xbf16>
    %cst_172 = arith.constant dense<0.000000e+00> : vector<4x128xf32>
    %193 = tpu.matmul %192, %173, %cst_172 {dimension_numbers = #tpu.dot_dimension_numbers<[1], [0], [0], [1], [0, 0, 1, 1], [], []>} : vector<4x16xbf16>, vector<16x128xbf16>, vector<4x128xf32> -> vector<4x128xf32>
    %194 = arith.truncf %193 : vector<4x128xf32> to vector<4x128xbf16>
    %c2_173 = arith.constant 2 : index
    %c0_174 = arith.constant 0 : index
    %c0_175 = arith.constant 0 : index
    %195 = vector.load %arg7[%c2_173, %c0_174, %c0_175] : memref<9x128x128xbf16, #tpu.memory_space<vmem>>, vector<1x128x128xbf16>
    %196 = vector.shape_cast %195 : vector<1x128x128xbf16> to vector<128x128xbf16>
    %cst_176 = arith.constant dense<0.000000e+00> : vector<4x128xf32>
    %197 = tpu.matmul %194, %196, %cst_176 {dimension_numbers = #tpu.dot_dimension_numbers<[1], [0], [0], [1], [0, 0, 1, 1], [], []>} : vector<4x128xbf16>, vector<128x128xbf16>, vector<4x128xf32> -> vector<4x128xf32>
    %198 = arith.addf %190, %197 : vector<4x128xf32>
    %c3_177 = arith.constant 3 : index
    %c0_178 = arith.constant 0 : index
    %c0_179 = arith.constant 0 : index
    %199 = vector.load %arg4[%c3_177, %c0_178, %c0_179] : memref<9x4x16xbf16, #tpu.memory_space<vmem>>, vector<1x4x16xbf16>
    %200 = vector.shape_cast %199 : vector<1x4x16xbf16> to vector<4x16xbf16>
    %cst_180 = arith.constant dense<0.000000e+00> : vector<4x128xf32>
    %201 = tpu.matmul %200, %173, %cst_180 {dimension_numbers = #tpu.dot_dimension_numbers<[1], [0], [0], [1], [0, 0, 1, 1], [], []>} : vector<4x16xbf16>, vector<16x128xbf16>, vector<4x128xf32> -> vector<4x128xf32>
    %202 = arith.truncf %201 : vector<4x128xf32> to vector<4x128xbf16>
    %c3_181 = arith.constant 3 : index
    %c0_182 = arith.constant 0 : index
    %c0_183 = arith.constant 0 : index
    %203 = vector.load %arg7[%c3_181, %c0_182, %c0_183] : memref<9x128x128xbf16, #tpu.memory_space<vmem>>, vector<1x128x128xbf16>
    %204 = vector.shape_cast %203 : vector<1x128x128xbf16> to vector<128x128xbf16>
    %cst_184 = arith.constant dense<0.000000e+00> : vector<4x128xf32>
    %205 = tpu.matmul %202, %204, %cst_184 {dimension_numbers = #tpu.dot_dimension_numbers<[1], [0], [0], [1], [0, 0, 1, 1], [], []>} : vector<4x128xbf16>, vector<128x128xbf16>, vector<4x128xf32> -> vector<4x128xf32>
    %206 = arith.addf %198, %205 : vector<4x128xf32>
    %c4_185 = arith.constant 4 : index
    %c0_186 = arith.constant 0 : index
    %c0_187 = arith.constant 0 : index
    %207 = vector.load %arg4[%c4_185, %c0_186, %c0_187] : memref<9x4x16xbf16, #tpu.memory_space<vmem>>, vector<1x4x16xbf16>
    %208 = vector.shape_cast %207 : vector<1x4x16xbf16> to vector<4x16xbf16>
    %cst_188 = arith.constant dense<0.000000e+00> : vector<4x128xf32>
    %209 = tpu.matmul %208, %173, %cst_188 {dimension_numbers = #tpu.dot_dimension_numbers<[1], [0], [0], [1], [0, 0, 1, 1], [], []>} : vector<4x16xbf16>, vector<16x128xbf16>, vector<4x128xf32> -> vector<4x128xf32>
    %210 = arith.truncf %209 : vector<4x128xf32> to vector<4x128xbf16>
    %c4_189 = arith.constant 4 : index
    %c0_190 = arith.constant 0 : index
    %c0_191 = arith.constant 0 : index
    %211 = vector.load %arg7[%c4_189, %c0_190, %c0_191] : memref<9x128x128xbf16, #tpu.memory_space<vmem>>, vector<1x128x128xbf16>
    %212 = vector.shape_cast %211 : vector<1x128x128xbf16> to vector<128x128xbf16>
    %cst_192 = arith.constant dense<0.000000e+00> : vector<4x128xf32>
    %213 = tpu.matmul %210, %212, %cst_192 {dimension_numbers = #tpu.dot_dimension_numbers<[1], [0], [0], [1], [0, 0, 1, 1], [], []>} : vector<4x128xbf16>, vector<128x128xbf16>, vector<4x128xf32> -> vector<4x128xf32>
    %214 = arith.addf %206, %213 : vector<4x128xf32>
    %c5_193 = arith.constant 5 : index
    %c0_194 = arith.constant 0 : index
    %c0_195 = arith.constant 0 : index
    %215 = vector.load %arg4[%c5_193, %c0_194, %c0_195] : memref<9x4x16xbf16, #tpu.memory_space<vmem>>, vector<1x4x16xbf16>
    %216 = vector.shape_cast %215 : vector<1x4x16xbf16> to vector<4x16xbf16>
    %cst_196 = arith.constant dense<0.000000e+00> : vector<4x128xf32>
    %217 = tpu.matmul %216, %173, %cst_196 {dimension_numbers = #tpu.dot_dimension_numbers<[1], [0], [0], [1], [0, 0, 1, 1], [], []>} : vector<4x16xbf16>, vector<16x128xbf16>, vector<4x128xf32> -> vector<4x128xf32>
    %218 = arith.truncf %217 : vector<4x128xf32> to vector<4x128xbf16>
    %c5_197 = arith.constant 5 : index
    %c0_198 = arith.constant 0 : index
    %c0_199 = arith.constant 0 : index
    %219 = vector.load %arg7[%c5_197, %c0_198, %c0_199] : memref<9x128x128xbf16, #tpu.memory_space<vmem>>, vector<1x128x128xbf16>
    %220 = vector.shape_cast %219 : vector<1x128x128xbf16> to vector<128x128xbf16>
    %cst_200 = arith.constant dense<0.000000e+00> : vector<4x128xf32>
    %221 = tpu.matmul %218, %220, %cst_200 {dimension_numbers = #tpu.dot_dimension_numbers<[1], [0], [0], [1], [0, 0, 1, 1], [], []>} : vector<4x128xbf16>, vector<128x128xbf16>, vector<4x128xf32> -> vector<4x128xf32>
    %222 = arith.addf %214, %221 : vector<4x128xf32>
    %c6_201 = arith.constant 6 : index
    %c0_202 = arith.constant 0 : index
    %c0_203 = arith.constant 0 : index
    %223 = vector.load %arg4[%c6_201, %c0_202, %c0_203] : memref<9x4x16xbf16, #tpu.memory_space<vmem>>, vector<1x4x16xbf16>
    %224 = vector.shape_cast %223 : vector<1x4x16xbf16> to vector<4x16xbf16>
    %cst_204 = arith.constant dense<0.000000e+00> : vector<4x128xf32>
    %225 = tpu.matmul %224, %173, %cst_204 {dimension_numbers = #tpu.dot_dimension_numbers<[1], [0], [0], [1], [0, 0, 1, 1], [], []>} : vector<4x16xbf16>, vector<16x128xbf16>, vector<4x128xf32> -> vector<4x128xf32>
    %226 = arith.truncf %225 : vector<4x128xf32> to vector<4x128xbf16>
    %c6_205 = arith.constant 6 : index
    %c0_206 = arith.constant 0 : index
    %c0_207 = arith.constant 0 : index
    %227 = vector.load %arg7[%c6_205, %c0_206, %c0_207] : memref<9x128x128xbf16, #tpu.memory_space<vmem>>, vector<1x128x128xbf16>
    %228 = vector.shape_cast %227 : vector<1x128x128xbf16> to vector<128x128xbf16>
    %cst_208 = arith.constant dense<0.000000e+00> : vector<4x128xf32>
    %229 = tpu.matmul %226, %228, %cst_208 {dimension_numbers = #tpu.dot_dimension_numbers<[1], [0], [0], [1], [0, 0, 1, 1], [], []>} : vector<4x128xbf16>, vector<128x128xbf16>, vector<4x128xf32> -> vector<4x128xf32>
    %230 = arith.addf %222, %229 : vector<4x128xf32>
    %c7_209 = arith.constant 7 : index
    %c0_210 = arith.constant 0 : index
    %c0_211 = arith.constant 0 : index
    %231 = vector.load %arg4[%c7_209, %c0_210, %c0_211] : memref<9x4x16xbf16, #tpu.memory_space<vmem>>, vector<1x4x16xbf16>
    %232 = vector.shape_cast %231 : vector<1x4x16xbf16> to vector<4x16xbf16>
    %cst_212 = arith.constant dense<0.000000e+00> : vector<4x128xf32>
    %233 = tpu.matmul %232, %173, %cst_212 {dimension_numbers = #tpu.dot_dimension_numbers<[1], [0], [0], [1], [0, 0, 1, 1], [], []>} : vector<4x16xbf16>, vector<16x128xbf16>, vector<4x128xf32> -> vector<4x128xf32>
    %234 = arith.truncf %233 : vector<4x128xf32> to vector<4x128xbf16>
    %c7_213 = arith.constant 7 : index
    %c0_214 = arith.constant 0 : index
    %c0_215 = arith.constant 0 : index
    %235 = vector.load %arg7[%c7_213, %c0_214, %c0_215] : memref<9x128x128xbf16, #tpu.memory_space<vmem>>, vector<1x128x128xbf16>
    %236 = vector.shape_cast %235 : vector<1x128x128xbf16> to vector<128x128xbf16>
    %cst_216 = arith.constant dense<0.000000e+00> : vector<4x128xf32>
    %237 = tpu.matmul %234, %236, %cst_216 {dimension_numbers = #tpu.dot_dimension_numbers<[1], [0], [0], [1], [0, 0, 1, 1], [], []>} : vector<4x128xbf16>, vector<128x128xbf16>, vector<4x128xf32> -> vector<4x128xf32>
    %238 = arith.addf %230, %237 : vector<4x128xf32>
    %c8_217 = arith.constant 8 : index
    %c0_218 = arith.constant 0 : index
    %c0_219 = arith.constant 0 : index
    %239 = vector.load %arg4[%c8_217, %c0_218, %c0_219] : memref<9x4x16xbf16, #tpu.memory_space<vmem>>, vector<1x4x16xbf16>
    %240 = vector.shape_cast %239 : vector<1x4x16xbf16> to vector<4x16xbf16>
    %cst_220 = arith.constant dense<0.000000e+00> : vector<4x128xf32>
    %241 = tpu.matmul %240, %173, %cst_220 {dimension_numbers = #tpu.dot_dimension_numbers<[1], [0], [0], [1], [0, 0, 1, 1], [], []>} : vector<4x16xbf16>, vector<16x128xbf16>, vector<4x128xf32> -> vector<4x128xf32>
    %242 = arith.truncf %241 : vector<4x128xf32> to vector<4x128xbf16>
    %c8_221 = arith.constant 8 : index
    %c0_222 = arith.constant 0 : index
    %c0_223 = arith.constant 0 : index
    %243 = vector.load %arg7[%c8_221, %c0_222, %c0_223] : memref<9x128x128xbf16, #tpu.memory_space<vmem>>, vector<1x128x128xbf16>
    %244 = vector.shape_cast %243 : vector<1x128x128xbf16> to vector<128x128xbf16>
    %cst_224 = arith.constant dense<0.000000e+00> : vector<4x128xf32>
    %245 = tpu.matmul %242, %244, %cst_224 {dimension_numbers = #tpu.dot_dimension_numbers<[1], [0], [0], [1], [0, 0, 1, 1], [], []>} : vector<4x128xbf16>, vector<128x128xbf16>, vector<4x128xf32> -> vector<4x128xf32>
    %246 = arith.addf %238, %245 : vector<4x128xf32>
    %c2_225 = arith.constant 2 : index
    %c0_226 = arith.constant 0 : index
    %c0_227 = arith.constant 0 : index
    %247 = vector.load %arg11[%c2_225, %c0_226, %c0_227] : memref<6x1x128xf32, #tpu.memory_space<vmem>>, vector<1x1x128xf32>
    %248 = vector.shape_cast %247 : vector<1x1x128xf32> to vector<1x128xf32>
    %249 = vector.broadcast %248 : vector<1x128xf32> to vector<4x128xf32>
    %250 = arith.addf %246, %249 : vector<4x128xf32>
    %c0_228 = arith.constant 0 : index
    %c2_229 = arith.constant 2 : index
    %251 = memref.load %arg14[%c0_228, %c2_229] : memref<1x7xf32, #tpu.memory_space<smem>>
    %cst_230 = arith.constant 0.000000e+00 : f32
    %252 = vector.broadcast %cst_230 : f32 to vector<4x128xf32>
    %253 = arith.cmpf ogt, %250, %252 : vector<4x128xf32>
    %254 = vector.broadcast %251 : f32 to vector<4x128xf32>
    %255 = arith.mulf %254, %250 : vector<4x128xf32>
    %256 = arith.select %253, %250, %255 : vector<4x128xi1>, vector<4x128xf32>
    %c64_i32_231 = arith.constant 64 : i32
    %257 = tpu.dynamic_rotate %250 by %c64_i32_231 dim 1 : vector<4x128xf32>, i32 -> vector<4x128xf32>
    %258 = arith.addf %256, %257 : vector<4x128xf32>
    %259 = arith.truncf %258 : vector<4x128xf32> to vector<4x128xbf16>
    %cst_232 = arith.constant 0.000000e+00 : f32
    %260 = vector.broadcast %cst_232 : f32 to vector<1x128xf32>
    %261 = vector.extract_strided_slice %259 {offsets = [0, 0], sizes = [1, 128], strides = [1, 1]} : vector<4x128xbf16> to vector<1x128xbf16>
    %c0_233 = arith.constant 0 : index
    %c0_234 = arith.constant 0 : index
    %c0_235 = arith.constant 0 : index
    %262 = vector.load %arg8[%c0_233, %c0_234, %c0_235] : memref<4x128x128xbf16, #tpu.memory_space<vmem>>, vector<1x128x128xbf16>
    %263 = vector.shape_cast %262 : vector<1x128x128xbf16> to vector<128x128xbf16>
    %cst_236 = arith.constant dense<0.000000e+00> : vector<1x128xf32>
    %264 = tpu.matmul %261, %263, %cst_236 {dimension_numbers = #tpu.dot_dimension_numbers<[1], [0], [0], [1], [0, 0, 1, 1], [], []>} : vector<1x128xbf16>, vector<128x128xbf16>, vector<1x128xf32> -> vector<1x128xf32>
    %265 = arith.addf %260, %264 : vector<1x128xf32>
    %266 = vector.extract_strided_slice %259 {offsets = [1, 0], sizes = [1, 128], strides = [1, 1]} : vector<4x128xbf16> to vector<1x128xbf16>
    %c1_237 = arith.constant 1 : index
    %c0_238 = arith.constant 0 : index
    %c0_239 = arith.constant 0 : index
    %267 = vector.load %arg8[%c1_237, %c0_238, %c0_239] : memref<4x128x128xbf16, #tpu.memory_space<vmem>>, vector<1x128x128xbf16>
    %268 = vector.shape_cast %267 : vector<1x128x128xbf16> to vector<128x128xbf16>
    %cst_240 = arith.constant dense<0.000000e+00> : vector<1x128xf32>
    %269 = tpu.matmul %266, %268, %cst_240 {dimension_numbers = #tpu.dot_dimension_numbers<[1], [0], [0], [1], [0, 0, 1, 1], [], []>} : vector<1x128xbf16>, vector<128x128xbf16>, vector<1x128xf32> -> vector<1x128xf32>
    %270 = arith.addf %265, %269 : vector<1x128xf32>
    %271 = vector.extract_strided_slice %259 {offsets = [2, 0], sizes = [1, 128], strides = [1, 1]} : vector<4x128xbf16> to vector<1x128xbf16>
    %c2_241 = arith.constant 2 : index
    %c0_242 = arith.constant 0 : index
    %c0_243 = arith.constant 0 : index
    %272 = vector.load %arg8[%c2_241, %c0_242, %c0_243] : memref<4x128x128xbf16, #tpu.memory_space<vmem>>, vector<1x128x128xbf16>
    %273 = vector.shape_cast %272 : vector<1x128x128xbf16> to vector<128x128xbf16>
    %cst_244 = arith.constant dense<0.000000e+00> : vector<1x128xf32>
    %274 = tpu.matmul %271, %273, %cst_244 {dimension_numbers = #tpu.dot_dimension_numbers<[1], [0], [0], [1], [0, 0, 1, 1], [], []>} : vector<1x128xbf16>, vector<128x128xbf16>, vector<1x128xf32> -> vector<1x128xf32>
    %275 = arith.addf %270, %274 : vector<1x128xf32>
    %276 = vector.extract_strided_slice %259 {offsets = [3, 0], sizes = [1, 128], strides = [1, 1]} : vector<4x128xbf16> to vector<1x128xbf16>
    %c3_245 = arith.constant 3 : index
    %c0_246 = arith.constant 0 : index
    %c0_247 = arith.constant 0 : index
    %277 = vector.load %arg8[%c3_245, %c0_246, %c0_247] : memref<4x128x128xbf16, #tpu.memory_space<vmem>>, vector<1x128x128xbf16>
    %278 = vector.shape_cast %277 : vector<1x128x128xbf16> to vector<128x128xbf16>
    %cst_248 = arith.constant dense<0.000000e+00> : vector<1x128xf32>
    %279 = tpu.matmul %276, %278, %cst_248 {dimension_numbers = #tpu.dot_dimension_numbers<[1], [0], [0], [1], [0, 0, 1, 1], [], []>} : vector<1x128xbf16>, vector<128x128xbf16>, vector<1x128xf32> -> vector<1x128xf32>
    %280 = arith.addf %275, %279 : vector<1x128xf32>
    %c3_249 = arith.constant 3 : index
    %c0_250 = arith.constant 0 : index
    %c0_251 = arith.constant 0 : index
    %281 = vector.load %arg11[%c3_249, %c0_250, %c0_251] : memref<6x1x128xf32, #tpu.memory_space<vmem>>, vector<1x1x128xf32>
    %282 = vector.shape_cast %281 : vector<1x1x128xf32> to vector<1x128xf32>
    %283 = arith.addf %280, %282 : vector<1x128xf32>
    %c0_252 = arith.constant 0 : index
    %c3_253 = arith.constant 3 : index
    %284 = memref.load %arg14[%c0_252, %c3_253] : memref<1x7xf32, #tpu.memory_space<smem>>
    %cst_254 = arith.constant 0.000000e+00 : f32
    %285 = vector.broadcast %cst_254 : f32 to vector<1x128xf32>
    %286 = arith.cmpf ogt, %283, %285 : vector<1x128xf32>
    %287 = vector.broadcast %284 : f32 to vector<1x128xf32>
    %288 = arith.mulf %287, %283 : vector<1x128xf32>
    %289 = arith.select %286, %283, %288 : vector<1x128xi1>, vector<1x128xf32>
    %c64_i32_255 = arith.constant 64 : i32
    %290 = tpu.dynamic_rotate %283 by %c64_i32_255 dim 1 : vector<1x128xf32>, i32 -> vector<1x128xf32>
    %291 = arith.addf %289, %290 : vector<1x128xf32>
    %292 = arith.truncf %291 : vector<1x128xf32> to vector<1x128xbf16>
    %cst_256 = arith.constant 0.000000e+00 : f32
    %293 = vector.broadcast %cst_256 : f32 to vector<1x128xf32>
    %c0_257 = arith.constant 0 : index
    %c0_258 = arith.constant 0 : index
    %c0_259 = arith.constant 0 : index
    %294 = vector.load %arg9[%c0_257, %c0_258, %c0_259] : memref<1x128x128xbf16, #tpu.memory_space<vmem>>, vector<1x128x128xbf16>
    %295 = vector.shape_cast %294 : vector<1x128x128xbf16> to vector<128x128xbf16>
    %cst_260 = arith.constant dense<0.000000e+00> : vector<1x128xf32>
    %296 = tpu.matmul %292, %295, %cst_260 {dimension_numbers = #tpu.dot_dimension_numbers<[1], [0], [0], [1], [0, 0, 1, 1], [], []>} : vector<1x128xbf16>, vector<128x128xbf16>, vector<1x128xf32> -> vector<1x128xf32>
    %297 = arith.addf %293, %296 : vector<1x128xf32>
    %c4_261 = arith.constant 4 : index
    %c0_262 = arith.constant 0 : index
    %c0_263 = arith.constant 0 : index
    %298 = vector.load %arg11[%c4_261, %c0_262, %c0_263] : memref<6x1x128xf32, #tpu.memory_space<vmem>>, vector<1x1x128xf32>
    %299 = vector.shape_cast %298 : vector<1x1x128xf32> to vector<1x128xf32>
    %300 = arith.addf %297, %299 : vector<1x128xf32>
    %c0_264 = arith.constant 0 : index
    %c4_265 = arith.constant 4 : index
    %301 = memref.load %arg14[%c0_264, %c4_265] : memref<1x7xf32, #tpu.memory_space<smem>>
    %cst_266 = arith.constant 0.000000e+00 : f32
    %302 = vector.broadcast %cst_266 : f32 to vector<1x128xf32>
    %303 = arith.cmpf ogt, %300, %302 : vector<1x128xf32>
    %304 = vector.broadcast %301 : f32 to vector<1x128xf32>
    %305 = arith.mulf %304, %300 : vector<1x128xf32>
    %306 = arith.select %303, %300, %305 : vector<1x128xi1>, vector<1x128xf32>
    %c64_i32_267 = arith.constant 64 : i32
    %307 = tpu.dynamic_rotate %300 by %c64_i32_267 dim 1 : vector<1x128xf32>, i32 -> vector<1x128xf32>
    %308 = arith.addf %306, %307 : vector<1x128xf32>
    %309 = arith.truncf %308 : vector<1x128xf32> to vector<1x128xbf16>
    %cst_268 = arith.constant 0.000000e+00 : f32
    %310 = vector.broadcast %cst_268 : f32 to vector<1x128xf32>
    %c0_269 = arith.constant 0 : index
    %c0_270 = arith.constant 0 : index
    %c0_271 = arith.constant 0 : index
    %311 = vector.load %arg10[%c0_269, %c0_270, %c0_271] : memref<1x128x128xbf16, #tpu.memory_space<vmem>>, vector<1x128x128xbf16>
    %312 = vector.shape_cast %311 : vector<1x128x128xbf16> to vector<128x128xbf16>
    %cst_272 = arith.constant dense<0.000000e+00> : vector<1x128xf32>
    %313 = tpu.matmul %309, %312, %cst_272 {dimension_numbers = #tpu.dot_dimension_numbers<[1], [0], [0], [1], [0, 0, 1, 1], [], []>} : vector<1x128xbf16>, vector<128x128xbf16>, vector<1x128xf32> -> vector<1x128xf32>
    %314 = arith.addf %310, %313 : vector<1x128xf32>
    %c5_273 = arith.constant 5 : index
    %c0_274 = arith.constant 0 : index
    %c0_275 = arith.constant 0 : index
    %315 = vector.load %arg11[%c5_273, %c0_274, %c0_275] : memref<6x1x128xf32, #tpu.memory_space<vmem>>, vector<1x1x128xf32>
    %316 = vector.shape_cast %315 : vector<1x1x128xf32> to vector<1x128xf32>
    %317 = arith.addf %314, %316 : vector<1x128xf32>
    %c0_276 = arith.constant 0 : index
    %c5_277 = arith.constant 5 : index
    %318 = memref.load %arg14[%c0_276, %c5_277] : memref<1x7xf32, #tpu.memory_space<smem>>
    %cst_278 = arith.constant 0.000000e+00 : f32
    %319 = vector.broadcast %cst_278 : f32 to vector<1x128xf32>
    %320 = arith.cmpf ogt, %317, %319 : vector<1x128xf32>
    %321 = vector.broadcast %318 : f32 to vector<1x128xf32>
    %322 = arith.mulf %321, %317 : vector<1x128xf32>
    %323 = arith.select %320, %317, %322 : vector<1x128xi1>, vector<1x128xf32>
    %c64_i32_279 = arith.constant 64 : i32
    %324 = tpu.dynamic_rotate %317 by %c64_i32_279 dim 1 : vector<1x128xf32>, i32 -> vector<1x128xf32>
    %325 = arith.addf %323, %324 : vector<1x128xf32>
    %326 = arith.truncf %325 : vector<1x128xf32> to vector<1x128xbf16>
    %c0_280 = arith.constant 0 : index
    %c0_281 = arith.constant 0 : index
    %327 = vector.load %arg12[%c0_280, %c0_281] : memref<128x128xbf16, #tpu.memory_space<vmem>>, vector<128x128xbf16>
    %cst_282 = arith.constant dense<0.000000e+00> : vector<1x128xf32>
    %328 = tpu.matmul %326, %327, %cst_282 {dimension_numbers = #tpu.dot_dimension_numbers<[1], [0], [0], [1], [0, 0, 1, 1], [], []>} : vector<1x128xbf16>, vector<128x128xbf16>, vector<1x128xf32> -> vector<1x128xf32>
    %c0_283 = arith.constant 0 : index
    %c0_284 = arith.constant 0 : index
    %329 = vector.load %arg13[%c0_283, %c0_284] : memref<1x128xf32, #tpu.memory_space<vmem>>, vector<1x128xf32>
    %330 = arith.addf %328, %329 : vector<1x128xf32>
    %c0_285 = arith.constant 0 : index
    %c6_286 = arith.constant 6 : index
    %331 = memref.load %arg14[%c0_285, %c6_286] : memref<1x7xf32, #tpu.memory_space<smem>>
    %cst_287 = arith.constant 0.000000e+00 : f32
    %332 = vector.broadcast %cst_287 : f32 to vector<1x128xf32>
    %333 = arith.cmpf ogt, %330, %332 : vector<1x128xf32>
    %334 = vector.broadcast %331 : f32 to vector<1x128xf32>
    %335 = arith.mulf %334, %330 : vector<1x128xf32>
    %336 = arith.select %333, %330, %335 : vector<1x128xi1>, vector<1x128xf32>
    %c0_288 = arith.constant 0 : index
    %c0_289 = arith.constant 0 : index
    %c0_290 = arith.constant 0 : index
    %337 = vector.load %arg15[%c0_288, %c0_289, %c0_290] : memref<1x1x128xf32, #tpu.memory_space<vmem>>, vector<1x1x128xf32>
    %338 = vector.shape_cast %337 : vector<1x1x128xf32> to vector<1x128xf32>
    %339 = vector.shape_cast %336 : vector<1x128xf32> to vector<1x1x128xf32>
    tpu.vector_store %arg15[%c0_288, %c0_289, %c0_290], %339 {strides = array<i32>} : memref<1x1x128xf32, #tpu.memory_space<vmem>>, vector<1x1x128xf32>,
    return
  }
  func.func @transform_0(%arg0: i32) -> (i32, i32, i32) {
    %c0_i32 = arith.constant 0 : i32
    %c0_i32_0 = arith.constant 0 : i32
    %c0_i32_1 = arith.constant 0 : i32
    return %arg0, %c0_i32, %c0_i32_0 : i32, i32, i32
  }
  func.func @transform_1(%arg0: i32) -> (i32, i32, i32) {
    %c0_i32 = arith.constant 0 : i32
    %c0_i32_0 = arith.constant 0 : i32
    %c0_i32_1 = arith.constant 0 : i32
    %c0_i32_2 = arith.constant 0 : i32
    return %c0_i32, %c0_i32_0, %c0_i32_1 : i32, i32, i32
  }
  func.func @transform_2(%arg0: i32) -> (i32, i32, i32) {
    %c0_i32 = arith.constant 0 : i32
    %c0_i32_0 = arith.constant 0 : i32
    %c0_i32_1 = arith.constant 0 : i32
    %c0_i32_2 = arith.constant 0 : i32
    return %c0_i32, %c0_i32_0, %c0_i32_1 : i32, i32, i32
  }
  func.func @transform_3(%arg0: i32) -> (i32, i32, i32) {
    %c0_i32 = arith.constant 0 : i32
    %c0_i32_0 = arith.constant 0 : i32
    %c0_i32_1 = arith.constant 0 : i32
    %c0_i32_2 = arith.constant 0 : i32
    return %c0_i32, %c0_i32_0, %c0_i32_1 : i32, i32, i32
  }
  func.func @transform_4(%arg0: i32) -> (i32, i32, i32) {
    %c0_i32 = arith.constant 0 : i32
    %c0_i32_0 = arith.constant 0 : i32
    %c0_i32_1 = arith.constant 0 : i32
    %c0_i32_2 = arith.constant 0 : i32
    return %c0_i32, %c0_i32_0, %c0_i32_1 : i32, i32, i32
  }
  func.func @transform_5(%arg0: i32) -> (i32, i32, i32) {
    %c0_i32 = arith.constant 0 : i32
    %c0_i32_0 = arith.constant 0 : i32
    %c0_i32_1 = arith.constant 0 : i32
    %c0_i32_2 = arith.constant 0 : i32
    return %c0_i32, %c0_i32_0, %c0_i32_1 : i32, i32, i32
  }
  func.func @transform_6(%arg0: i32) -> (i32, i32, i32) {
    %c0_i32 = arith.constant 0 : i32
    %c0_i32_0 = arith.constant 0 : i32
    %c0_i32_1 = arith.constant 0 : i32
    %c0_i32_2 = arith.constant 0 : i32
    return %c0_i32, %c0_i32_0, %c0_i32_1 : i32, i32, i32
  }
  func.func @transform_7(%arg0: i32) -> (i32, i32, i32) {
    %c0_i32 = arith.constant 0 : i32
    %c0_i32_0 = arith.constant 0 : i32
    %c0_i32_1 = arith.constant 0 : i32
    %c0_i32_2 = arith.constant 0 : i32
    return %c0_i32, %c0_i32_0, %c0_i32_1 : i32, i32, i32
  }
  func.func @transform_8(%arg0: i32) -> (i32, i32, i32) {
    %c0_i32 = arith.constant 0 : i32
    %c0_i32_0 = arith.constant 0 : i32
    %c0_i32_1 = arith.constant 0 : i32
    %c0_i32_2 = arith.constant 0 : i32
    return %c0_i32, %c0_i32_0, %c0_i32_1 : i32, i32, i32
  }
  func.func @transform_9(%arg0: i32) -> (i32, i32, i32) {
    %c0_i32 = arith.constant 0 : i32
    %c0_i32_0 = arith.constant 0 : i32
    %c0_i32_1 = arith.constant 0 : i32
    %c0_i32_2 = arith.constant 0 : i32
    return %c0_i32, %c0_i32_0, %c0_i32_1 : i32, i32, i32
  }
  func.func @transform_10(%arg0: i32) -> (i32, i32, i32) {
    %c0_i32 = arith.constant 0 : i32
    %c0_i32_0 = arith.constant 0 : i32
    %c0_i32_1 = arith.constant 0 : i32
    %c0_i32_2 = arith.constant 0 : i32
    return %c0_i32, %c0_i32_0, %c0_i32_1 : i32, i32, i32
  }
  func.func @transform_11(%arg0: i32) -> (i32, i32) {
    %c0_i32 = arith.constant 0 : i32
    %c0_i32_0 = arith.constant 0 : i32
    %c0_i32_1 = arith.constant 0 : i32
    return %c0_i32, %c0_i32_0 : i32, i32
  }
  func.func @transform_12(%arg0: i32) -> (i32, i32) {
    %c0_i32 = arith.constant 0 : i32
    %c0_i32_0 = arith.constant 0 : i32
    %c0_i32_1 = arith.constant 0 : i32
    return %c0_i32, %c0_i32_0 : i32, i32
  }
  func.func @transform_13(%arg0: i32) -> (i32, i32) {
    %c0_i32 = arith.constant 0 : i32
    %c0_i32_0 = arith.constant 0 : i32
    %c0_i32_1 = arith.constant 0 : i32
    return %c0_i32, %c0_i32_0 : i32, i32
  }
  func.func @transform_14(%arg0: i32) -> (i32, i32, i32) {
    %c0_i32 = arith.constant 0 : i32
    %c0_i32_0 = arith.constant 0 : i32
    %c0_i32_1 = arith.constant 0 : i32
    return %arg0, %c0_i32, %c0_i32_0 : i32, i32, i32
  }
}

</mosaic_0001>

<bundles_post_ra>
// kernel: cnn_regressor_forward.1
= control target key start
LH: loop header
LB: loop body
LE: loop exit
PB: predicated region body
PF: predicated region fallthrough
CT: control target
= control target key end

     0   :  { %s11153_s0 = inlined_call_operand.vmem [shape: bf16[2,256,128], index: 0, kind: input, shape index: {}]   ;;  %s11154_s1 = inlined_call_operand.vmem [shape: bf16[9,64,256], index: 1, kind: input, shape index: {}]   ;;  %s11155_s2 = inlined_call_operand.vmem [shape: bf16[9,16,64], index: 2, kind: input, shape index: {}]   ;;  %s11156_s3 = inlined_call_operand.hbm [shape: bf16[9,4,16], index: 3, kind: input, shape index: {}]   ;;  %s11157_s4 = inlined_call_operand.hbm [shape: bf16[9,128,128], index: 4, kind: input, shape index: {}]   ;;  %s11158_s5 = inlined_call_operand.hbm [shape: bf16[9,128,128], index: 5, kind: input, shape index: {}]   ;;  %s11159_s6 = inlined_call_operand.hbm [shape: bf16[9,128,128], index: 6, kind: input, shape index: {}]   ;;  %s11160_s7 = inlined_call_operand.vmem [shape: bf16[4,128,128], index: 7, kind: input, shape index: {}]   ;;  %s11161_s8 = inlined_call_operand.vmem [shape: bf16[1,128,128], index: 8, kind: input, shape index: {}]   ;;  %s11162_s9 = inlined_call_operand.vmem [shape: bf16[1,128,128], index: 9, kind: input, shape index: {}]   ;;  %s11163_s10 = inlined_call_operand.vmem [shape: f32[6,1,128], index: 10, kind: input, shape index: {}]   ;;  %s11164_s11 = inlined_call_operand.hbm [shape: bf16[128,128], index: 11, kind: input, shape index: {}]   ;;  %s11165_s12 = inlined_call_operand.vmem [shape: f32[1,128], index: 12, kind: input, shape index: {}]   ;;  %s11166_s13 = inlined_call_operand.vmem [shape: f32[1,7], index: 13, kind: input, shape index: {}]   ;;  %s11167_s14 = inlined_call_operand.vmem [shape: f32[2,1,128], index: 14, kind: output, shape index: {}]  }
   0x1   :  { %11175 = sst [smem:[#allocation17_spill]] %s11165_s12 }
   0x2   :  { %11176 = sst [smem:[#allocation18_spill]] %s11167_s14 }
   0x3   :  { %19 = vsyncpa [#allocation3], 0 }
   0x4   :  { %20 = vsyncpa [#allocation6], 0 }
   0x5   :  { %21 = vsyncpa [#allocation9], 0 }
   0x6   :  { %22 = vsyncpa [#allocation4], 0  ;;  %s9792_s29 = smov 0  }
   0x7 LB: > { %11177 = sst [smem:[#allocation16_spill]] %s9702_s29  ;;  %s9704_s30 = smov [#allocation5]   ;;  %s9702_s29 = sphi %s9792_s29, %s28_s29  }
   0x8   : > { %s389_s15 = sshll.u32 %s9704_s30, 4  ;;  %s9798_s16 = sadd.s32 4294967295, %s9702_s29   ;;  %s9803_s15 = int_to_ptr.vmem [resolvable:$true] %s389_s15 }
   0x9   : > { %p6781_p0 = scmp.ge.s32.totalorder %s9702_s29, 1  ;;  %p358_p1 = scmp.lt.s32.totalorder %s9702_s29, 3 }
   0xa   : > { %p11173_p2 = scmp.eq.s32.totalorder %s9798_s16, 0  ;;  %s9705_s18 = smov [#allocation8]  }
   0xb   : > { %p9805_p3 = pnand %p6781_p0, %p358_p1  ;;  %s415_s19 = sshll.u32 %s9705_s18, 4  ;;  %s9811_s19 = int_to_ptr.vmem [resolvable:$true] %s415_s19 }
   0xc   : > { %s9706_s21 = smov [#allocation2]   ;;  %s9525_s25 = scalar_lea.hbm %s11157_s4, 9216 }
   0xd   : > { %s11178_s17 = scalar_select %p9805_p3, 1, 0 }
   0xe   : > { %p9052_p4 = pneg %p9805_p3  ;;  %s376_s22 = sshll.u32 %s9706_s21, 4  ;;  %s9819_s22 = int_to_ptr.vmem [resolvable:$true] %s376_s22 }
   0xf   : > { %p9526_p6 = scmp.ne.s32.totalorder %s11157_s4, %s9525_s25  ;;  %p9532_p10 = scmp.lt.u32.totalorder %s9525_s25, %s11157_s4 }
  0x10   : > { %p9815_p5 = pnand %p11173_p2, %p9052_p4 }
  0x12   : > { %p9829_p7 = pneg %p9815_p5 }
  0x14   : > { %p9528_p8 = pnand %p9829_p7, %p9526_p6 }
  0x16   : > { %p9529_p9 = pneg %p9528_p8 }
  0x18   : > { %p9534_p11 = pnand %p9532_p10, %p9529_p9 }
  0x1a   : > { %9537 = shalt.err (!%p9534_p11)
}
  0x1b   : > { %s9538_s21 = scalar_lea.vmem %s9803_s15, 9216  ;;  %p9546_p1 = scmp.lt.s32.totalorder %s9803_s15, %s9803_s15 }
  0x1c   : > { %p9539_p12 = scmp.ne.s32.totalorder %s9803_s15, %s9538_s21  ;;  %p9547_p4 = scmp.lt.s32.totalorder %s9538_s21, %s9538_s21 }
  0x1e   : > { %p9541_p13 = pnand %p9539_p12, %p9829_p7  ;;  %p9548_p6 = por %p9547_p4, %p9546_p1 }
  0x20   : > { %p9542_p0 = pneg %p9541_p13 }
  0x22   : > { %p9549_p8 = pnand %p9548_p6, %p9542_p0 }
  0x24   : > { %9552 = shalt.err (!%p9549_p8)
}
  0x25   : > { %s11169_s23 = smov 64   ;;  %s11171_s24 = smov 4  }
  0x26   : > { %9058 = dma.hbm_to_vmem [thread:$0]  (!%p9815_p5), %s11157_s4, 9216, %s9803_s15, [#allocation6], %s11169_s23, %s11169_s23, %s11171_s24  }
  0x27   : > { %s9553_s18 = scalar_lea.hbm %s11159_s6, 9216 }
  0x28   : > { %p9554_p9 = scmp.ne.s32.totalorder %s11159_s6, %s9553_s18  ;;  %p9560_p12 = scmp.lt.u32.totalorder %s9553_s18, %s11159_s6 }
  0x2a   : > { %p9556_p10 = pnand %p9554_p9, %p9829_p7 }
  0x2c   : > { %p9557_p11 = pneg %p9556_p10 }
  0x2e   : > { %p9562_p13 = pnand %p9560_p12, %p9557_p11 }
  0x30   : > { %9565 = shalt.err (!%p9562_p13)
}
  0x31   : > { %s9566_s15 = scalar_lea.vmem %s9811_s19, 9216  ;;  %p9574_p6 = scmp.lt.s32.totalorder %s9811_s19, %s9811_s19 }
  0x32   : > { %p9567_p0 = scmp.ne.s32.totalorder %s9811_s19, %s9566_s15  ;;  %p9575_p8 = scmp.lt.s32.totalorder %s9566_s15, %s9566_s15 }
  0x34   : > { %p9569_p1 = pnand %p9567_p0, %p9829_p7  ;;  %p9576_p9 = por %p9575_p8, %p9574_p6 }
  0x36   : > { %p9570_p4 = pneg %p9569_p1 }
  0x38   : > { %p9577_p10 = pnand %p9576_p9, %p9570_p4 }
  0x3a   : > { %9580 = shalt.err (!%p9577_p10)
}
  0x3b   : > { %9064 = dma.hbm_to_vmem [thread:$0]  (!%p9815_p5), %s11159_s6, 9216, %s9811_s19, [#allocation9], %s11169_s23, %s11169_s23, %s11171_s24  }
  0x3c   : > { %s9581_s26 = scalar_lea.hbm %s11156_s3, 288 }
  0x3d   : > { %p9582_p11 = scmp.ne.s32.totalorder %s11156_s3, %s9581_s26  ;;  %p9588_p0 = scmp.lt.u32.totalorder %s9581_s26, %s11156_s3 }
  0x3f   : > { %p9584_p12 = pnand %p9582_p11, %p9829_p7 }
  0x41   : > { %p9585_p13 = pneg %p9584_p12 }
  0x43   : > { %p9590_p1 = pnand %p9588_p0, %p9585_p13 }
  0x45   : > { %9593 = shalt.err (!%p9590_p1)
}
  0x46   : > { %s9594_s19 = scalar_lea.vmem %s9819_s22, 288  ;;  %p9602_p9 = scmp.lt.s32.totalorder %s9819_s22, %s9819_s22 }
  0x47   : > { %p9595_p4 = scmp.ne.s32.totalorder %s9819_s22, %s9594_s19  ;;  %p9603_p10 = scmp.lt.s32.totalorder %s9594_s19, %s9594_s19 }
  0x49   : > { %p9597_p6 = pnand %p9595_p4, %p9829_p7  ;;  %p9604_p11 = por %p9603_p10, %p9602_p9 }
  0x4b   : > { %p9598_p8 = pneg %p9597_p6 }
  0x4d   : > { %p9605_p12 = pnand %p9604_p11, %p9598_p8 }
  0x4f   : > { %9608 = shalt.err (!%p9605_p12)
}
  0x50   : > { %s9709_s15 = smov 32   ;;  %s9710_s12 = smov 2  }
  0x51   : > { %9055 = dma.hbm_to_vmem [thread:$0]  (!%p9815_p5), %s11156_s3, 288, %s9819_s22, [#allocation3], %s9709_s15, %s9709_s15, %s9710_s12  }
  0x52   : > { %s9711_s25 = smov [#allocation7]   ;;  %s9712_s27 = smov [#allocation10]  }
  0x53   : > { %s402_s26 = sshll.u32 %s9711_s25, 4  ;;  %s440_s30 = sshll.u32 %s9712_s27, 4  ;;  %s403_s26 = int_to_ptr.vmem [resolvable:$true] %s402_s26  ;;  %s9902_s30 = int_to_ptr.vmem [resolvable:$true] %s440_s30 }
  0x54   : > { %s9609_s19 = scalar_lea.hbm %s11158_s5, 9216 }
  0x55   : > { %p9610_p13 = scmp.ne.s32.totalorder %s11158_s5, %s9609_s19  ;;  %p9616_p4 = scmp.lt.u32.totalorder %s9609_s19, %s11158_s5 }
  0x57   : > { %p9612_p0 = pnand %p9610_p13, %p9829_p7 }
  0x59   : > { %p9613_p1 = pneg %p9612_p0 }
  0x5b   : > { %p9618_p6 = pnand %p9616_p4, %p9613_p1 }
  0x5d   : > { %9621 = shalt.err (!%p9618_p6)
}
  0x5e   : > { %s9622_s15 = scalar_lea.vmem %s403_s26, 9216  ;;  %p9630_p11 = scmp.lt.s32.totalorder %s403_s26, %s403_s26 }
  0x5f   : > { %p9623_p8 = scmp.ne.s32.totalorder %s403_s26, %s9622_s15  ;;  %p9631_p12 = scmp.lt.s32.totalorder %s9622_s15, %s9622_s15 }
  0x61   : > { %p9625_p9 = pnand %p9623_p8, %p9829_p7  ;;  %p9632_p2 = por %p9631_p12, %p9630_p11 }
  0x63   : > { %p9626_p10 = pneg %p9625_p9 }
  0x65   : > { %p9633_p3 = pnand %p9632_p2, %p9626_p10 }
  0x67   : > { %9636 = shalt.err (!%p9633_p3)
}
  0x68   : > { %s11181_s23 = smov 4   ;;  %s11182_s24 = smov 64  }
  0x69   : > { %9061 = dma.hbm_to_vmem [thread:$0]  (!%p9815_p5), %s11158_s5, 9216, %s403_s26, [#allocation6], %s11182_s24, %s11182_s24, %s11181_s23  }
  0x6a   : > { %s9637_s18 = scalar_lea.hbm %s11164_s11, 1024 }
  0x6b   : > { %p9638_p13 = scmp.ne.s32.totalorder %s11164_s11, %s9637_s18  ;;  %p9644_p0 = scmp.lt.u32.totalorder %s9637_s18, %s11164_s11 }
  0x6d   : > { %p9640_p2 = pnand %p9638_p13, %p9829_p7 }
  0x6f   : > { %p9641_p3 = pneg %p9640_p2 }
  0x71   : > { %p9646_p1 = pnand %p9644_p0, %p9641_p3 }
  0x73   : > { %9649 = shalt.err (!%p9646_p1)
}
  0x74   : > { %s9650_s26 = scalar_lea.vmem %s9902_s30, 1024  ;;  %p9658_p9 = scmp.lt.s32.totalorder %s9902_s30, %s9902_s30 }
  0x75   : > { %p9651_p4 = scmp.ne.s32.totalorder %s9902_s30, %s9650_s26  ;;  %p9659_p10 = scmp.lt.s32.totalorder %s9650_s26, %s9650_s26 }
  0x77   : > { %p9653_p6 = pnand %p9651_p4, %p9829_p7  ;;  %p9660_p11 = por %p9659_p10, %p9658_p9 }
  0x79   : > { %p9654_p8 = pneg %p9653_p6 }
  0x7b   : > { %p9661_p12 = pnand %p9660_p11, %p9654_p8 }
  0x7d   : > { %9664 = shalt.err (!%p9661_p12)
}
  0x7e   : > { %9067 = dma.hbm_to_vmem [thread:$0]  (!%p9815_p5), %s11164_s11, 1024, %s9902_s30, [#allocation9], %s11182_s24, %s11182_s24, %s11181_s23  }
  0x7f   : > { %s457_s27 = sshll.u32 %s11166_s13, 4  ;;  %s458_s27 = int_to_ptr.vmem [resolvable:$true] %s457_s27 }
  0x80   : > { %s9665_s18 = scalar_lea.vmem %s458_s27, 16  ;;  %p9673_p0 = scmp.lt.s32.totalorder %s458_s27, %s458_s27 }
  0x81   : > { %p9666_p13 = scmp.ne.s32.totalorder %s458_s27, %s9665_s18  ;;  %p9674_p1 = scmp.lt.s32.totalorder %s9665_s18, %s9665_s18 }
  0x83   : > { %p9668_p2 = pnand %p9666_p13, %p9829_p7  ;;  %p9675_p4 = por %p9674_p1, %p9673_p0 }
  0x85   : > { %p9669_p3 = pneg %p9668_p2 }
  0x87   : > { %p9676_p6 = pnand %p9675_p4, %p9669_p3 }
  0x89   : > { %9679 = shalt.err (!%p9676_p6)
}
  0x8a   : > { %s9713_s21 = smov [#allocation11]   ;;  %p11183_p8 = scmp.ne.s32.totalorder %s11178_s17, 0 }
  0x8b   : > { %9070 = dma.vmem_to_smem (!%p9815_p5), %s458_s27, 16, %s9713_s21, [#allocation4]  }
  0x8c   : > { %478 = sbr.rel (%p11183_p8) target bundleno = 5234 (0x1472), region = 76  ;;  %p11184_p9 = scmp.eq.s32.totalorder (!%p11183_p8), %s9798_s16, 0 }
  0x93   : > { %9685 = dma.done.wait (%p11184_p9), [#allocation3], 288   ;;  %p11185_p10 = pmov %p11184_p9 }
  0x94   : > { %p11186_p7 = pmov %p11184_p9 }
  0x95   : > { %9687 = vsyncadd (%p11185_p10), [#allocation3], 4294967008 }
  0x96   : > { %9689 = dma.done.wait (%p11186_p7), [#allocation6], 18432   ;;  %p11187_p11 = pmov %p11186_p7 }
  0x97   : > { %p11188_p12 = pmov %p11186_p7 }
  0x98   : > { %9691 = vsyncadd (%p11187_p11), [#allocation6], 4294948864 }
  0x99   : > { %9693 = dma.done.wait (%p11188_p12), [#allocation9], 10240   ;;  %p11189_p5 = pmov %p11186_p7 }
  0x9b   : > { %9695 = vsyncadd (%p11189_p5), [#allocation9], 4294957056  ;;  %p11190_p13 = pmov %p11189_p5 }
  0x9c   : > { %p11191_p2 = pmov %p11189_p5 }
  0x9d   : > { %9697 = dma.done.wait (%p11190_p13), [#allocation4], 16  }
  0x9e   : > { %9699 = vsyncadd (%p11191_p2), [#allocation4], 4294967280 }
  0x9f   : > { %504 = sfence }
  0xa0   : > { %p543_p3 = scmp.lt.s32.totalorder %s9798_s16, 1  ;;  %v9122_v0 = vld [vmem:[%s11154_s1 + $0x44] ss:$8 sps:$4 sm:$0xff]   ;;  %v9120_v18 = vld [vmem:[%s11154_s1 + $0x40] ss:$8 sps:$4 sm:$0xff]   ;;  %v9198_v37 = vld [vmem:[#allocation5 + $0x40] sm:$0xff]  }
  0xa1   : > { %894 = vmatprep.mubr.bf16.mxu1 %v9122_v0  ;;  %v9133_v12 = vld [vmem:[%s11154_s1 + $0x4] ss:$8 sps:$4 sm:$0xff]   ;;  %v9131_v19 = vld [vmem:[%s11154_s1] ss:$8 sps:$4 sm:$0xff]   ;;  %v9123_v20 = vld [vmem:[%s11154_s1 + $0x54] ss:$8 sps:$4 sm:$0xff]  }
  0xa2   : > { %s11196_s16 = smov (!%p543_p3, %s9798_s16), 1  ;;  %760 = vmatprep.mubr.bf16.mxu0 %v9133_v12  ;;  %v9135_v21 = vld [vmem:[%s11154_s1 + $0x14] ss:$8 sps:$4 sm:$0xff]   ;;  %v9125_v22 = vld [vmem:[%s11154_s1 + $0x50] ss:$8 sps:$4 sm:$0xff]   ;;  %v9203_v41 = vld [vmem:[#allocation5 + $0x50] sm:$0xff]  }
  0xa3   : > { %s7329_s28 = sshll.u32 %s11196_s16, 7  ;;  %v9137_v23 = vld [vmem:[%s11154_s1 + $0x10] ss:$8 sps:$4 sm:$0xff]   ;;  %v9126_v24 = vld [vmem:[%s11154_s1 + $0x64] ss:$8 sps:$4 sm:$0xff]   ;;  %vm9716_vm0 = vmmov 0  }
  0xa4   : > { %s9987_s24 = scalar_lea.vmem %s11153_s0, %s7329_s28  ;;  %v9138_v25 = vld [vmem:[%s11154_s1 + $0x24] ss:$8 sps:$4 sm:$0xff]   ;;  %v9128_v26 = vld [vmem:[%s11154_s1 + $0x60] ss:$8 sps:$4 sm:$0xff]   ;;  %v9129_v28 = vld [vmem:[%s11154_s1 + $0x74] ss:$8 sps:$4 sm:$0xff]  }
  0xa5   : > { %v9990_v1 = vld [vmem:[%s9987_s24 + $0x40] sm:$0xff]   ;;  %v9997_v3 = vld [vmem:[%s9987_s24 + $0x48] sm:$0xff]   ;;  %v10007_v5 = vld [vmem:[%s9987_s24 + $0x50] sm:$0xff]   ;;  %s9715_s28 = smov 64   ;;  %s2981_s30 = sld [smem:[#allocation11]]  ;;  %vm3042_vm9 = vcmask 523264  }
  0xa6   : > { %v9993_v2 = vld [vmem:[%s9987_s24] sm:$0xff]   ;;  %7370 = vmatprep.subr.bf16.mxu1 %v9990_v1  ;;  %7330 = vmatprep.subr.bf16.mxu0 %v9990_v1  ;;  %v10002_v4 = vld [vmem:[%s9987_s24 + $0x8] sm:$0xff]   ;;  %v10012_v6 = vld [vmem:[%s9987_s24 + $0x10] sm:$0xff]   ;;  %s7131_s26 = sld [smem:[#allocation11 + $0x1]]  ;;  %vm4505_vm12 = vcmask 130048   ;;  %s7215_s12 = sld [smem:[#allocation11 + $0x2]] }
  0xa7   : > { %7371 = vmatpush3.bf16.msra.mxu1 %v9993_v2  ;;  %7331 = vmatpush3.bf16.msra.mxu0 %v9993_v2  ;;  %v10017_v7 = vld [vmem:[%s9987_s24 + $0x58] sm:$0xff]   ;;  %v10027_v9 = vld [vmem:[%s9987_s24 + $0x60] sm:$0xff]   ;;  %v10037_v11 = vld [vmem:[%s9987_s24 + $0x68] sm:$0xff]   ;;  %s7297_s27 = sld [smem:[#allocation11 + $0x3]]  ;;  %s7307_s17 = sld [smem:[#allocation11 + $0x4]] }
  0xa8   : > { %7372 = vmatprep.subr.bf16.mxu1 %v9997_v3  ;;  %7332 = vmatprep.subr.bf16.mxu0 %v9997_v3  ;;  %v10022_v8 = vld [vmem:[%s9987_s24 + $0x18] sm:$0xff]   ;;  %v10032_v10 = vld [vmem:[%s9987_s24 + $0x20] sm:$0xff]   ;;  %v10045_v13 = vld [vmem:[%s9987_s24 + $0x28] sm:$0xff]   ;;  %s7317_s23 = sld [smem:[#allocation11 + $0x5]]  ;;  %s7326_s19 = sld [smem:[#allocation11 + $0x6]] }
  0xa9   : > { %v10050_v14 = vld [vmem:[%s9987_s24 + $0x70] sm:$0xff]   ;;  %v10060_v16 = vld [vmem:[%s9987_s24 + $0x78] sm:$0xff]   ;;  %v9140_v27 = vld [vmem:[%s11154_s1 + $0x20] ss:$8 sps:$4 sm:$0xff]   ;;  %s11193_s15 = sld [smem:[#allocation18_spill]] }
  0xaa   : > { %v10055_v15 = vld [vmem:[%s9987_s24 + $0x30] sm:$0xff]   ;;  %v10065_v17 = vld [vmem:[%s9987_s24 + $0x38] sm:$0xff]   ;;  %v9143_v32 = vld [vmem:[%s11154_s1 + $0x84] ss:$8 sps:$4 sm:$0xff]  }
  0xab   : > { %7373 = vmatpush3.bf16.msra.mxu1 %v10002_v4  ;;  %7333 = vmatpush3.bf16.msra.mxu0 %v10002_v4  ;;  %v9144_v29 = vld [vmem:[%s11154_s1 + $0x34] ss:$8 sps:$4 sm:$0xff]   ;;  %v9134_v30 = vld [vmem:[%s11154_s1 + $0x70] ss:$8 sps:$4 sm:$0xff]   ;;  %v9141_v33 = vld [vmem:[%s11154_s1 + $0x80] ss:$8 sps:$4 sm:$0xff]  }
  0xac   : > { %7374 = vmatprep.subr.bf16.mxu1 %v10007_v5  ;;  %7334 = vmatprep.subr.bf16.mxu0 %v10007_v5  ;;  %v9146_v31 = vld [vmem:[%s11154_s1 + $0x30] ss:$8 sps:$4 sm:$0xff]   ;;  %v9147_v34 = vld [vmem:[%s11154_s1 + $0x94] ss:$8 sps:$4 sm:$0xff]   ;;  %v9150_v36 = vld [vmem:[%s11154_s1 + $0xa4] ss:$8 sps:$4 sm:$0xff]  }
  0xad   : > { %v9149_v35 = vld [vmem:[%s11154_s1 + $0x90] ss:$8 sps:$4 sm:$0xff]   ;;  %v9152_v38 = vld [vmem:[%s11154_s1 + $0xa0] ss:$8 sps:$4 sm:$0xff]   ;;  %v9153_v39 = vld [vmem:[%s11154_s1 + $0xb4] ss:$8 sps:$4 sm:$0xff]  }
  0xae   : > { %v9199_v40 = vld [vmem:[#allocation5 + $0x48] sm:$0xff]   ;;  %v9158_v43 = vld [vmem:[%s11154_s1 + $0xc4] ss:$8 sps:$4 sm:$0xff]   ;;  %v9208_v45 = vld [vmem:[#allocation5 + $0x60] sm:$0xff]  }
  0xaf   : > { %7375 = vmatpush3.bf16.msra.mxu1 %v10012_v6  ;;  %7335 = vmatpush3.bf16.msra.mxu0 %v10012_v6  ;;  %v9155_v42 = vld [vmem:[%s11154_s1 + $0xb0] ss:$8 sps:$4 sm:$0xff]   ;;  %v9156_v46 = vld [vmem:[%s11154_s1 + $0xc0] ss:$8 sps:$4 sm:$0xff]   ;;  %v9159_v47 = vld [vmem:[%s11154_s1 + $0xd4] ss:$8 sps:$4 sm:$0xff]  }
  0xb0   : > { %7376 = vmatprep.subr.bf16.mxu1 %v10017_v7  ;;  %7336 = vmatprep.subr.bf16.mxu0 %v10017_v7  ;;  %v9204_v44 = vld [vmem:[#allocation5 + $0x58] sm:$0xff]   ;;  %v9165_v51 = vld [vmem:[%s11154_s1 + $0xf4] ss:$8 sps:$4 sm:$0xff]   ;;  %v9213_v55 = vld [vmem:[#allocation5 + $0x70] sm:$0xff]  }
  0xb1   : > { %v9161_v48 = vld [vmem:[%s11154_s1 + $0xd0] ss:$8 sps:$4 sm:$0xff]   ;;  %v9162_v49 = vld [vmem:[%s11154_s1 + $0xe4] ss:$8 sps:$4 sm:$0xff]   ;;  %v9164_v50 = vld [vmem:[%s11154_s1 + $0xe0] ss:$8 sps:$4 sm:$0xff]  }
  0xb2   : > { %v9167_v52 = vld [vmem:[%s11154_s1 + $0xf0] ss:$8 sps:$4 sm:$0xff]   ;;  %v9170_v53 = vld [vmem:[%s11154_s1 + $0x104] ss:$8 sps:$4 sm:$0xff]   ;;  %v9168_v56 = vld [vmem:[%s11154_s1 + $0x100] ss:$8 sps:$4 sm:$0xff]  }
  0xb3   : > { %7377 = vmatpush3.bf16.msra.mxu1 %v10022_v8  ;;  %7337 = vmatpush3.bf16.msra.mxu0 %v10022_v8  ;;  %v9209_v54 = vld [vmem:[#allocation5 + $0x68] sm:$0xff]   ;;  %v9214_v58 = vld [vmem:[#allocation5 + $0x78] sm:$0xff]   ;;  %v10220_v59 = vld [vmem:[#allocation5] sm:$0xff]  }
  0xb4   : > { %7378 = vmatprep.subr.bf16.mxu1 %v10027_v9  ;;  %7338 = vmatprep.subr.bf16.mxu0 %v10027_v9  ;;  %v9171_v57 = vld [vmem:[%s11154_s1 + $0x114] ss:$8 sps:$4 sm:$0xff]   ;;  %v9173_v60 = vld [vmem:[%s11154_s1 + $0x110] ss:$8 sps:$4 sm:$0xff]   ;;  %v9174_v61 = vld [vmem:[%s11154_s1 + $0x124] ss:$8 sps:$4 sm:$0xff]  }
  0xb5   : > { %v9176_v62 = vld [vmem:[%s11154_s1 + $0x120] ss:$8 sps:$4 sm:$0xff]   ;;  %v9177_v63 = vld [vmem:[%s11154_s1 + $0x134] ss:$8 sps:$4 sm:$0xff]   ;;  %v9179_v0 = vld [vmem:[%s11154_s1 + $0x130] ss:$8 sps:$4 sm:$0xff]  }
  0xb6   : > { %v10292_v12 = vld [vmem:[%s9987_s24 + $0x10] sm:$0xff]  }
  0xb7   : > { %7379 = vmatpush3.bf16.msra.mxu1 %v10032_v10  ;;  %7339 = vmatpush3.bf16.msra.mxu0 %v10032_v10 }
  0xb8   : > { %7380 = vmatprep.subr.bf16.mxu1 %v10037_v11  ;;  %7340 = vmatprep.subr.bf16.mxu0 %v10037_v11 }
  0xbb   : > { %7381 = vmatpush3.bf16.msra.mxu1 %v10045_v13  ;;  %7341 = vmatpush3.bf16.msra.mxu0 %v10045_v13 }
  0xbc   : > { %7382 = vmatprep.subr.bf16.mxu1 %v10050_v14  ;;  %7342 = vmatprep.subr.bf16.mxu0 %v10050_v14 }
  0xbf   : > { %7383 = vmatpush3.bf16.msra.mxu1 %v10055_v15  ;;  %7343 = vmatpush3.bf16.msra.mxu0 %v10055_v15 }
  0xc0   : > { %7384 = vmatprep.subr.bf16.mxu1 %v10060_v16  ;;  %7344 = vmatprep.subr.bf16.mxu0 %v10060_v16 }
  0xc3   : > { %7385 = vmatpush3.bf16.msra.mxu1 %v10065_v17  ;;  %7345 = vmatpush3.bf16.msra.mxu0 %v10065_v17 }
  0xc4   : > { %7434 = vmatprep.subr.bf16.mxu1 %v9990_v1  ;;  %8086 = vmatprep.subr.bf16.mxu0 %v9198_v37 }
  0xc6   : > { %895 = vmatmul.mubr.bf16.vlgmr.msra.gmra.mrb[0].mxu1 %v9120_v18  ;;  %761 = vmatmul.mubr.bf16.vlgmr.msra.gmra.mrb[0].mxu0 %v9131_v19  ;;  %v10314_v18 = vld [vmem:[%s9987_s24 + $0x20] sm:$0xff]   ;;  %v10318_v19 = vld [vmem:[%s9987_s24 + $0x68] sm:$0xff]  }
  0xc7   : > { %902 = vmatprep.mubr.bf16.mxu1 %v9123_v20  ;;  %7435 = vmatpush3.bf16.msra.mxu1 %v9993_v2  ;;  %v9191_v20 = vld [vmem:[%s11154_s1 + $0x170] ss:$8 sps:$4 sm:$0xff]  }
  0xc8   : > { %7436 = vmatprep.subr.bf16.mxu1 %v9997_v3  ;;  %768 = vmatprep.mubr.bf16.mxu0 %v9135_v21  ;;  %v9194_v21 = vld [vmem:[%s11154_s1 + $0x184] ss:$8 sps:$4 sm:$0xff]  }
  0xc9   : > { %8087 = vmatpush3.bf16.msra.mxu0 %v9198_v37  ;;  %v9220_v37 = vld [vmem:[%s11154_s1 + $0x1e4] ss:$8 sps:$4 sm:$0xff]  }
  0xca   : > { %8088 = vmatprep.subr.bf16.mxu0 %v9199_v40 }
  0xcb   : > { %7437 = vmatpush3.bf16.msra.mxu1 %v10002_v4 }
  0xcc   : > { %7438 = vmatprep.subr.bf16.mxu1 %v10007_v5 }
  0xcd   : > { %8089 = vmatpush3.bf16.msra.mxu0 %v9199_v40  ;;  %v9227_v40 = vld [vmem:[%s11154_s1 + $0x1f0] ss:$8 sps:$4 sm:$0xff]  }
  0xce   : > { %903 = vmatmul.mubr.bf16.gmra.mrb[4].mxu1 %v9125_v22  ;;  %769 = vmatmul.mubr.bf16.gmra.mrb[4].mxu0 %v9137_v23  ;;  %v10328_v22 = vld [vmem:[%s9987_s24 + $0x28] sm:$0xff]   ;;  %v10332_v23 = vld [vmem:[%s9987_s24 + $0x70] sm:$0xff]  }
  0xcf   : > { %910 = vmatprep.mubr.bf16.mxu1 %v9126_v24  ;;  %7439 = vmatpush3.bf16.msra.mxu1 %v10012_v6  ;;  %v10336_v24 = vld [vmem:[%s9987_s24 + $0x30] sm:$0xff]  }
  0xd0   : > { %7440 = vmatprep.subr.bf16.mxu1 %v10017_v7  ;;  %776 = vmatprep.mubr.bf16.mxu0 %v9138_v25  ;;  %v10340_v25 = vld [vmem:[%s9987_s24 + $0x78] sm:$0xff]  }
  0xd1   : > { %8090 = vmatprep.subr.bf16.mxu0 %v9203_v41 }
  0xd2   : > { %8091 = vmatpush3.bf16.msra.mxu0 %v9203_v41 }
  0xd3   : > { %7441 = vmatpush3.bf16.msra.mxu1 %v10022_v8  ;;  %8092 = vmatprep.subr.bf16.mxu0 %v9204_v44 }
  0xd4   : > { %7442 = vmatprep.subr.bf16.mxu1 %v10027_v9 }
  0xd6   : > { %911 = vmatmul.mubr.bf16.gmra.mrb[8].mxu1 %v9128_v26  ;;  %777 = vmatmul.mubr.bf16.gmra.mrb[8].mxu0 %v9140_v27  ;;  %v9192_v26 = vld [vmem:[%s11154_s1 + $0x180] ss:$8 sps:$4 sm:$0xff]   ;;  %v9195_v27 = vld [vmem:[%s11154_s1 + $0x194] ss:$8 sps:$4 sm:$0xff]  }
  0xd7   : > { %918 = vmatprep.mubr.bf16.mxu1 %v9129_v28  ;;  %7443 = vmatpush3.bf16.msra.mxu1 %v10032_v10  ;;  %v9197_v28 = vld [vmem:[%s11154_s1 + $0x190] ss:$8 sps:$4 sm:$0xff]  }
  0xd8   : > { %7444 = vmatprep.subr.bf16.mxu1 %v10037_v11  ;;  %784 = vmatprep.mubr.bf16.mxu0 %v9144_v29  ;;  %v9200_v29 = vld [vmem:[%s11154_s1 + $0x1a4] ss:$8 sps:$4 sm:$0xff]  }
  0xd9   : > { %8093 = vmatpush3.bf16.msra.mxu0 %v9204_v44 }
  0xda   : > { %8094 = vmatprep.subr.bf16.mxu0 %v9208_v45 }
  0xdb   : > { %7445 = vmatpush3.bf16.msra.mxu1 %v10045_v13 }
  0xdc   : > { %7446 = vmatprep.subr.bf16.mxu1 %v10050_v14 }
  0xdd   : > { %8095 = vmatpush3.bf16.msra.mxu0 %v9208_v45  ;;  %v9232_v45 = vld [vmem:[%s11154_s1 + $0x204] ss:$8 sps:$4 sm:$0xff]  }
  0xde   : > { %919 = vmatmul.mubr.bf16.gmra.mrb[12].mxu1 %v9134_v30  ;;  %785 = vmatmul.mubr.bf16.gmra.mrb[12].mxu0 %v9146_v31  ;;  %v9202_v30 = vld [vmem:[%s11154_s1 + $0x1a0] ss:$8 sps:$4 sm:$0xff]   ;;  %v9205_v31 = vld [vmem:[%s11154_s1 + $0x1b4] ss:$8 sps:$4 sm:$0xff]  }
  0xdf   : > { %7447 = vmatpush3.bf16.msra.mxu1 %v10055_v15  ;;  %1255 = vmatprep.mubr.bf16.mxu1 %v9143_v32  ;;  %v9207_v32 = vld [vmem:[%s11154_s1 + $0x1b0] ss:$8 sps:$4 sm:$0xff]  }
  0xe0   : > { %7448 = vmatprep.subr.bf16.mxu1 %v10060_v16  ;;  %8096 = vmatprep.subr.bf16.mxu0 %v9209_v54 }
  0xe1   : > { %8097 = vmatpush3.bf16.msra.mxu0 %v9209_v54 }
  0xe2   : > { %8098 = vmatprep.subr.bf16.mxu0 %v9213_v55 }
  0xe3   : > { %7449 = vmatpush3.bf16.msra.mxu1 %v10065_v17 }
  0xe4   : > { %7486 = vmatprep.subr.bf16.mxu1 %v9990_v1 }
  0xe5   : > { %8099 = vmatpush3.bf16.msra.mxu0 %v9213_v55 }
  0xe6   : > { %1256 = vmatmul.mubr.bf16.vlgmr.msra.gmra.mrb[16].mxu1 %v9141_v33  ;;  %8100 = vmatprep.subr.bf16.mxu0 %v9214_v58  ;;  %v9212_v33 = vld [vmem:[%s11154_s1 + $0x1c4] ss:$8 sps:$4 sm:$0xff]  }
  0xe7   : > { %7487 = vmatpush3.bf16.msra.mxu1 %v9993_v2  ;;  %1263 = vmatprep.mubr.bf16.mxu1 %v9147_v34  ;;  %v9210_v34 = vld [vmem:[%s11154_s1 + $0x1c0] ss:$8 sps:$4 sm:$0xff]  }
  0xe8   : > { %7488 = vmatprep.subr.bf16.mxu1 %v9997_v3 }
  0xe9   : > { %8101 = vmatpush3.bf16.msra.mxu0 %v9214_v58 }
  0xea   : > { %8110 = vmatprep.subr.bf16.mxu0 %v10220_v59 }
  0xeb   : > { %7489 = vmatpush3.bf16.msra.mxu1 %v10002_v4 }
  0xec   : > { %7490 = vmatprep.subr.bf16.mxu1 %v10007_v5 }
  0xee   : > { %1264 = vmatmul.mubr.bf16.gmra.mrb[20].mxu1 %v9149_v35  ;;  %v9215_v35 = vld [vmem:[%s11154_s1 + $0x1d4] ss:$8 sps:$4 sm:$0xff]  }
  0xef   : > { %7491 = vmatpush3.bf16.msra.mxu1 %v10012_v6  ;;  %1271 = vmatprep.mubr.bf16.mxu1 %v9150_v36  ;;  %v9217_v36 = vld [vmem:[%s11154_s1 + $0x1d0] ss:$8 sps:$4 sm:$0xff]  }
  0xf0   : > { %7492 = vmatprep.subr.bf16.mxu1 %v10017_v7 }
  0xf3   : > { %7493 = vmatpush3.bf16.msra.mxu1 %v10022_v8 }
  0xf4   : > { %7494 = vmatprep.subr.bf16.mxu1 %v10027_v9 }
  0xf6   : > { %1272 = vmatmul.mubr.bf16.gmra.mrb[24].mxu1 %v9152_v38  ;;  %v9222_v38 = vld [vmem:[%s11154_s1 + $0x1e0] ss:$8 sps:$4 sm:$0xff]  }
  0xf7   : > { %7495 = vmatpush3.bf16.msra.mxu1 %v10032_v10  ;;  %1279 = vmatprep.mubr.bf16.mxu1 %v9153_v39  ;;  %v9225_v39 = vld [vmem:[%s11154_s1 + $0x1f4] ss:$8 sps:$4 sm:$0xff]  }
  0xf8   : > { %7496 = vmatprep.subr.bf16.mxu1 %v10037_v11 }
  0xfb   : > { %7497 = vmatpush3.bf16.msra.mxu1 %v10045_v13 }
  0xfc   : > { %7498 = vmatprep.subr.bf16.mxu1 %v10050_v14 }
  0xfe   : > { %1280 = vmatmul.mubr.bf16.gmra.mrb[28].mxu1 %v9155_v42 }
  0xff   : > { %7499 = vmatpush3.bf16.msra.mxu1 %v10055_v15  ;;  %1511 = vmatprep.mubr.bf16.mxu1 %v9158_v43 }
 0x100   : > { %7500 = vmatprep.subr.bf16.mxu1 %v10060_v16 }
 0x103   : > { %7501 = vmatpush3.bf16.msra.mxu1 %v10065_v17 }
 0x104   : > { %7538 = vmatprep.subr.bf16.mxu1 %v9990_v1 }
 0x106   : > { %1512 = vmatmul.mubr.bf16.vlgmr.msra.gmra.mrb[32].mxu1 %v9156_v46 }
 0x107   : > { %7539 = vmatpush3.bf16.msra.mxu1 %v9993_v2  ;;  %1519 = vmatprep.mubr.bf16.mxu1 %v9159_v47 }
 0x108   : > { %7540 = vmatprep.subr.bf16.mxu1 %v9997_v3 }
 0x10b   : > { %7541 = vmatpush3.bf16.msra.mxu1 %v10002_v4 }
 0x10c   : > { %7542 = vmatprep.subr.bf16.mxu1 %v10007_v5 }
 0x10e   : > { %1520 = vmatmul.mubr.bf16.gmra.mrb[36].mxu1 %v9161_v48 }
 0x10f   : > { %7543 = vmatpush3.bf16.msra.mxu1 %v10012_v6  ;;  %1527 = vmatprep.mubr.bf16.mxu1 %v9162_v49 }
 0x110   : > { %7544 = vmatprep.subr.bf16.mxu1 %v10017_v7 }
 0x113   : > { %7545 = vmatpush3.bf16.msra.mxu1 %v10022_v8 }
 0x114   : > { %7546 = vmatprep.subr.bf16.mxu1 %v10027_v9 }
 0x116   : > { %1528 = vmatmul.mubr.bf16.gmra.mrb[40].mxu1 %v9164_v50 }
 0x117   : > { %7547 = vmatpush3.bf16.msra.mxu1 %v10032_v10  ;;  %1535 = vmatprep.mubr.bf16.mxu1 %v9165_v51 }
 0x118   : > { %7548 = vmatprep.subr.bf16.mxu1 %v10037_v11 }
 0x11b   : > { %7549 = vmatpush3.bf16.msra.mxu1 %v10045_v13 }
 0x11c   : > { %7550 = vmatprep.subr.bf16.mxu1 %v10050_v14 }
 0x11e   : > { %1536 = vmatmul.mubr.bf16.gmra.mrb[44].mxu1 %v9167_v52 }
 0x11f   : > { %7551 = vmatpush3.bf16.msra.mxu1 %v10055_v15  ;;  %1767 = vmatprep.mubr.bf16.mxu1 %v9170_v53 }
 0x120   : > { %7552 = vmatprep.subr.bf16.mxu1 %v10060_v16 }
 0x123   : > { %7553 = vmatpush3.bf16.msra.mxu1 %v10065_v17  ;;  %v10310_v17 = vld [vmem:[%s9987_s24 + $0x60] sm:$0xff]  }
 0x124   : > { %7590 = vmatprep.subr.bf16.mxu1 %v9990_v1  ;;  %v9182_v1 = vld [vmem:[%s11154_s1 + $0x144] ss:$8 sps:$4 sm:$0xff]  }
 0x126   : > { %1768 = vmatmul.mubr.bf16.vlgmr.msra.gmra.mrb[48].mxu1 %v9168_v56  ;;  %v9230_v56 = vld [vmem:[%s11154_s1 + $0x200] ss:$8 sps:$4 sm:$0xff]  }
 0x127   : > { %7591 = vmatpush3.bf16.msra.mxu1 %v9993_v2  ;;  %1775 = vmatprep.mubr.bf16.mxu1 %v9171_v57  ;;  %v9180_v2 = vld [vmem:[%s11154_s1 + $0x140] ss:$8 sps:$4 sm:$0xff]  }
 0x128   : > { %7592 = vmatprep.subr.bf16.mxu1 %v9997_v3  ;;  %v10259_v3 = vld [vmem:[%s9987_s24 + $0x38] sm:$0xff]  }
 0x12b   : > { %7593 = vmatpush3.bf16.msra.mxu1 %v10002_v4  ;;  %v9183_v4 = vld [vmem:[%s11154_s1 + $0x154] ss:$8 sps:$4 sm:$0xff]  }
 0x12c   : > { %7594 = vmatprep.subr.bf16.mxu1 %v10007_v5  ;;  %v10266_v5 = vld [vmem:[%s9987_s24 + $0x40] sm:$0xff]  }
 0x12e   : > { %1776 = vmatmul.mubr.bf16.gmra.mrb[52].mxu1 %v9173_v60 }
 0x12f   : > { %7595 = vmatpush3.bf16.msra.mxu1 %v10012_v6  ;;  %1783 = vmatprep.mubr.bf16.mxu1 %v9174_v61  ;;  %v10270_v6 = vld [vmem:[%s9987_s24] sm:$0xff]  }
 0x130   : > { %7596 = vmatprep.subr.bf16.mxu1 %v10017_v7  ;;  %v10274_v7 = vld [vmem:[%s9987_s24 + $0x48] sm:$0xff]  }
 0x133   : > { %7597 = vmatpush3.bf16.msra.mxu1 %v10022_v8  ;;  %v9185_v8 = vld [vmem:[%s11154_s1 + $0x150] ss:$8 sps:$4 sm:$0xff]  }
 0x134   : > { %7598 = vmatprep.subr.bf16.mxu1 %v10027_v9  ;;  %v10281_v9 = vld [vmem:[%s9987_s24 + $0x8] sm:$0xff]  }
 0x136   : > { %1784 = vmatmul.mubr.bf16.gmra.mrb[56].mxu1 %v9176_v62  ;;  %v9235_v62 = vld [vmem:[%s11154_s1 + $0x214] ss:$8 sps:$4 sm:$0xff]  }
 0x137   : > { %7599 = vmatpush3.bf16.msra.mxu1 %v10032_v10  ;;  %1791 = vmatprep.mubr.bf16.mxu1 %v9177_v63  ;;  %v9186_v10 = vld [vmem:[%s11154_s1 + $0x164] ss:$8 sps:$4 sm:$0xff]  }
 0x138   : > { %7600 = vmatprep.subr.bf16.mxu1 %v10037_v11  ;;  %v10288_v11 = vld [vmem:[%s9987_s24 + $0x50] sm:$0xff]  }
 0x13b   : > { %7601 = vmatpush3.bf16.msra.mxu1 %v10045_v13  ;;  %v10296_v13 = vld [vmem:[%s9987_s24 + $0x58] sm:$0xff]  }
 0x13c   : > { %7602 = vmatprep.subr.bf16.mxu1 %v10050_v14  ;;  %v9188_v14 = vld [vmem:[%s11154_s1 + $0x160] ss:$8 sps:$4 sm:$0xff]  }
 0x13e   : > { %1792 = vmatmul.mubr.bf16.gmra.mrb[60].mxu1 %v9179_v0 }
 0x13f   : > { %7603 = vmatpush3.bf16.msra.mxu1 %v10055_v15  ;;  %2023 = vmatprep.mubr.bf16.mxu1 %v9182_v1  ;;  %v10303_v15 = vld [vmem:[%s9987_s24 + $0x18] sm:$0xff]  }
 0x140   : > { %7604 = vmatprep.subr.bf16.mxu1 %v10060_v16  ;;  %v9189_v16 = vld [vmem:[%s11154_s1 + $0x174] ss:$8 sps:$4 sm:$0xff]  }
 0x143   : > { %7605 = vmatpush3.bf16.msra.mxu1 %v10259_v3 }
 0x144   : > { %7642 = vmatprep.subr.bf16.mxu1 %v10266_v5 }
 0x146   : > { %2024 = vmatmul.mubr.bf16.vlgmr.msra.gmra.mrb[64].mxu1 %v9180_v2 }
 0x147   : > { %7643 = vmatpush3.bf16.msra.mxu1 %v10270_v6  ;;  %2031 = vmatprep.mubr.bf16.mxu1 %v9183_v4 }
 0x148   : > { %7644 = vmatprep.subr.bf16.mxu1 %v10274_v7 }
 0x14b   : > { %7645 = vmatpush3.bf16.msra.mxu1 %v10281_v9 }
 0x14c   : > { %7646 = vmatprep.subr.bf16.mxu1 %v10288_v11 }
 0x14e   : > { %2032 = vmatmul.mubr.bf16.gmra.mrb[68].mxu1 %v9185_v8 }
 0x14f   : > { %7647 = vmatpush3.bf16.msra.mxu1 %v10292_v12  ;;  %2039 = vmatprep.mubr.bf16.mxu1 %v9186_v10 }
 0x150   : > { %7648 = vmatprep.subr.bf16.mxu1 %v10296_v13 }
 0x153   : > { %7649 = vmatpush3.bf16.msra.mxu1 %v10303_v15 }
 0x154   : > { %7650 = vmatprep.subr.bf16.mxu1 %v10310_v17 }
 0x156   : > { %2040 = vmatmul.mubr.bf16.gmra.mrb[72].mxu1 %v9188_v14 }
 0x157   : > { %7651 = vmatpush3.bf16.msra.mxu1 %v10314_v18  ;;  %2047 = vmatprep.mubr.bf16.mxu1 %v9189_v16 }
 0x158   : > { %7652 = vmatprep.subr.bf16.mxu1 %v10318_v19 }
 0x15b   : > { %7653 = vmatpush3.bf16.msra.mxu1 %v10328_v22 }
 0x15c   : > { %7654 = vmatprep.subr.bf16.mxu1 %v10332_v23 }
 0x15e   : > { %2048 = vmatmul.mubr.bf16.gmra.mrb[76].mxu1 %v9191_v20 }
 0x15f   : > { %7655 = vmatpush3.bf16.msra.mxu1 %v10336_v24  ;;  %2279 = vmatprep.mubr.bf16.mxu1 %v9194_v21 }
 0x160   : > { %7656 = vmatprep.subr.bf16.mxu1 %v10340_v25 }
 0x163   : > { %7657 = vmatpush3.bf16.msra.mxu1 %v10259_v3 }
 0x164   : > { %7694 = vmatprep.subr.bf16.mxu1 %v10266_v5 }
 0x166   : > { %2280 = vmatmul.mubr.bf16.vlgmr.msra.gmra.mrb[80].mxu1 %v9192_v26 }
 0x167   : > { %7695 = vmatpush3.bf16.msra.mxu1 %v10270_v6  ;;  %2287 = vmatprep.mubr.bf16.mxu1 %v9195_v27 }
 0x168   : > { %7696 = vmatprep.subr.bf16.mxu1 %v10274_v7 }
 0x16b   : > { %7697 = vmatpush3.bf16.msra.mxu1 %v10281_v9 }
 0x16c   : > { %7698 = vmatprep.subr.bf16.mxu1 %v10288_v11 }
 0x16e   : > { %2288 = vmatmul.mubr.bf16.gmra.mrb[84].mxu1 %v9197_v28 }
 0x16f   : > { %7699 = vmatpush3.bf16.msra.mxu1 %v10292_v12  ;;  %2295 = vmatprep.mubr.bf16.mxu1 %v9200_v29 }
 0x170   : > { %7700 = vmatprep.subr.bf16.mxu1 %v10296_v13 }
 0x173   : > { %7701 = vmatpush3.bf16.msra.mxu1 %v10303_v15 }
 0x174   : > { %7702 = vmatprep.subr.bf16.mxu1 %v10310_v17 }
 0x176   : > { %2296 = vmatmul.mubr.bf16.gmra.mrb[88].mxu1 %v9202_v30  ;;  %v9242_v30 = vld [vmem:[%s11154_s1 + $0x220] ss:$8 sps:$4 sm:$0xff]  }
 0x177   : > { %7703 = vmatpush3.bf16.msra.mxu1 %v10314_v18  ;;  %2303 = vmatprep.mubr.bf16.mxu1 %v9205_v31 }
 0x178   : > { %7704 = vmatprep.subr.bf16.mxu1 %v10318_v19 }
 0x17b   : > { %7705 = vmatpush3.bf16.msra.mxu1 %v10328_v22 }
 0x17c   : > { %7706 = vmatprep.subr.bf16.mxu1 %v10332_v23 }
 0x17e   : > { %2304 = vmatmul.mubr.bf16.gmra.mrb[92].mxu1 %v9207_v32 }
 0x17f   : > { %7707 = vmatpush3.bf16.msra.mxu1 %v10336_v24  ;;  %2535 = vmatprep.mubr.bf16.mxu1 %v9212_v33 }
 0x180   : > { %7708 = vmatprep.subr.bf16.mxu1 %v10340_v25 }
 0x183   : > { %7709 = vmatpush3.bf16.msra.mxu1 %v10259_v3 }
 0x184   : > { %7746 = vmatprep.subr.bf16.mxu1 %v10266_v5 }
 0x186   : > { %2536 = vmatmul.mubr.bf16.vlgmr.msra.gmra.mrb[96].mxu1 %v9210_v34  ;;  %v9228_v34 = vld [vmem:[#allocation5 + $0x20] sm:$0xff]  }
 0x187   : > { %7747 = vmatpush3.bf16.msra.mxu1 %v10270_v6  ;;  %2543 = vmatprep.mubr.bf16.mxu1 %v9215_v35  ;;  %v9245_v35 = vld [vmem:[%s11154_s1 + $0x234] ss:$8 sps:$4 sm:$0xff]  }
 0x188   : > { %7748 = vmatprep.subr.bf16.mxu1 %v10274_v7 }
 0x18b   : > { %7749 = vmatpush3.bf16.msra.mxu1 %v10281_v9  ;;  %v9219_v9 = vld [vmem:[#allocation5 + $0x8] sm:$0xff]  }
 0x18c   : > { %7750 = vmatprep.subr.bf16.mxu1 %v10288_v11 }
 0x18e   : > { %2544 = vmatmul.mubr.bf16.gmra.mrb[100].mxu1 %v9217_v36 }
 0x18f   : > { %7751 = vmatpush3.bf16.msra.mxu1 %v10292_v12  ;;  %2551 = vmatprep.mubr.bf16.mxu1 %v9220_v37 }
 0x190   : > { %7752 = vmatprep.subr.bf16.mxu1 %v10296_v13  ;;  %v9237_v13 = vld [vmem:[%s11154_s1 + $0x210] ss:$8 sps:$4 sm:$0xff]  }
 0x193   : > { %7753 = vmatpush3.bf16.msra.mxu1 %v10303_v15 }
 0x194   : > { %7754 = vmatprep.subr.bf16.mxu1 %v10310_v17  ;;  %v9223_v17 = vld [vmem:[#allocation5 + $0x10] sm:$0xff]  }
 0x196   : > { %2552 = vmatmul.mubr.bf16.gmra.mrb[104].mxu1 %v9222_v38 }
 0x197   : > { %7755 = vmatpush3.bf16.msra.mxu1 %v10314_v18  ;;  %2559 = vmatprep.mubr.bf16.mxu1 %v9225_v39  ;;  %v9240_v18 = vld [vmem:[%s11154_s1 + $0x224] ss:$8 sps:$4 sm:$0xff]  }
 0x198   : > { %7756 = vmatprep.subr.bf16.mxu1 %v10318_v19 }
 0x199   : > { %v7386_v41 = vpop.f32.mrb[0].mxu1  ;;  %v7346_v42 = vpop.f32.mrb[0].mxu0 }
 0x19a   : > { %v7387_v43 = vpop.f32.mrb[1].mxu1  ;;  %v7347_v44 = vpop.f32.mrb[1].mxu0 }
 0x19b   : > { %v7388_v46 = vadd.f32 %v7387_v43, %v7386_v41  ;;  %v7389_v47 = vpop.f32.mrb[2].mxu1  ;;  %7757 = vmatpush3.bf16.msra.mxu1 %v10328_v22  ;;  %v10420_v48 = vadd.f32 %v7347_v44, %v7346_v42  ;;  %v7349_v49 = vpop.f32.mrb[2].mxu0  ;;  %v9229_v43 = vld [vmem:[#allocation5 + $0x28] sm:$0xff]  }
 0x19c   : > { %v7390_v50 = vpop.f32.mrb[3].mxu1  ;;  %7758 = vmatprep.subr.bf16.mxu1 %v10332_v23  ;;  %v7350_v51 = vpop.f32.mrb[3].mxu0 }
 0x19d   : > { %v7391_v52 = vadd.f32 %v7390_v50, %v7389_v47  ;;  %v10423_v53 = vadd.f32 %v7350_v51, %v7349_v49  ;;  %v9233_v49 = vld [vmem:[#allocation5 + $0x30] sm:$0xff]  }
 0x19e   : > { %2560 = vmatmul.mubr.bf16.gmra.mrb[108].mxu1 %v9227_v40 }
 0x19f   : > { %v927_v54 = vpack.c.bf16 %v7391_v52, %v7388_v46  ;;  %7759 = vmatpush3.bf16.msra.mxu1 %v10336_v24  ;;  %v793_v55 = vpack.c.bf16 %v10423_v53, %v10420_v48  ;;  %2791 = vmatprep.mubr.bf16.mxu1 %v9232_v45  ;;  %v9247_v46 = vld [vmem:[%s11154_s1 + $0x230] ss:$8 sps:$4 sm:$0xff]  }
 0x1a0   : > { %7760 = vmatprep.subr.bf16.mxu1 %v10340_v25  ;;  %v9224_v25 = vld [vmem:[#allocation5 + $0x18] sm:$0xff]   ;;  %v9238_v53 = vld [vmem:[#allocation5 + $0x80] sm:$0xff]  }
 0x1a1   : > { %v7392_v57 = vpop.f32.mrb[4].mxu1  ;;  %8102 = vmatprep.mubr.bf16.mxu0 %v927_v54  ;;  %v7352_v58 = vpop.f32.mrb[4].mxu0 }
 0x1a2   : > { %v7393_v60 = vpop.f32.mrb[5].mxu1  ;;  %v7353_v61 = vpop.f32.mrb[5].mxu0 }
 0x1a3   : > { %v7394_v63 = vadd.f32 %v7393_v60, %v7392_v57  ;;  %v7395_v0 = vpop.f32.mrb[6].mxu1  ;;  %7761 = vmatpush3.bf16.msra.mxu1 %v10259_v3  ;;  %v10436_v1 = vadd.f32 %v7353_v61, %v7352_v58  ;;  %v7355_v2 = vpop.f32.mrb[6].mxu0 }
 0x1a4   : > { %v7396_v4 = vpop.f32.mrb[7].mxu1  ;;  %v7356_v5 = vpop.f32.mrb[7].mxu0 }
 0x1a5   : > { %v7397_v6 = vadd.f32 %v7396_v4, %v7395_v0  ;;  %v10438_v7 = vadd.f32 %v7356_v5, %v7355_v2  ;;  %v9243_v5 = vld [vmem:[#allocation5 + $0x90] sm:$0xff]  }
 0x1a6   : > { %2792 = vmatmul.mubr.bf16.vlgmr.msra.gmra.mrb[112].mxu1 %v9230_v56  ;;  %v9234_v56 = vld [vmem:[#allocation5 + $0x38] sm:$0xff]  }
 0x1a7   : > { %v928_v8 = vpack.c.bf16 %v7397_v6, %v7394_v63  ;;  %v794_v10 = vpack.c.bf16 %v10438_v7, %v10436_v1  ;;  %2799 = vmatprep.mubr.bf16.mxu1 %v9235_v62  ;;  %v9239_v63 = vld [vmem:[#allocation5 + $0x88] sm:$0xff]   ;;  %v9248_v7 = vld [vmem:[#allocation5 + $0xa0] sm:$0xff]  }
 0x1a9   : > { %8103 = vmatmul.mubr.bf16.vlgmr.msra.gmra.mrb[16].mxu0 %v928_v8  ;;  %v7398_v11 = vpop.f32.mrb[8].mxu1  ;;  %v7358_v12 = vpop.f32.mrb[8].mxu0 }
 0x1aa   : > { %8111 = vmatpush3.bf16.msra.mxu0 %v10220_v59  ;;  %v7399_v3 = vpop.f32.mrb[9].mxu1  ;;  %v7359_v14 = vpop.f32.mrb[9].mxu0 }
 0x1ab   : > { %8112 = vmatprep.subr.bf16.mxu0 %v9219_v9  ;;  %v7400_v15 = vadd.f32 %v7399_v3, %v7398_v11  ;;  %v7401_v16 = vpop.f32.mrb[10].mxu1  ;;  %v10449_v19 = vadd.f32 %v7359_v14, %v7358_v12  ;;  %v7361_v20 = vpop.f32.mrb[10].mxu0  ;;  %v9244_v12 = vld [vmem:[#allocation5 + $0x98] sm:$0xff]  }
 0x1ac   : > { %v7402_v21 = vpop.f32.mrb[11].mxu1  ;;  %v7362_v22 = vpop.f32.mrb[11].mxu0 }
 0x1ad   : > { %v7403_v59 = vadd.f32 %v7402_v21, %v7401_v16  ;;  %v10451_v23 = vadd.f32 %v7362_v22, %v7361_v20  ;;  %v9250_v21 = vld [vmem:[#allocation5 + $0xb0] sm:$0xff]  }
 0x1ae   : > { %8113 = vmatpush3.bf16.msra.mxu0 %v9219_v9  ;;  %2800 = vmatmul.mubr.bf16.gmra.mrb[116].mxu1 %v9237_v13 }
 0x1af   : > { %8114 = vmatprep.subr.bf16.mxu0 %v9223_v17  ;;  %v929_v24 = vpack.c.bf16 %v7403_v59, %v7400_v15  ;;  %2807 = vmatprep.mubr.bf16.mxu1 %v9240_v18  ;;  %v795_v26 = vpack.c.bf16 %v10451_v23, %v10449_v19 }
 0x1b1   : > { %v7404_v27 = vpop.f32.mrb[12].mxu1  ;;  %8106 = vmatprep.mubr.bf16.mxu0 %v929_v24  ;;  %v7364_v28 = vpop.f32.mrb[12].mxu0 }
 0x1b2   : > { %8115 = vmatpush3.bf16.msra.mxu0 %v9223_v17  ;;  %v7405_v29 = vpop.f32.mrb[13].mxu1  ;;  %v7365_v31 = vpop.f32.mrb[13].mxu0  ;;  %v9249_v17 = vld [vmem:[#allocation5 + $0xa8] sm:$0xff]  }
 0x1b3   : > { %8116 = vmatprep.subr.bf16.mxu0 %v9224_v25  ;;  %v7406_v32 = vadd.f32 %v7405_v29, %v7404_v27  ;;  %v7407_v33 = vpop.f32.mrb[14].mxu1  ;;  %v7366_v36 = vadd.f32 %v7365_v31, %v7364_v28  ;;  %v7367_v37 = vpop.f32.mrb[14].mxu0  ;;  %v9252_v29 = vld [vmem:[#allocation5 + $0xc0] sm:$0xff]  }
 0x1b4   : > { %v7408_v38 = vpop.f32.mrb[15].mxu1  ;;  %v7368_v39 = vpop.f32.mrb[15].mxu0 }
 0x1b5   : > { %v7409_v40 = vadd.f32 %v7408_v38, %v7407_v33  ;;  %v7369_v41 = vadd.f32 %v7368_v39, %v7367_v37  ;;  %v9254_v38 = vld [vmem:[#allocation5 + $0xd0] sm:$0xff]  }
 0x1b6   : > { %8117 = vmatpush3.bf16.msra.mxu0 %v9224_v25  ;;  %2808 = vmatmul.mubr.bf16.gmra.mrb[120].mxu1 %v9242_v30  ;;  %v9251_v25 = vld [vmem:[#allocation5 + $0xb8] sm:$0xff]  }
 0x1b7   : > { %v930_v42 = vpack.c.bf16 %v7409_v40, %v7406_v32  ;;  %8118 = vmatprep.subr.bf16.mxu0 %v9228_v34  ;;  %2815 = vmatprep.mubr.bf16.mxu1 %v9245_v35  ;;  %v796_v44 = vpack.c.bf16 %v7369_v41, %v7366_v36 }
 0x1b9   : > { %8107 = vmatmul.mubr.bf16.gmra.mrb[20].mxu0 %v930_v42  ;;  %v7450_v45 = vpop.f32.mrb[16].mxu1 }
 0x1ba   : > { %8119 = vmatpush3.bf16.msra.mxu0 %v9228_v34  ;;  %8126 = vmatprep.mubr.bf16.mxu0 %v793_v55  ;;  %v7451_v47 = vpop.f32.mrb[17].mxu1  ;;  %v9253_v34 = vld [vmem:[#allocation5 + $0xc8] sm:$0xff]  }
 0x1bb   : > { %8120 = vmatprep.subr.bf16.mxu0 %v9229_v43  ;;  %v7452_v50 = vadd.f32 %v7451_v47, %v7450_v45  ;;  %v7453_v51 = vpop.f32.mrb[18].mxu1  ;;  %v9256_v47 = vld [vmem:[#allocation5 + $0xe0] sm:$0xff]  }
 0x1bc   : > { %v7454_v52 = vpop.f32.mrb[19].mxu1 }
 0x1bd   : > { %v7455_v54 = vadd.f32 %v7454_v52, %v7453_v51 }
 0x1be   : > { %8121 = vmatpush3.bf16.msra.mxu0 %v9229_v43  ;;  %2816 = vmatmul.mubr.bf16.gmra.mrb[124].mxu1 %v9247_v46  ;;  %v9255_v43 = vld [vmem:[#allocation5 + $0xd8] sm:$0xff]  }
 0x1bf   : > { %8122 = vmatprep.subr.bf16.mxu0 %v9233_v49  ;;  %v1288_v57 = vpack.c.bf16 %v7455_v54, %v7452_v50  ;;  %v9257_v54 = vld [vmem:[#allocation5 + $0xe8] sm:$0xff]  }
 0x1c1   : > { %v7456_v58 = vpop.f32.mrb[20].mxu1 }
 0x1c2   : > { %8123 = vmatpush3.bf16.msra.mxu0 %v9233_v49  ;;  %v7457_v48 = vpop.f32.mrb[21].mxu1 }
 0x1c3   : > { %8124 = vmatprep.subr.bf16.mxu0 %v9234_v56  ;;  %v10467_v55 = vadd.f32 %v7457_v48, %v7456_v58  ;;  %v7459_v60 = vpop.f32.mrb[22].mxu1  ;;  %v9258_v48 = vld [vmem:[#allocation5 + $0xf0] sm:$0xff]  }
 0x1c4   : > { %v7460_v61 = vpop.f32.mrb[23].mxu1 }
 0x1c5   : > { %v7461_v62 = vadd.f32 %v7460_v61, %v7459_v60 }
 0x1c6   : > { %8125 = vmatpush3.bf16.msra.mxu0 %v9234_v56 }
 0x1c7   : > { %8134 = vmatprep.subr.bf16.mxu0 %v9238_v53  ;;  %v1289_v0 = vpack.c.bf16 %v7461_v62, %v10467_v55  ;;  %v9259_v62 = vld [vmem:[#allocation5 + $0xf8] sm:$0xff]  }
 0x1c9   : > { %8127 = vmatmul.mubr.bf16.vlgmr.msra.gmra.mrb[16].mxu0 %v794_v10  ;;  %v7462_v2 = vpop.f32.mrb[24].mxu1 }
 0x1ca   : > { %8135 = vmatpush3.bf16.msra.mxu0 %v9238_v53  ;;  %8130 = vmatprep.mubr.bf16.mxu0 %v795_v26  ;;  %v7463_v4 = vpop.f32.mrb[25].mxu1 }
 0x1cb   : > { %8136 = vmatprep.subr.bf16.mxu0 %v9239_v63  ;;  %v7464_v6 = vadd.f32 %v7463_v4, %v7462_v2  ;;  %v7465_v8 = vpop.f32.mrb[26].mxu1  ;;  %v9260_v4 = vld [vmem:[#allocation5 + $0x100] sm:$0xff]  }
 0x1cc   : > { %v7466_v9 = vpop.f32.mrb[27].mxu1 }
 0x1cd   : > { %v7467_v11 = vadd.f32 %v7466_v9, %v7465_v8 }
 0x1ce   : > { %8137 = vmatpush3.bf16.msra.mxu0 %v9239_v63 }
 0x1cf   : > { %8138 = vmatprep.subr.bf16.mxu0 %v9243_v5  ;;  %v1290_v3 = vpack.c.bf16 %v7467_v11, %v7464_v6  ;;  %v9261_v11 = vld [vmem:[#allocation5 + $0x108] sm:$0xff]  }
 0x1d1   : > { %8131 = vmatmul.mubr.bf16.gmra.mrb[20].mxu0 %v796_v44  ;;  %v7468_v13 = vpop.f32.mrb[28].mxu1 }
 0x1d2   : > { %8139 = vmatpush3.bf16.msra.mxu0 %v9243_v5  ;;  %8150 = vmatprep.mubr.bf16.mxu0 %v1288_v57  ;;  %v7469_v1 = vpop.f32.mrb[29].mxu1 }
 0x1d3   : > { %8140 = vmatprep.subr.bf16.mxu0 %v9244_v12  ;;  %v7470_v10 = vadd.f32 %v7469_v1, %v7468_v13  ;;  %v7471_v14 = vpop.f32.mrb[30].mxu1  ;;  %v9262_v1 = vld [vmem:[#allocation5 + $0x110] sm:$0xff]  }
 0x1d4   : > { %v7472_v15 = vpop.f32.mrb[31].mxu1 }
 0x1d5   : > { %v7473_v16 = vadd.f32 %v7472_v15, %v7471_v14 }
 0x1d6   : > { %8141 = vmatpush3.bf16.msra.mxu0 %v9244_v12 }
 0x1d7   : > { %8142 = vmatprep.subr.bf16.mxu0 %v9248_v7  ;;  %v1291_v18 = vpack.c.bf16 %v7473_v16, %v7470_v10  ;;  %v9263_v16 = vld [vmem:[#allocation5 + $0x118] sm:$0xff]  }
 0x1d9   : > { %v7502_v19 = vpop.f32.mrb[32].mxu1 }
 0x1da   : > { %8143 = vmatpush3.bf16.msra.mxu0 %v9248_v7  ;;  %v7503_v20 = vpop.f32.mrb[33].mxu1 }
 0x1db   : > { %8144 = vmatprep.subr.bf16.mxu0 %v9249_v17  ;;  %v7504_v22 = vadd.f32 %v7503_v20, %v7502_v19  ;;  %v7505_v59 = vpop.f32.mrb[34].mxu1  ;;  %v9264_v20 = vld [vmem:[#allocation5 + $0x120] sm:$0xff]  }
 0x1dc   : > { %v7506_v23 = vpop.f32.mrb[35].mxu1 }
 0x1dd   : > { %v7507_v24 = vadd.f32 %v7506_v23, %v7505_v59 }
 0x1de   : > { %8145 = vmatpush3.bf16.msra.mxu0 %v9249_v17 }
 0x1df   : > { %8146 = vmatprep.subr.bf16.mxu0 %v9250_v21  ;;  %v1544_v26 = vpack.c.bf16 %v7507_v24, %v7504_v22  ;;  %v9265_v24 = vld [vmem:[#allocation5 + $0x128] sm:$0xff]  }
 0x1e1   : > { %v7508_v27 = vpop.f32.mrb[36].mxu1 }
 0x1e2   : > { %8147 = vmatpush3.bf16.msra.mxu0 %v9250_v21  ;;  %v7509_v28 = vpop.f32.mrb[37].mxu1 }
 0x1e3   : > { %8148 = vmatprep.subr.bf16.mxu0 %v9251_v25  ;;  %v10473_v30 = vadd.f32 %v7509_v28, %v7508_v27  ;;  %v7511_v31 = vpop.f32.mrb[38].mxu1  ;;  %v9266_v28 = vld [vmem:[#allocation5 + $0x130] sm:$0xff]  }
 0x1e4   : > { %v7512_v32 = vpop.f32.mrb[39].mxu1 }
 0x1e5   : > { %v7513_v33 = vadd.f32 %v7512_v32, %v7511_v31 }
 0x1e6   : > { %8149 = vmatpush3.bf16.msra.mxu0 %v9251_v25 }
 0x1e7   : > { %8158 = vmatprep.subr.bf16.mxu0 %v9252_v29  ;;  %v1545_v35 = vpack.c.bf16 %v7513_v33, %v10473_v30  ;;  %v9267_v33 = vld [vmem:[#allocation5 + $0x138] sm:$0xff]  }
 0x1e9   : > { %8151 = vmatmul.mubr.bf16.vlgmr.msra.gmra.mrb[16].mxu0 %v1289_v0  ;;  %v7514_v36 = vpop.f32.mrb[40].mxu1 }
 0x1ea   : > { %8159 = vmatpush3.bf16.msra.mxu0 %v9252_v29  ;;  %8154 = vmatprep.mubr.bf16.mxu0 %v1290_v3  ;;  %v7515_v37 = vpop.f32.mrb[41].mxu1 }
 0x1eb   : > { %8160 = vmatprep.subr.bf16.mxu0 %v9253_v34  ;;  %v7516_v39 = vadd.f32 %v7515_v37, %v7514_v36  ;;  %v7517_v40 = vpop.f32.mrb[42].mxu1  ;;  %v9268_v37 = vld [vmem:[#allocation5 + $0x140] sm:$0xff]  }
 0x1ec   : > { %v7518_v41 = vpop.f32.mrb[43].mxu1 }
 0x1ed   : > { %v7519_v42 = vadd.f32 %v7518_v41, %v7517_v40 }
 0x1ee   : > { %8161 = vmatpush3.bf16.msra.mxu0 %v9253_v34 }
 0x1ef   : > { %8162 = vmatprep.subr.bf16.mxu0 %v9254_v38  ;;  %v1546_v44 = vpack.c.bf16 %v7519_v42, %v7516_v39  ;;  %v9269_v42 = vld [vmem:[#allocation5 + $0x148] sm:$0xff]  }
 0x1f1   : > { %8155 = vmatmul.mubr.bf16.gmra.mrb[20].mxu0 %v1291_v18  ;;  %v7520_v45 = vpop.f32.mrb[44].mxu1 }
 0x1f2   : > { %8163 = vmatpush3.bf16.msra.mxu0 %v9254_v38  ;;  %8174 = vmatprep.mubr.bf16.mxu0 %v1544_v26  ;;  %v7521_v46 = vpop.f32.mrb[45].mxu1 }
 0x1f3   : > { %8164 = vmatprep.subr.bf16.mxu0 %v9255_v43  ;;  %v7522_v49 = vadd.f32 %v7521_v46, %v7520_v45  ;;  %v7523_v50 = vpop.f32.mrb[46].mxu1  ;;  %v9270_v46 = vld [vmem:[#allocation5 + $0x150] sm:$0xff]  }
 0x1f4   : > { %v7524_v51 = vpop.f32.mrb[47].mxu1 }
 0x1f5   : > { %v7525_v52 = vadd.f32 %v7524_v51, %v7523_v50 }
 0x1f6   : > { %8165 = vmatpush3.bf16.msra.mxu0 %v9255_v43 }
 0x1f7   : > { %8166 = vmatprep.subr.bf16.mxu0 %v9256_v47  ;;  %v1547_v56 = vpack.c.bf16 %v7525_v52, %v7522_v49  ;;  %v9271_v52 = vld [vmem:[#allocation5 + $0x158] sm:$0xff]  }
 0x1f9   : > { %v7554_v57 = vpop.f32.mrb[48].mxu1 }
 0x1fa   : > { %8167 = vmatpush3.bf16.msra.mxu0 %v9256_v47  ;;  %v7555_v58 = vpop.f32.mrb[49].mxu1 }
 0x1fb   : > { %8168 = vmatprep.subr.bf16.mxu0 %v9257_v54  ;;  %v7556_v53 = vadd.f32 %v7555_v58, %v7554_v57  ;;  %v7557_v55 = vpop.f32.mrb[50].mxu1  ;;  %v9272_v58 = vld [vmem:[#allocation5 + $0x160] sm:$0xff]  }
 0x1fc   : > { %v7558_v60 = vpop.f32.mrb[51].mxu1 }
 0x1fd   : > { %v7559_v61 = vadd.f32 %v7558_v60, %v7557_v55 }
 0x1fe   : > { %8169 = vmatpush3.bf16.msra.mxu0 %v9257_v54 }
 0x1ff   : > { %8170 = vmatprep.subr.bf16.mxu0 %v9258_v48  ;;  %v1800_v63 = vpack.c.bf16 %v7559_v61, %v7556_v53  ;;  %v9273_v61 = vld [vmem:[#allocation5 + $0x168] sm:$0xff]  }
 0x201   : > { %v7560_v0 = vpop.f32.mrb[52].mxu1 }
 0x202   : > { %8171 = vmatpush3.bf16.msra.mxu0 %v9258_v48  ;;  %v7561_v2 = vpop.f32.mrb[53].mxu1 }
 0x203   : > { %8172 = vmatprep.subr.bf16.mxu0 %v9259_v62  ;;  %v10476_v5 = vadd.f32 %v7561_v2, %v7560_v0  ;;  %v7563_v6 = vpop.f32.mrb[54].mxu1  ;;  %v9274_v2 = vld [vmem:[#allocation5 + $0x170] sm:$0xff]  }
 0x204   : > { %v7564_v8 = vpop.f32.mrb[55].mxu1 }
 0x205   : > { %v7565_v9 = vadd.f32 %v7564_v8, %v7563_v6 }
 0x206   : > { %8173 = vmatpush3.bf16.msra.mxu0 %v9259_v62 }
 0x207   : > { %8182 = vmatprep.subr.bf16.mxu0 %v9260_v4  ;;  %v1801_v12 = vpack.c.bf16 %v7565_v9, %v10476_v5  ;;  %v9275_v9 = vld [vmem:[#allocation5 + $0x178] sm:$0xff]  }
 0x209   : > { %8175 = vmatmul.mubr.bf16.vlgmr.msra.gmra.mrb[16].mxu0 %v1545_v35  ;;  %v7566_v3 = vpop.f32.mrb[56].mxu1 }
 0x20a   : > { %8183 = vmatpush3.bf16.msra.mxu0 %v9260_v4  ;;  %8178 = vmatprep.mubr.bf16.mxu0 %v1546_v44  ;;  %v7567_v13 = vpop.f32.mrb[57].mxu1 }
 0x20b   : > { %8184 = vmatprep.subr.bf16.mxu0 %v9261_v11  ;;  %v7568_v7 = vadd.f32 %v7567_v13, %v7566_v3  ;;  %v7569_v10 = vpop.f32.mrb[58].mxu1  ;;  %v9276_v13 = vld [vmem:[#allocation5 + $0x180] sm:$0xff]  }
 0x20c   : > { %v7570_v14 = vpop.f32.mrb[59].mxu1 }
 0x20d   : > { %v7571_v15 = vadd.f32 %v7570_v14, %v7569_v10 }
 0x20e   : > { %8185 = vmatpush3.bf16.msra.mxu0 %v9261_v11 }
 0x20f   : > { %8186 = vmatprep.subr.bf16.mxu0 %v9262_v1  ;;  %v1802_v17 = vpack.c.bf16 %v7571_v15, %v7568_v7  ;;  %v9277_v15 = vld [vmem:[#allocation5 + $0x188] sm:$0xff]  }
 0x211   : > { %8179 = vmatmul.mubr.bf16.gmra.mrb[20].mxu0 %v1547_v56  ;;  %v7572_v18 = vpop.f32.mrb[60].mxu1 }
 0x212   : > { %8187 = vmatpush3.bf16.msra.mxu0 %v9262_v1  ;;  %8198 = vmatprep.mubr.bf16.mxu0 %v1800_v63  ;;  %v7573_v19 = vpop.f32.mrb[61].mxu1 }
 0x213   : > { %8188 = vmatprep.subr.bf16.mxu0 %v9263_v16  ;;  %v7574_v21 = vadd.f32 %v7573_v19, %v7572_v18  ;;  %v7575_v22 = vpop.f32.mrb[62].mxu1  ;;  %v9278_v19 = vld [vmem:[#allocation5 + $0x190] sm:$0xff]  }
 0x214   : > { %v7576_v59 = vpop.f32.mrb[63].mxu1 }
 0x215   : > { %v7577_v23 = vadd.f32 %v7576_v59, %v7575_v22 }
 0x216   : > { %8189 = vmatpush3.bf16.msra.mxu0 %v9263_v16 }
 0x217   : > { %8190 = vmatprep.subr.bf16.mxu0 %v9264_v20  ;;  %v1803_v25 = vpack.c.bf16 %v7577_v23, %v7574_v21  ;;  %v9279_v23 = vld [vmem:[#allocation5 + $0x198] sm:$0xff]  }
 0x219   : > { %v7606_v26 = vpop.f32.mrb[64].mxu1 }
 0x21a   : > { %8191 = vmatpush3.bf16.msra.mxu0 %v9264_v20  ;;  %v7607_v27 = vpop.f32.mrb[65].mxu1 }
 0x21b   : > { %8192 = vmatprep.subr.bf16.mxu0 %v9265_v24  ;;  %v7608_v29 = vadd.f32 %v7607_v27, %v7606_v26  ;;  %v7609_v30 = vpop.f32.mrb[66].mxu1  ;;  %v9280_v27 = vld [vmem:[#allocation5 + $0x1a0] sm:$0xff]  }
 0x21c   : > { %v7610_v31 = vpop.f32.mrb[67].mxu1 }
 0x21d   : > { %v7611_v32 = vadd.f32 %v7610_v31, %v7609_v30 }
 0x21e   : > { %8193 = vmatpush3.bf16.msra.mxu0 %v9265_v24 }
 0x21f   : > { %8194 = vmatprep.subr.bf16.mxu0 %v9266_v28  ;;  %v2056_v34 = vpack.c.bf16 %v7611_v32, %v7608_v29  ;;  %v9281_v32 = vld [vmem:[#allocation5 + $0x1a8] sm:$0xff]  }
 0x221   : > { %v7612_v35 = vpop.f32.mrb[68].mxu1 }
 0x222   : > { %8195 = vmatpush3.bf16.msra.mxu0 %v9266_v28  ;;  %v7613_v36 = vpop.f32.mrb[69].mxu1 }
 0x223   : > { %8196 = vmatprep.subr.bf16.mxu0 %v9267_v33  ;;  %v10479_v38 = vadd.f32 %v7613_v36, %v7612_v35  ;;  %v7615_v39 = vpop.f32.mrb[70].mxu1  ;;  %v9282_v36 = vld [vmem:[#allocation5 + $0x1b0] sm:$0xff]  }
 0x224   : > { %v7616_v40 = vpop.f32.mrb[71].mxu1 }
 0x225   : > { %v7617_v41 = vadd.f32 %v7616_v40, %v7615_v39 }
 0x226   : > { %8197 = vmatpush3.bf16.msra.mxu0 %v9267_v33 }
 0x227   : > { %8206 = vmatprep.subr.bf16.mxu0 %v9268_v37  ;;  %v2057_v43 = vpack.c.bf16 %v7617_v41, %v10479_v38  ;;  %v9283_v41 = vld [vmem:[#allocation5 + $0x1b8] sm:$0xff]  }
 0x229   : > { %8199 = vmatmul.mubr.bf16.vlgmr.msra.gmra.mrb[16].mxu0 %v1801_v12  ;;  %v7618_v44 = vpop.f32.mrb[72].mxu1 }
 0x22a   : > { %8207 = vmatpush3.bf16.msra.mxu0 %v9268_v37  ;;  %8202 = vmatprep.mubr.bf16.mxu0 %v1802_v17  ;;  %v7619_v45 = vpop.f32.mrb[73].mxu1 }
 0x22b   : > { %8208 = vmatprep.subr.bf16.mxu0 %v9269_v42  ;;  %v7620_v47 = vadd.f32 %v7619_v45, %v7618_v44  ;;  %v7621_v49 = vpop.f32.mrb[74].mxu1  ;;  %v9284_v45 = vld [vmem:[#allocation5 + $0x1c0] sm:$0xff]  }
 0x22c   : > { %v7622_v50 = vpop.f32.mrb[75].mxu1 }
 0x22d   : > { %v7623_v51 = vadd.f32 %v7622_v50, %v7621_v49 }
 0x22e   : > { %8209 = vmatpush3.bf16.msra.mxu0 %v9269_v42 }
 0x22f   : > { %8210 = vmatprep.subr.bf16.mxu0 %v9270_v46  ;;  %v2058_v54 = vpack.c.bf16 %v7623_v51, %v7620_v47  ;;  %v9285_v51 = vld [vmem:[#allocation5 + $0x1c8] sm:$0xff]  }
 0x231   : > { %8203 = vmatmul.mubr.bf16.gmra.mrb[20].mxu0 %v1803_v25  ;;  %v7624_v56 = vpop.f32.mrb[76].mxu1 }
 0x232   : > { %8211 = vmatpush3.bf16.msra.mxu0 %v9270_v46  ;;  %8222 = vmatprep.mubr.bf16.mxu0 %v2056_v34  ;;  %v7625_v57 = vpop.f32.mrb[77].mxu1 }
 0x233   : > { %8212 = vmatprep.subr.bf16.mxu0 %v9271_v52  ;;  %v7626_v48 = vadd.f32 %v7625_v57, %v7624_v56  ;;  %v7627_v53 = vpop.f32.mrb[78].mxu1  ;;  %v9286_v57 = vld [vmem:[#allocation5 + $0x1d0] sm:$0xff]  }
 0x234   : > { %v7628_v55 = vpop.f32.mrb[79].mxu1 }
 0x235   : > { %v7629_v60 = vadd.f32 %v7628_v55, %v7627_v53 }
 0x236   : > { %8213 = vmatpush3.bf16.msra.mxu0 %v9271_v52 }
 0x237   : > { %8214 = vmatprep.subr.bf16.mxu0 %v9272_v58  ;;  %v2059_v62 = vpack.c.bf16 %v7629_v60, %v7626_v48  ;;  %v9287_v60 = vld [vmem:[#allocation5 + $0x1d8] sm:$0xff]  }
 0x239   : > { %v7658_v63 = vpop.f32.mrb[80].mxu1 }
 0x23a   : > { %8215 = vmatpush3.bf16.msra.mxu0 %v9272_v58  ;;  %v7659_v0 = vpop.f32.mrb[81].mxu1 }
 0x23b   : > { %8216 = vmatprep.subr.bf16.mxu0 %v9273_v61  ;;  %v7660_v4 = vadd.f32 %v7659_v0, %v7658_v63  ;;  %v7661_v5 = vpop.f32.mrb[82].mxu1  ;;  %v9288_v0 = vld [vmem:[#allocation5 + $0x1e0] sm:$0xff]  }
 0x23c   : > { %v7662_v6 = vpop.f32.mrb[83].mxu1 }
 0x23d   : > { %v7663_v8 = vadd.f32 %v7662_v6, %v7661_v5 }
 0x23e   : > { %8217 = vmatpush3.bf16.msra.mxu0 %v9273_v61 }
 0x23f   : > { %8218 = vmatprep.subr.bf16.mxu0 %v9274_v2  ;;  %v2312_v11 = vpack.c.bf16 %v7663_v8, %v7660_v4  ;;  %v9289_v8 = vld [vmem:[#allocation5 + $0x1e8] sm:$0xff]  }
 0x241   : > { %v7664_v12 = vpop.f32.mrb[84].mxu1 }
 0x242   : > { %8219 = vmatpush3.bf16.msra.mxu0 %v9274_v2  ;;  %v7665_v3 = vpop.f32.mrb[85].mxu1 }
 0x243   : > { %8220 = vmatprep.subr.bf16.mxu0 %v9275_v9  ;;  %v10482_v1 = vadd.f32 %v7665_v3, %v7664_v12  ;;  %v7667_v7 = vpop.f32.mrb[86].mxu1  ;;  %v9290_v3 = vld [vmem:[#allocation5 + $0x1f0] sm:$0xff]  }
 0x244   : > { %v7668_v10 = vpop.f32.mrb[87].mxu1 }
 0x245   : > { %v7669_v14 = vadd.f32 %v7668_v10, %v7667_v7 }
 0x246   : > { %8221 = vmatpush3.bf16.msra.mxu0 %v9275_v9 }
 0x247   : > { %8230 = vmatprep.subr.bf16.mxu0 %v9276_v13  ;;  %v2313_v16 = vpack.c.bf16 %v7669_v14, %v10482_v1  ;;  %v9291_v14 = vld [vmem:[#allocation5 + $0x1f8] sm:$0xff]  }
 0x249   : > { %8223 = vmatmul.mubr.bf16.vlgmr.msra.gmra.mrb[16].mxu0 %v2057_v43  ;;  %v7670_v17 = vpop.f32.mrb[88].mxu1 }
 0x24a   : > { %8231 = vmatpush3.bf16.msra.mxu0 %v9276_v13  ;;  %8226 = vmatprep.mubr.bf16.mxu0 %v2058_v54  ;;  %v7671_v18 = vpop.f32.mrb[89].mxu1 }
 0x24b   : > { %8232 = vmatprep.subr.bf16.mxu0 %v9277_v15  ;;  %v7672_v20 = vadd.f32 %v7671_v18, %v7670_v17  ;;  %v7673_v21 = vpop.f32.mrb[90].mxu1  ;;  %v9292_v18 = vld [vmem:[#allocation5 + $0x200] sm:$0xff]  }
 0x24c   : > { %v7674_v22 = vpop.f32.mrb[91].mxu1 }
 0x24d   : > { %v7675_v59 = vadd.f32 %v7674_v22, %v7673_v21 }
 0x24e   : > { %8233 = vmatpush3.bf16.msra.mxu0 %v9277_v15 }
 0x24f   : > { %8234 = vmatprep.subr.bf16.mxu0 %v9278_v19  ;;  %v2314_v24 = vpack.c.bf16 %v7675_v59, %v7672_v20  ;;  %v9293_v59 = vld [vmem:[#allocation5 + $0x208] sm:$0xff]  }
 0x251   : > { %8227 = vmatmul.mubr.bf16.gmra.mrb[20].mxu0 %v2059_v62  ;;  %v7676_v25 = vpop.f32.mrb[92].mxu1 }
 0x252   : > { %8235 = vmatpush3.bf16.msra.mxu0 %v9278_v19  ;;  %8246 = vmatprep.mubr.bf16.mxu0 %v2312_v11  ;;  %v7677_v26 = vpop.f32.mrb[93].mxu1 }
 0x253   : > { %8236 = vmatprep.subr.bf16.mxu0 %v9279_v23  ;;  %v7678_v28 = vadd.f32 %v7677_v26, %v7676_v25  ;;  %v7679_v29 = vpop.f32.mrb[94].mxu1  ;;  %v9294_v26 = vld [vmem:[#allocation5 + $0x210] sm:$0xff]  }
 0x254   : > { %v7680_v30 = vpop.f32.mrb[95].mxu1 }
 0x255   : > { %v7681_v31 = vadd.f32 %v7680_v30, %v7679_v29 }
 0x256   : > { %8237 = vmatpush3.bf16.msra.mxu0 %v9279_v23 }
 0x257   : > { %8238 = vmatprep.subr.bf16.mxu0 %v9280_v27  ;;  %v2315_v33 = vpack.c.bf16 %v7681_v31, %v7678_v28  ;;  %v9295_v31 = vld [vmem:[#allocation5 + $0x218] sm:$0xff]  }
 0x259   : > { %v7710_v34 = vpop.f32.mrb[96].mxu1 }
 0x25a   : > { %8239 = vmatpush3.bf16.msra.mxu0 %v9280_v27  ;;  %v7711_v35 = vpop.f32.mrb[97].mxu1 }
 0x25b   : > { %8240 = vmatprep.subr.bf16.mxu0 %v9281_v32  ;;  %v7712_v37 = vadd.f32 %v7711_v35, %v7710_v34  ;;  %v7713_v38 = vpop.f32.mrb[98].mxu1  ;;  %v9296_v35 = vld [vmem:[#allocation5 + $0x220] sm:$0xff]  }
 0x25c   : > { %v7714_v39 = vpop.f32.mrb[99].mxu1 }
 0x25d   : > { %v7715_v40 = vadd.f32 %v7714_v39, %v7713_v38 }
 0x25e   : > { %8241 = vmatpush3.bf16.msra.mxu0 %v9281_v32 }
 0x25f   : > { %8242 = vmatprep.subr.bf16.mxu0 %v9282_v36  ;;  %v2568_v42 = vpack.c.bf16 %v7715_v40, %v7712_v37  ;;  %v9297_v40 = vld [vmem:[#allocation5 + $0x228] sm:$0xff]  }
 0x261   : > { %v7716_v43 = vpop.f32.mrb[100].mxu1 }
 0x262   : > { %8243 = vmatpush3.bf16.msra.mxu0 %v9282_v36  ;;  %v7717_v44 = vpop.f32.mrb[101].mxu1 }
 0x263   : > { %8244 = vmatprep.subr.bf16.mxu0 %v9283_v41  ;;  %v10485_v46 = vadd.f32 %v7717_v44, %v7716_v43  ;;  %v7719_v47 = vpop.f32.mrb[102].mxu1  ;;  %v9299_v43 = vld [vmem:[#allocation5 + $0x238] sm:$0xff]   ;;  %v7022_v44 = vld [vmem:[%s11163_s10] ss:$0 sm:$0xff] }
 0x264   : > { %v7720_v49 = vpop.f32.mrb[103].mxu1 }
 0x265   : > { %v7721_v50 = vadd.f32 %v7720_v49, %v7719_v47 }
 0x266   : > { %8245 = vmatpush3.bf16.msra.mxu0 %v9283_v41 }
 0x267   : > { %8254 = vmatprep.subr.bf16.mxu0 %v9284_v45  ;;  %v2569_v52 = vpack.c.bf16 %v7721_v50, %v10485_v46 }
 0x269   : > { %8247 = vmatmul.mubr.bf16.vlgmr.msra.gmra.mrb[16].mxu0 %v2313_v16  ;;  %v7722_v54 = vpop.f32.mrb[104].mxu1 }
 0x26a   : > { %8255 = vmatpush3.bf16.msra.mxu0 %v9284_v45  ;;  %8250 = vmatprep.mubr.bf16.mxu0 %v2314_v24  ;;  %v7723_v56 = vpop.f32.mrb[105].mxu1  ;;  %v9714_v45 = vmov 0.0  }
 0x26b   : > { %8256 = vmatprep.subr.bf16.mxu0 %v9285_v51  ;;  %v7724_v58 = vadd.f32 %v7723_v56, %v7722_v54  ;;  %v7725_v48 = vpop.f32.mrb[106].mxu1  ;;  %8302 = vmatprep.subr.bf16.mxu1 %v9714_v45 }
 0x26c   : > { %v7726_v53 = vpop.f32.mrb[107].mxu1  ;;  %8310 = vmatprep.mubr.msk.bf16.mxu1 %vm9716_vm0, %v9714_v45 }
 0x26d   : > { %v7727_v55 = vadd.f32 %v7726_v53, %v7725_v48 }
 0x26e   : > { %8257 = vmatpush3.bf16.msra.mxu0 %v9285_v51 }
 0x26f   : > { %8258 = vmatprep.subr.bf16.mxu0 %v9286_v57  ;;  %v2570_v61 = vpack.c.bf16 %v7727_v55, %v7724_v58 }
 0x271   : > { %8251 = vmatmul.mubr.bf16.gmra.mrb[20].mxu0 %v2315_v33  ;;  %v7728_v62 = vpop.f32.mrb[108].mxu1 }
 0x272   : > { %8259 = vmatpush3.bf16.msra.mxu0 %v9286_v57  ;;  %8270 = vmatprep.mubr.bf16.mxu0 %v2568_v42  ;;  %v7729_v63 = vpop.f32.mrb[109].mxu1  ;;  %v9298_v42 = vld [vmem:[#allocation5 + $0x230] sm:$0xff]  }
 0x273   : > { %8260 = vmatprep.subr.bf16.mxu0 %v9287_v60  ;;  %v7730_v2 = vadd.f32 %v7729_v63, %v7728_v62  ;;  %v7731_v4 = vpop.f32.mrb[110].mxu1  ;;  %v9302_v63 = vld [vmem:[#allocation7] sm:$0xff]  }
 0x274   : > { %v7732_v5 = vpop.f32.mrb[111].mxu1 }
 0x275   : > { %v7733_v6 = vadd.f32 %v7732_v5, %v7731_v4  ;;  %v9307_v4 = vld [vmem:[#allocation7 + $0x18] sm:$0xff]   ;;  %v9309_v5 = vld [vmem:[#allocation7 + $0x20] sm:$0xff]  }
 0x276   : > { %8261 = vmatpush3.bf16.msra.mxu0 %v9287_v60 }
 0x277   : > { %8262 = vmatprep.subr.bf16.mxu0 %v9288_v0  ;;  %v2571_v9 = vpack.c.bf16 %v7733_v6, %v7730_v2  ;;  %v9305_v2 = vld [vmem:[#allocation7 + $0x10] sm:$0xff]   ;;  %v9311_v6 = vld [vmem:[#allocation7 + $0x28] sm:$0xff]  }
 0x279   : > { %v7762_v11 = vpop.f32.mrb[112].mxu1 }
 0x27a   : > { %8263 = vmatpush3.bf16.msra.mxu0 %v9288_v0  ;;  %v7763_v12 = vpop.f32.mrb[113].mxu1  ;;  %v9303_v0 = vld [vmem:[#allocation7 + $0x8] sm:$0xff]  }
 0x27b   : > { %8264 = vmatprep.subr.bf16.mxu0 %v9289_v8  ;;  %v7764_v13 = vadd.f32 %v7763_v12, %v7762_v11  ;;  %v7765_v1 = vpop.f32.mrb[114].mxu1 }
 0x27c   : > { %v7766_v7 = vpop.f32.mrb[115].mxu1 }
 0x27d   : > { %v7767_v10 = vadd.f32 %v7766_v7, %v7765_v1 }
 0x27e   : > { %8265 = vmatpush3.bf16.msra.mxu0 %v9289_v8  ;;  %v9313_v8 = vld [vmem:[#allocation7 + $0x30] sm:$0xff]  }
 0x27f   : > { %8266 = vmatprep.subr.bf16.mxu0 %v9290_v3  ;;  %v2824_v15 = vpack.c.bf16 %v7767_v10, %v7764_v13 }
 0x281   : > { %v7768_v16 = vpop.f32.mrb[116].mxu1 }
 0x282   : > { %8267 = vmatpush3.bf16.msra.mxu0 %v9290_v3  ;;  %v7769_v17 = vpop.f32.mrb[117].mxu1 }
 0x283   : > { %8268 = vmatprep.subr.bf16.mxu0 %v9291_v14  ;;  %v7770_v19 = vadd.f32 %v7769_v17, %v7768_v16  ;;  %v7771_v20 = vpop.f32.mrb[118].mxu1 }
 0x284   : > { %v7772_v21 = vpop.f32.mrb[119].mxu1 }
 0x285   : > { %v7773_v22 = vadd.f32 %v7772_v21, %v7771_v20 }
 0x286   : > { %8269 = vmatpush3.bf16.msra.mxu0 %v9291_v14 }
 0x287   : > { %8278 = vmatprep.subr.bf16.mxu0 %v9292_v18  ;;  %v2825_v23 = vpack.c.bf16 %v7773_v22, %v7770_v19 }
 0x289   : > { %8271 = vmatmul.mubr.bf16.vlgmr.msra.gmra.mrb[16].mxu0 %v2569_v52  ;;  %v7774_v24 = vpop.f32.mrb[120].mxu1 }
 0x28a   : > { %8279 = vmatpush3.bf16.msra.mxu0 %v9292_v18  ;;  %8274 = vmatprep.mubr.bf16.mxu0 %v2570_v61  ;;  %v7775_v25 = vpop.f32.mrb[121].mxu1 }
 0x28b   : > { %8280 = vmatprep.subr.bf16.mxu0 %v9293_v59  ;;  %v7776_v27 = vadd.f32 %v7775_v25, %v7774_v24  ;;  %v7777_v28 = vpop.f32.mrb[122].mxu1 }
 0x28c   : > { %v7778_v29 = vpop.f32.mrb[123].mxu1 }
 0x28d   : > { %v7779_v30 = vadd.f32 %v7778_v29, %v7777_v28 }
 0x28e   : > { %8281 = vmatpush3.bf16.msra.mxu0 %v9293_v59 }
 0x28f   : > { %8282 = vmatprep.subr.bf16.mxu0 %v9294_v26  ;;  %v2826_v32 = vpack.c.bf16 %v7779_v30, %v7776_v27 }
 0x291   : > { %8275 = vmatmul.mubr.bf16.gmra.mrb[20].mxu0 %v2571_v9  ;;  %v7780_v33 = vpop.f32.mrb[124].mxu1  ;;  %v2990_v9 = vstv %s2981_s30 }
 0x292   : > { %8283 = vmatpush3.bf16.msra.mxu0 %v9294_v26  ;;  %8294 = vmatprep.mubr.bf16.mxu0 %v2824_v15  ;;  %v7781_v34 = vpop.f32.mrb[125].mxu1 }
 0x293   : > { %8284 = vmatprep.subr.bf16.mxu0 %v9295_v31  ;;  %v7782_v36 = vadd.f32 %v7781_v34, %v7780_v33  ;;  %v7783_v37 = vpop.f32.mrb[126].mxu1 }
 0x294   : > { %v7784_v38 = vpop.f32.mrb[127].mxu1 }
 0x295   : > { %v7785_v39 = vadd.f32 %v7784_v38, %v7783_v37 }
 0x296   : > { %8285 = vmatpush3.bf16.msra.mxu0 %v9295_v31 }
 0x297   : > { %8286 = vmatprep.subr.bf16.mxu0 %v9296_v35  ;;  %v2827_v41 = vpack.c.bf16 %v7785_v39, %v7782_v36 }
 0x29a   : > { %8287 = vmatpush3.bf16.msra.mxu0 %v9296_v35 }
 0x29b   : > { %8288 = vmatprep.subr.bf16.mxu0 %v9297_v40 }
 0x29e   : > { %8289 = vmatpush3.bf16.msra.mxu0 %v9297_v40 }
 0x29f   : > { %8290 = vmatprep.subr.bf16.mxu0 %v9298_v42 }
 0x2a2   : > { %8291 = vmatpush3.bf16.msra.mxu0 %v9298_v42  ;;  %v9300_v42 = vld [vmem:[%s11155_s2] sm:$0xff]  }
 0x2a3   : > { %8292 = vmatprep.subr.bf16.mxu0 %v9299_v43 }
 0x2a6   : > { %8293 = vmatpush3.bf16.msra.mxu0 %v9299_v43  ;;  %v9301_v43 = vld [vmem:[%s11155_s2 + $0x8] sm:$0xff]  }
 0x2a7   : > { %8346 = vmatprep.subr.bf16.mxu0 %v9714_v45 }
 0x2a9   : > { %8295 = vmatmul.mubr.bf16.vlgmr.msra.gmra.mrb[16].mxu0 %v2825_v23 }
 0x2aa   : > { %8298 = vmatprep.mubr.bf16.mxu0 %v2826_v32  ;;  %8347 = vmatpush3.bf16.msra.mxu0 %v9302_v63 }
 0x2ab   : > { %8348 = vmatprep.subr.bf16.mxu0 %v9714_v45 }
 0x2ae   : > { %8349 = vmatpush3.bf16.msra.mxu0 %v9303_v0 }
 0x2af   : > { %8350 = vmatprep.subr.bf16.mxu0 %v9714_v45 }
 0x2b1   : > { %8299 = vmatmul.mubr.bf16.gmra.mrb[20].mxu0 %v2827_v41 }
 0x2b2   : > { %8362 = vmatprep.mubr.msk.bf16.mxu0 %vm9716_vm0, %v9714_v45  ;;  %8351 = vmatpush3.bf16.msra.mxu0 %v9305_v2 }
 0x2b3   : > { %8352 = vmatprep.subr.bf16.mxu0 %v9714_v45 }
 0x2b6   : > { %8353 = vmatpush3.bf16.msra.mxu0 %v9307_v4  ;;  %v9318_v4 = vld [vmem:[%s11155_s2 + $0x10] sm:$0xff]  }
 0x2b7   : > { %8354 = vmatprep.subr.bf16.mxu0 %v9714_v45 }
 0x2ba   : > { %8355 = vmatpush3.bf16.msra.mxu0 %v9309_v5  ;;  %v9319_v5 = vld [vmem:[%s11155_s2 + $0x18] sm:$0xff]  }
 0x2bb   : > { %8356 = vmatprep.subr.bf16.mxu0 %v9714_v45 }
 0x2be   : > { %8357 = vmatpush3.bf16.msra.mxu0 %v9311_v6  ;;  %v9321_v6 = vld [vmem:[#allocation7 + $0x88] sm:$0xff]  }
 0x2bf   : > { %8358 = vmatprep.subr.bf16.mxu0 %v9714_v45 }
 0x2c2   : > { %8359 = vmatpush3.bf16.msra.mxu0 %v9313_v8  ;;  %v9322_v8 = vld [vmem:[#allocation7 + $0x90] sm:$0xff]  }
 0x2c3   : > { %8360 = vmatprep.subr.bf16.mxu0 %v9714_v45 }
 0x37c   : > { %v8296_v46 = vpop.f32.mrb[16].mxu0 }
 0x37d   : > { %v2975_v47 = vadd.f32 %v8296_v46, %v7022_v44  ;;  %v2927_v49 = vpop.f32.mrb[17].mxu0  ;;  %v9306_v46 = vld [vmem:[#allocation7 + $0x48] sm:$0xff]  }
 0x37e   : > { %v10493_v50 = vadd.f32 %v7022_v44, %v2927_v49  ;;  %v8297_v51 = vpop.f32.mrb[18].mxu0  ;;  %v9310_v49 = vld [vmem:[#allocation7 + $0x58] sm:$0xff]  }
 0x37f   : > { %3011 = vrot.lane.b32.xlu1 %v2975_v47, %s9715_s28  ;;  %v2930_v52 = vpop.f32.mrb[19].mxu0  ;;  %v2976_v54 = vadd.f32 %v8297_v51, %v7022_v44  ;;  %v2993_v12 = vmul.f32 %v2990_v9, %v2975_v47  ;;  %vm2984_vm1 = vcmp.gt.f32.partialorder %v2975_v47, 0.0  ;;  %v9315_v51 = vld [vmem:[#allocation7 + $0x38] sm:$0xff]  }
 0x380   : > { %3007 = vrot.lane.b32.xlu0 %v10493_v50, %s9715_s28  ;;  %v2974_v56 = vadd.f32 %v7022_v44, %v2930_v52  ;;  %v2991_v1 = vmul.f32 %v2990_v9, %v10493_v50  ;;  %vm2982_vm3 = vcmp.gt.f32.partialorder %v10493_v50, 0.0  ;;  %8361 = vmatpush3.bf16.msra.mxu0 %v9315_v51  ;;  %v9314_v52 = vld [vmem:[#allocation7 + $0x68] sm:$0xff]   ;;  %v9343_v51 = vld [vmem:[#allocation7 + $0x140] sm:$0xff]  }
 0x381   : > { %v2994_v3 = vmul.f32 %v2990_v9, %v2976_v54  ;;  %vm2985_vm2 = vcmp.gt.f32.partialorder %v2976_v54, 0.0  ;;  %v3001_v10 = vsel %vm2984_vm1, %v2975_v47, %v2993_v12  ;;  %v9308_v47 = vld [vmem:[#allocation7 + $0x50] sm:$0xff]   ;;  %8378 = vmatprep.subr.bf16.mxu0 %v9714_v45  ;;  %v9325_v12 = vld [vmem:[#allocation7 + $0xc0] sm:$0xff]  }
 0x382   : > { %v2992_v7 = vmul.f32 %v2990_v9, %v2974_v56  ;;  %vm2983_vm4 = vcmp.gt.f32.partialorder %v2974_v56, 0.0  ;;  %v2999_v17 = vsel %vm2982_vm3, %v10493_v50, %v2991_v1  ;;  %v9312_v50 = vld [vmem:[#allocation7 + $0x60] sm:$0xff]   ;;  %v9328_v1 = vld [vmem:[#allocation7 + $0xb0] sm:$0xff]  }
 0x383   : > { %3013 = vrot.lane.b32.xlu1 %v2976_v54, %s9715_s28  ;;  %v3002_v15 = vsel %vm2985_vm2, %v2976_v54, %v2994_v3  ;;  %v9316_v54 = vld [vmem:[#allocation7 + $0x70] sm:$0xff]   ;;  %v9326_v3 = vld [vmem:[#allocation7 + $0xa8] sm:$0xff]  }
 0x384   : > { %3009 = vrot.lane.b32.xlu0 %v2974_v56, %s9715_s28  ;;  %v8300_v57 = vpop.f32.mrb[20].mxu0  ;;  %v3000_v20 = vsel %vm2983_vm4, %v2974_v56, %v2992_v7  ;;  %v9317_v56 = vld [vmem:[#allocation7 + $0x78] sm:$0xff]   ;;  %v9329_v7 = vld [vmem:[#allocation7 + $0xd0] sm:$0xff]  }
 0x385   : > { %v2943_v58 = vpop.f32.mrb[21].mxu0  ;;  %v10510_v61 = vadd.f32 %v8300_v57, %v7022_v44 }
 0x386   : > { %v10500_v48 = vadd.f32 %v7022_v44, %v2943_v58  ;;  %v8301_v53 = vpop.f32.mrb[22].mxu0 }
 0x387   : > { %v2946_v55 = vpop.f32.mrb[23].mxu0  ;;  %v10514_v62 = vadd.f32 %v8301_v53, %v7022_v44  ;;  %v2997_v30 = vmul.f32 %v2990_v9, %v10510_v61  ;;  %vm2988_vm7 = vcmp.gt.f32.partialorder %v10510_v61, 0.0  ;;  %v9320_v53 = vld [vmem:[#allocation7 + $0x80] sm:$0xff]  }
 0x388   : > { %v10502_v60 = vadd.f32 %v7022_v44, %v2946_v55  ;;  %3015 = vrot.lane.b32.xlu0 %v10500_v48, %s9715_s28  ;;  %v2995_v23 = vmul.f32 %v2990_v9, %v10500_v48  ;;  %vm2986_vm5 = vcmp.gt.f32.partialorder %v10500_v48, 0.0  ;;  %v9304_v44 = vld [vmem:[#allocation7 + $0x40] sm:$0xff]  }
 0x389   : > { %v2998_v31 = vmul.f32 %v2990_v9, %v10514_v62  ;;  %vm2989_vm8 = vcmp.gt.f32.partialorder %v10514_v62, 0.0  ;;  %v3005_v36 = vsel %vm2988_vm7, %v10510_v61, %v2997_v30 }
 0x38a   : > { %3017 = vrot.lane.b32.xlu1 %v10502_v60, %s9715_s28  ;;  %v2996_v24 = vmul.f32 %v2990_v9, %v10502_v60  ;;  %vm2987_vm6 = vcmp.gt.f32.partialorder %v10502_v60, 0.0  ;;  %v3003_v27 = vsel %vm2986_vm5, %v10500_v48, %v2995_v23  ;;  %v9323_v9 = vld [vmem:[#allocation7 + $0x98] sm:$0xff]  }
 0x38b   : > { %v3006_v37 = vsel %vm2989_vm8, %v10514_v62, %v2998_v31 }
 0x38c   : > { %3019 = vrot.lane.b32.xlu0 %v10510_v61, %s9715_s28  ;;  %v3004_v29 = vsel %vm2987_vm6, %v10502_v60, %v2996_v24 }
 0x38e   : > { %3021 = vrot.lane.b32.xlu1 %v10514_v62, %s9715_s28 }
 0x3f1   : > { %v3012_v11 = vpop.permute.xlu1 %3011 }
 0x3f2   : > { %v3008_v13 = vpop.permute.xlu0 %3007  ;;  %v3025_v16 = vadd.f32 %v3012_v11, %v3001_v10  ;;  %v9324_v11 = vld [vmem:[#allocation7 + $0xa0] sm:$0xff]   ;;  %v9330_v10 = vld [vmem:[#allocation7 + $0xb8] sm:$0xff]  }
 0x3f3   : > { %v3023_v21 = vadd.f32 %v3008_v13, %v2999_v17  ;;  %v9327_v13 = vld [vmem:[#allocation7 + $0xc8] sm:$0xff]   ;;  %v9334_v17 = vld [vmem:[#allocation7 + $0xf0] sm:$0xff]  }
 0x3f5   : > { %v3014_v14 = vpop.permute.xlu1 %3013 }
 0x3f6   : > { %v3026_v18 = vadd.f32 %v3014_v14, %v3002_v15  ;;  %v3010_v19 = vpop.permute.xlu0 %3009  ;;  %v9331_v14 = vld [vmem:[#allocation7 + $0xd8] sm:$0xff]   ;;  %v9332_v15 = vld [vmem:[#allocation7 + $0xe0] sm:$0xff]  }
 0x3f7   : > { %v3024_v22 = vadd.f32 %v3010_v19, %v3000_v20 }
 0x3f8   : > { %v10530_v59 = vpack.c.bf16 %v3026_v18, %v3025_v16  ;;  %v9333_v16 = vld [vmem:[#allocation7 + $0xe8] sm:$0xff]   ;;  %v9335_v18 = vld [vmem:[#allocation7 + $0xf8] sm:$0xff]  }
 0x3f9   : > { %v10534_v25 = vpack.c.bf16 %v3024_v22, %v3023_v21 }
 0x3fa   : > { %v3016_v26 = vpop.permute.xlu0 %3015 }
 0x3fb   : > { %8303 = vmatpush3.bf16.msra.mxu1 %v10534_v25  ;;  %v3027_v32 = vadd.f32 %v3016_v26, %v3003_v27 }
 0x3fc   : > { %v3018_v28 = vpop.permute.xlu1 %3017  ;;  %8304 = vmatprep.subr.bf16.mxu1 %v9714_v45 }
 0x3fd   : > { %v3028_v33 = vadd.f32 %v3018_v28, %v3004_v29 }
 0x3fe   : > { %v3020_v34 = vpop.permute.xlu0 %3019 }
 0x3ff   : > { %v10546_v35 = vpack.c.bf16 %v3028_v33, %v3027_v32  ;;  %8305 = vmatpush3.bf16.msra.mxu1 %v10530_v59  ;;  %v3029_v39 = vadd.f32 %v3020_v34, %v3005_v36 }
 0x400   : > { %v3022_v38 = vpop.permute.xlu1 %3021  ;;  %8306 = vmatprep.subr.bf16.mxu1 %v9714_v45 }
 0x401   : > { %v3030_v40 = vadd.f32 %v3022_v38, %v3006_v37  ;;  %v9336_v38 = vld [vmem:[%s11155_s2 + $0x20] sm:$0xff]  }
 0x403   : > { %v10552_v41 = vpack.c.bf16 %v3030_v40, %v3029_v39  ;;  %8307 = vmatpush3.bf16.msra.mxu1 %v10546_v35 }
 0x404   : > { %8308 = vmatprep.subr.bf16.mxu1 %v9714_v45 }
 0x407   : > { %8309 = vmatpush3.bf16.msra.mxu1 %v10552_v41 }
 0x408   : > { %8314 = vmatprep.subr.bf16.mxu1 %v9714_v45 }
 0x40a   : > { %8311 = vmatmul.mubr.msk.bf16.vlgmr.msra.gmra.mrb[128].mxu1 %vm3042_vm9, %v9300_v42  ;;  %v9338_v42 = vld [vmem:[#allocation7 + $0x100] sm:$0xff]  }
 0x40b   : > { %8315 = vmatpush3.bf16.msra.mxu1 %v10534_v25  ;;  %8322 = vmatprep.mubr.msk.bf16.mxu1 %vm9716_vm0, %v9714_v45 }
 0x40c   : > { %8316 = vmatprep.subr.bf16.mxu1 %v9714_v45 }
 0x40f   : > { %8317 = vmatpush3.bf16.msra.mxu1 %v10530_v59 }
 0x410   : > { %8318 = vmatprep.subr.bf16.mxu1 %v9714_v45 }
 0x413   : > { %8319 = vmatpush3.bf16.msra.mxu1 %v10546_v35 }
 0x414   : > { %8320 = vmatprep.subr.bf16.mxu1 %v9714_v45 }
 0x417   : > { %8321 = vmatpush3.bf16.msra.mxu1 %v10552_v41 }
 0x418   : > { %8326 = vmatprep.subr.bf16.mxu1 %v9714_v45 }
 0x41a   : > { %8323 = vmatmul.mubr.msk.bf16.vlgmr.msra.gmra.mrb[132].mxu1 %vm3042_vm9, %v9301_v43 }
 0x41b   : > { %8327 = vmatpush3.bf16.msra.mxu1 %v9304_v44  ;;  %8342 = vmatprep.mubr.msk.bf16.mxu1 %vm9716_vm0, %v9714_v45  ;;  %v9339_v44 = vld [vmem:[#allocation7 + $0x108] sm:$0xff]  }
 0x41c   : > { %8328 = vmatprep.subr.bf16.mxu1 %v9714_v45 }
 0x41f   : > { %8329 = vmatpush3.bf16.msra.mxu1 %v9306_v46  ;;  %v9340_v46 = vld [vmem:[#allocation7 + $0x110] sm:$0xff]  }
 0x420   : > { %8330 = vmatprep.subr.bf16.mxu1 %v9714_v45 }
 0x423   : > { %8331 = vmatpush3.bf16.msra.mxu1 %v9308_v47  ;;  %v9337_v47 = vld [vmem:[%s11155_s2 + $0x28] sm:$0xff]  }
 0x424   : > { %8332 = vmatprep.subr.bf16.mxu1 %v9714_v45 }
 0x427   : > { %8333 = vmatpush3.bf16.msra.mxu1 %v9310_v49  ;;  %v9341_v49 = vld [vmem:[#allocation7 + $0x118] sm:$0xff]  }
 0x428   : > { %8334 = vmatprep.subr.bf16.mxu1 %v9714_v45 }
 0x42b   : > { %8335 = vmatpush3.bf16.msra.mxu1 %v9312_v50  ;;  %v9342_v50 = vld [vmem:[#allocation7 + $0x120] sm:$0xff]  }
 0x42c   : > { %8336 = vmatprep.subr.bf16.mxu1 %v9714_v45 }
 0x42f   : > { %8337 = vmatpush3.bf16.msra.mxu1 %v9314_v52  ;;  %v9344_v52 = vld [vmem:[#allocation7 + $0x128] sm:$0xff]  }
 0x430   : > { %8338 = vmatprep.subr.bf16.mxu1 %v9714_v45 }
 0x433   : > { %8339 = vmatpush3.bf16.msra.mxu1 %v9316_v54  ;;  %v9345_v54 = vld [vmem:[#allocation7 + $0x148] sm:$0xff]  }
 0x434   : > { %8340 = vmatprep.subr.bf16.mxu1 %v9714_v45 }
 0x437   : > { %8341 = vmatpush3.bf16.msra.mxu1 %v9317_v56  ;;  %v9346_v56 = vld [vmem:[#allocation7 + $0x130] sm:$0xff]  }
 0x438   : > { %8366 = vmatprep.subr.bf16.mxu1 %v9714_v45 }
 0x4dd   : > { %v3080_v57 = vpop.f32.mrb[128].mxu1 }
 0x4de   : > { %v8312_v58 = vpop.f32.mrb[129].mxu1 }
 0x4df   : > { %v3083_v48 = vpop.f32.mrb[130].mxu1  ;;  %v9348_v58 = vld [vmem:[#allocation7 + $0x138] sm:$0xff]  }
 0x4e0   : > { %v3087_v55 = vpack.c.bf16 %v3083_v48, %v3080_v57  ;;  %v8313_v60 = vpop.f32.mrb[131].mxu1  ;;  %v9347_v57 = vld [vmem:[#allocation7 + $0x150] sm:$0xff]   ;;  %v9349_v48 = vld [vmem:[#allocation7 + $0x158] sm:$0xff]  }
 0x4e1   : > { %v9352_v60 = vld [vmem:[#allocation7 + $0x170] sm:$0xff]  }
 0x4e2   : > { %8363 = vmatmul.mubr.bf16.vlgmr.msra.gmra.mrb[24].mxu0 %v3087_v55  ;;  %v9351_v55 = vld [vmem:[#allocation7 + $0x168] sm:$0xff]  }
 0x4e3   : > { %8379 = vmatpush3.bf16.msra.mxu0 %v9320_v53  ;;  %8394 = vmatprep.mubr.msk.bf16.mxu0 %vm9716_vm0, %v9714_v45  ;;  %v9350_v53 = vld [vmem:[#allocation7 + $0x160] sm:$0xff]  }
 0x4e4   : > { %8380 = vmatprep.subr.bf16.mxu0 %v9714_v45 }
 0x4e7   : > { %8381 = vmatpush3.bf16.msra.mxu0 %v9321_v6 }
 0x4e8   : > { %8382 = vmatprep.subr.bf16.mxu0 %v9714_v45 }
 0x4eb   : > { %8383 = vmatpush3.bf16.msra.mxu0 %v9322_v8 }
 0x4ec   : > { %8384 = vmatprep.subr.bf16.mxu0 %v9714_v45 }
 0x4ed   : > { %v3149_v61 = vpop.f32.mrb[132].mxu1 }
 0x4ee   : > { %v8324_v62 = vpop.f32.mrb[133].mxu1 }
 0x4ef   : > { %v3152_v63 = vpop.f32.mrb[134].mxu1  ;;  %8385 = vmatpush3.bf16.msra.mxu0 %v9323_v9 }
 0x4f0   : > { %v3156_v0 = vpack.c.bf16 %v3152_v63, %v3149_v61  ;;  %v8325_v2 = vpop.f32.mrb[135].mxu1  ;;  %8386 = vmatprep.subr.bf16.mxu0 %v9714_v45  ;;  %v9353_v61 = vld [vmem:[#allocation7 + $0x178] sm:$0xff]  }
 0x4f2   : > { %8343 = vmatmul.mubr.bf16.vlgmr.msra.gmra.mrb[136].mxu1 %v3156_v0 }
 0x4f3   : > { %8367 = vmatpush3.bf16.msra.mxu1 %v10534_v25  ;;  %8374 = vmatprep.mubr.msk.bf16.mxu1 %vm9716_vm0, %v9714_v45 }
 0x4f4   : > { %8368 = vmatprep.subr.bf16.mxu1 %v9714_v45  ;;  %8387 = vmatpush3.bf16.msra.mxu0 %v9324_v11 }
 0x4f5   : > { %8388 = vmatprep.subr.bf16.mxu0 %v9714_v45 }
 0x4f7   : > { %8369 = vmatpush3.bf16.msra.mxu1 %v10530_v59 }
 0x4f8   : > { %8370 = vmatprep.subr.bf16.mxu1 %v9714_v45  ;;  %8389 = vmatpush3.bf16.msra.mxu0 %v9326_v3 }
 0x4f9   : > { %8390 = vmatprep.subr.bf16.mxu0 %v9714_v45 }
 0x4fb   : > { %8371 = vmatpush3.bf16.msra.mxu1 %v10546_v35 }
 0x4fc   : > { %8372 = vmatprep.subr.bf16.mxu1 %v9714_v45  ;;  %8391 = vmatpush3.bf16.msra.mxu0 %v9328_v1 }
 0x4fd   : > { %8392 = vmatprep.subr.bf16.mxu0 %v9714_v45 }
 0x4ff   : > { %8373 = vmatpush3.bf16.msra.mxu1 %v10552_v41 }
 0x500   : > { %8398 = vmatprep.subr.bf16.mxu1 %v9714_v45  ;;  %8393 = vmatpush3.bf16.msra.mxu0 %v9330_v10 }
 0x501   : > { %8430 = vmatprep.subr.bf16.mxu0 %v9714_v45 }
 0x502   : > { %8375 = vmatmul.mubr.msk.bf16.vlgmr.msra.gmra.mrb[140].mxu1 %vm3042_vm9, %v9318_v4 }
 0x503   : > { %8399 = vmatpush3.bf16.msra.mxu1 %v10534_v25  ;;  %8406 = vmatprep.mubr.msk.bf16.mxu1 %vm9716_vm0, %v9714_v45 }
 0x504   : > { %8400 = vmatprep.subr.bf16.mxu1 %v9714_v45 }
 0x507   : > { %8401 = vmatpush3.bf16.msra.mxu1 %v10530_v59 }
 0x508   : > { %8402 = vmatprep.subr.bf16.mxu1 %v9714_v45 }
 0x50b   : > { %8403 = vmatpush3.bf16.msra.mxu1 %v10546_v35 }
 0x50c   : > { %8404 = vmatprep.subr.bf16.mxu1 %v9714_v45 }
 0x50f   : > { %8405 = vmatpush3.bf16.msra.mxu1 %v10552_v41 }
 0x510   : > { %8410 = vmatprep.subr.bf16.mxu1 %v9714_v45 }
 0x512   : > { %8407 = vmatmul.mubr.msk.bf16.vlgmr.msra.gmra.mrb[144].mxu1 %vm3042_vm9, %v9319_v5 }
 0x513   : > { %8426 = vmatprep.mubr.msk.bf16.mxu1 %vm9716_vm0, %v9714_v45  ;;  %8411 = vmatpush3.bf16.msra.mxu1 %v9325_v12 }
 0x514   : > { %8412 = vmatprep.subr.bf16.mxu1 %v9714_v45 }
 0x517   : > { %8413 = vmatpush3.bf16.msra.mxu1 %v9327_v13 }
 0x518   : > { %8414 = vmatprep.subr.bf16.mxu1 %v9714_v45 }
 0x51b   : > { %8415 = vmatpush3.bf16.msra.mxu1 %v9329_v7 }
 0x51c   : > { %8416 = vmatprep.subr.bf16.mxu1 %v9714_v45 }
 0x51f   : > { %8417 = vmatpush3.bf16.msra.mxu1 %v9331_v14 }
 0x520   : > { %8418 = vmatprep.subr.bf16.mxu1 %v9714_v45 }
 0x523   : > { %8419 = vmatpush3.bf16.msra.mxu1 %v9332_v15 }
 0x524   : > { %8420 = vmatprep.subr.bf16.mxu1 %v9714_v45 }
 0x527   : > { %8421 = vmatpush3.bf16.msra.mxu1 %v9333_v16 }
 0x528   : > { %8422 = vmatprep.subr.bf16.mxu1 %v9714_v45 }
 0x52b   : > { %8423 = vmatpush3.bf16.msra.mxu1 %v9334_v17  ;;  %v9354_v17 = vld [vmem:[%s11155_s2 + $0x30] sm:$0xff]  }
 0x52c   : > { %8424 = vmatprep.subr.bf16.mxu1 %v9714_v45 }
 0x52f   : > { %8425 = vmatpush3.bf16.msra.mxu1 %v9335_v18 }
 0x530   : > { %8462 = vmatprep.subr.bf16.mxu1 %v9714_v45 }
 0x5b5   : > { %v3345_v19 = vpop.f32.mrb[24].mxu0 }
 0x5b6   : > { %v8364_v20 = vpop.f32.mrb[25].mxu0 }
 0x5b7   : > { %v3348_v21 = vpop.f32.mrb[26].mxu0  ;;  %v9356_v20 = vld [vmem:[#allocation7 + $0x180] sm:$0xff]  }
 0x5b8   : > { %v8365_v22 = vpop.f32.mrb[27].mxu0 }
 0x5b9   : > { %v9357_v22 = vld [vmem:[#allocation7 + $0x188] sm:$0xff]  }
 0x5c5   : > { %v3256_v23 = vpop.f32.mrb[136].mxu1 }
 0x5c6   : > { %v10635_v24 = vadd.f32 %v3345_v19, %v3256_v23  ;;  %v8344_v26 = vpop.f32.mrb[137].mxu1  ;;  %v9358_v23 = vld [vmem:[#allocation7 + $0x190] sm:$0xff]  }
 0x5c7   : > { %v3259_v27 = vpop.f32.mrb[138].mxu1  ;;  %v9359_v26 = vld [vmem:[#allocation7 + $0x198] sm:$0xff]  }
 0x5c8   : > { %v10637_v28 = vadd.f32 %v3348_v21, %v3259_v27  ;;  %v8345_v29 = vpop.f32.mrb[139].mxu1  ;;  %v9360_v27 = vld [vmem:[#allocation7 + $0x1a0] sm:$0xff]  }
 0x5c9   : > { %v9362_v29 = vld [vmem:[#allocation7 + $0x1a8] sm:$0xff]  }
 0x5d5   : > { %v3397_v30 = vpop.f32.mrb[140].mxu1 }
 0x5d6   : > { %v8376_v31 = vpop.f32.mrb[141].mxu1 }
 0x5d7   : > { %v3400_v32 = vpop.f32.mrb[142].mxu1  ;;  %v9364_v31 = vld [vmem:[#allocation7 + $0x1b0] sm:$0xff]  }
 0x5d8   : > { %v3404_v33 = vpack.c.bf16 %v3400_v32, %v3397_v30  ;;  %v8377_v34 = vpop.f32.mrb[143].mxu1  ;;  %v9363_v30 = vld [vmem:[#allocation7 + $0x1c8] sm:$0xff]   ;;  %v9365_v32 = vld [vmem:[#allocation7 + $0x1d0] sm:$0xff]  }
 0x5d9   : > { %v9367_v34 = vld [vmem:[#allocation7 + $0x1d8] sm:$0xff]  }
 0x5da   : > { %8395 = vmatmul.mubr.bf16.vlgmr.msra.gmra.mrb[28].mxu0 %v3404_v33  ;;  %v9366_v33 = vld [vmem:[#allocation7 + $0x1b8] sm:$0xff]  }
 0x5db   : > { %8431 = vmatpush3.bf16.msra.mxu0 %v10534_v25  ;;  %8438 = vmatprep.mubr.msk.bf16.mxu0 %vm9716_vm0, %v9714_v45 }
 0x5dc   : > { %8432 = vmatprep.subr.bf16.mxu0 %v9714_v45 }
 0x5df   : > { %8433 = vmatpush3.bf16.msra.mxu0 %v10530_v59 }
 0x5e0   : > { %8434 = vmatprep.subr.bf16.mxu0 %v9714_v45 }
 0x5e3   : > { %8435 = vmatpush3.bf16.msra.mxu0 %v10546_v35 }
 0x5e4   : > { %8436 = vmatprep.subr.bf16.mxu0 %v9714_v45 }
 0x5e5   : > { %v3558_v36 = vpop.f32.mrb[144].mxu1 }
 0x5e6   : > { %v8408_v37 = vpop.f32.mrb[145].mxu1 }
 0x5e7   : > { %8437 = vmatpush3.bf16.msra.mxu0 %v10552_v41  ;;  %v3561_v39 = vpop.f32.mrb[146].mxu1  ;;  %v9369_v37 = vld [vmem:[#allocation7 + $0x1e8] sm:$0xff]  }
 0x5e8   : > { %v3565_v40 = vpack.c.bf16 %v3561_v39, %v3558_v36  ;;  %8442 = vmatprep.subr.bf16.mxu0 %v9714_v45  ;;  %v8409_v43 = vpop.f32.mrb[147].mxu1  ;;  %v9368_v36 = vld [vmem:[#allocation7 + $0x1e0] sm:$0xff]   ;;  %v9371_v39 = vld [vmem:[#allocation7 + $0x1f8] sm:$0xff]  }
 0x5ea   : > { %8439 = vmatmul.mubr.msk.bf16.vlgmr.msra.gmra.mrb[32].mxu0 %vm3042_vm9, %v9336_v38  ;;  %8427 = vmatmul.mubr.bf16.vlgmr.msra.gmra.mrb[148].mxu1 %v3565_v40  ;;  %v9370_v38 = vld [vmem:[#allocation7 + $0x1f0] sm:$0xff]  }
 0x5eb   : > { %8463 = vmatpush3.bf16.msra.mxu1 %v10534_v25  ;;  %8470 = vmatprep.mubr.msk.bf16.mxu1 %vm9716_vm0, %v9714_v45 }
 0x5ec   : > { %8464 = vmatprep.subr.bf16.mxu1 %v9714_v45  ;;  %8443 = vmatpush3.bf16.msra.mxu0 %v9338_v42 }
 0x5ed   : > { %8444 = vmatprep.subr.bf16.mxu0 %v9714_v45  ;;  %8458 = vmatprep.mubr.msk.bf16.mxu0 %vm9716_vm0, %v9714_v45 }
 0x5ef   : > { %8465 = vmatpush3.bf16.msra.mxu1 %v10530_v59 }
 0x5f0   : > { %8466 = vmatprep.subr.bf16.mxu1 %v9714_v45  ;;  %8445 = vmatpush3.bf16.msra.mxu0 %v9339_v44 }
 0x5f1   : > { %8446 = vmatprep.subr.bf16.mxu0 %v9714_v45 }
 0x5f3   : > { %8467 = vmatpush3.bf16.msra.mxu1 %v10546_v35 }
 0x5f4   : > { %8468 = vmatprep.subr.bf16.mxu1 %v9714_v45  ;;  %8447 = vmatpush3.bf16.msra.mxu0 %v9340_v46 }
 0x5f5   : > { %8448 = vmatprep.subr.bf16.mxu0 %v9714_v45 }
 0x5f7   : > { %8469 = vmatpush3.bf16.msra.mxu1 %v10552_v41 }
 0x5f8   : > { %8474 = vmatprep.subr.bf16.mxu1 %v9714_v45  ;;  %8449 = vmatpush3.bf16.msra.mxu0 %v9341_v49 }
 0x5f9   : > { %8450 = vmatprep.subr.bf16.mxu0 %v9714_v45 }
 0x5fa   : > { %8471 = vmatmul.mubr.msk.bf16.vlgmr.msra.gmra.mrb[152].mxu1 %vm3042_vm9, %v9337_v47 }
 0x5fb   : > { %8490 = vmatprep.mubr.msk.bf16.mxu1 %vm9716_vm0, %v9714_v45  ;;  %8475 = vmatpush3.bf16.msra.mxu1 %v9343_v51 }
 0x5fc   : > { %8451 = vmatpush3.bf16.msra.mxu0 %v9342_v50  ;;  %8476 = vmatprep.subr.bf16.mxu1 %v9714_v45 }
 0x5fd   : > { %8452 = vmatprep.subr.bf16.mxu0 %v9714_v45 }
 0x5ff   : > { %8477 = vmatpush3.bf16.msra.mxu1 %v9345_v54 }
 0x600   : > { %8453 = vmatpush3.bf16.msra.mxu0 %v9344_v52  ;;  %8478 = vmatprep.subr.bf16.mxu1 %v9714_v45 }
 0x601   : > { %8454 = vmatprep.subr.bf16.mxu0 %v9714_v45 }
 0x603   : > { %8479 = vmatpush3.bf16.msra.mxu1 %v9347_v57 }
 0x604   : > { %8455 = vmatpush3.bf16.msra.mxu0 %v9346_v56  ;;  %8480 = vmatprep.subr.bf16.mxu1 %v9714_v45 }
 0x605   : > { %8456 = vmatprep.subr.bf16.mxu0 %v9714_v45 }
 0x607   : > { %8481 = vmatpush3.bf16.msra.mxu1 %v9349_v48 }
 0x608   : > { %8457 = vmatpush3.bf16.msra.mxu0 %v9348_v58  ;;  %8482 = vmatprep.subr.bf16.mxu1 %v9714_v45 }
 0x609   : > { %8494 = vmatprep.subr.bf16.mxu0 %v9714_v45 }
 0x60b   : > { %8483 = vmatpush3.bf16.msra.mxu1 %v9350_v53 }
 0x60c   : > { %8484 = vmatprep.subr.bf16.mxu1 %v9714_v45 }
 0x60f   : > { %8485 = vmatpush3.bf16.msra.mxu1 %v9351_v55 }
 0x610   : > { %8486 = vmatprep.subr.bf16.mxu1 %v9714_v45 }
 0x613   : > { %8487 = vmatpush3.bf16.msra.mxu1 %v9352_v60 }
 0x614   : > { %8488 = vmatprep.subr.bf16.mxu1 %v9714_v45 }
 0x617   : > { %8489 = vmatpush3.bf16.msra.mxu1 %v9353_v61 }
 0x618   : > { %8526 = vmatprep.subr.bf16.mxu1 %v9714_v45 }
 0x6ad   : > { %v3504_v62 = vpop.f32.mrb[28].mxu0 }
 0x6ae   : > { %v3511_v63 = vadd.f32 %v3504_v62, %v10635_v24  ;;  %v8396_v0 = vpop.f32.mrb[29].mxu0  ;;  %v9355_v24 = vld [vmem:[%s11155_s2 + $0x38] sm:$0xff]   ;;  %v9372_v62 = vld [vmem:[%s11155_s2 + $0x40] sm:$0xff]  }
 0x6af   : > { %v3507_v2 = vpop.f32.mrb[30].mxu0 }
 0x6b0   : > { %v3512_v4 = vadd.f32 %v3507_v2, %v10637_v28  ;;  %v8397_v5 = vpop.f32.mrb[31].mxu0  ;;  %v9361_v28 = vld [vmem:[#allocation7 + $0x1c0] sm:$0xff]   ;;  %v9376_v2 = vld [vmem:[#allocation7 + $0x218] sm:$0xff]  }
 0x6b1   : > { %v9378_v5 = vld [vmem:[#allocation7 + $0x228] sm:$0xff]  }
 0x6bd   : > { %v3719_v6 = vpop.f32.mrb[32].mxu0  ;;  %v3665_v8 = vpop.f32.mrb[148].mxu1 }
 0x6be   : > { %v10689_v9 = vadd.f32 %v3665_v8, %v3511_v63  ;;  %v8440_v11 = vpop.f32.mrb[33].mxu0  ;;  %v8428_v12 = vpop.f32.mrb[149].mxu1  ;;  %v9373_v63 = vld [vmem:[#allocation7 + $0x200] sm:$0xff]   ;;  %v9380_v8 = vld [vmem:[#allocation7 + $0x238] sm:$0xff]  }
 0x6bf   : > { %v3722_v3 = vpop.f32.mrb[34].mxu0  ;;  %v3668_v13 = vpop.f32.mrb[150].mxu1 }
 0x6c0   : > { %v3726_v1 = vpack.c.bf16 %v3722_v3, %v3719_v6  ;;  %v10691_v7 = vadd.f32 %v3668_v13, %v3512_v4  ;;  %v8441_v10 = vpop.f32.mrb[35].mxu0  ;;  %v8429_v14 = vpop.f32.mrb[151].mxu1  ;;  %v9377_v4 = vld [vmem:[#allocation7 + $0x220] sm:$0xff]   ;;  %v9379_v6 = vld [vmem:[#allocation7 + $0x230] sm:$0xff]  }
 0x6c2   : > { %8459 = vmatmul.mubr.bf16.vlgmr.msra.gmra.mrb[36].mxu0 %v3726_v1 }
 0x6c3   : > { %8495 = vmatpush3.bf16.msra.mxu0 %v10534_v25  ;;  %8502 = vmatprep.mubr.msk.bf16.mxu0 %vm9716_vm0, %v9714_v45 }
 0x6c4   : > { %8496 = vmatprep.subr.bf16.mxu0 %v9714_v45 }
 0x6c7   : > { %8497 = vmatpush3.bf16.msra.mxu0 %v10530_v59 }
 0x6c8   : > { %8498 = vmatprep.subr.bf16.mxu0 %v9714_v45 }
 0x6cb   : > { %8499 = vmatpush3.bf16.msra.mxu0 %v10546_v35 }
 0x6cc   : > { %8500 = vmatprep.subr.bf16.mxu0 %v9714_v45 }
 0x6cd   : > { %v3880_v15 = vpop.f32.mrb[152].mxu1 }
 0x6ce   : > { %v8472_v16 = vpop.f32.mrb[153].mxu1 }
 0x6cf   : > { %8501 = vmatpush3.bf16.msra.mxu0 %v10552_v41  ;;  %v3883_v18 = vpop.f32.mrb[154].mxu1 }
 0x6d0   : > { %v3887_v19 = vpack.c.bf16 %v3883_v18, %v3880_v15  ;;  %8506 = vmatprep.subr.bf16.mxu0 %v9714_v45  ;;  %v8473_v21 = vpop.f32.mrb[155].mxu1 }
 0x6d2   : > { %8503 = vmatmul.mubr.msk.bf16.vlgmr.msra.gmra.mrb[40].mxu0 %vm3042_vm9, %v9354_v17  ;;  %8491 = vmatmul.mubr.bf16.vlgmr.msra.gmra.mrb[156].mxu1 %v3887_v19 }
 0x6d3   : > { %8527 = vmatpush3.bf16.msra.mxu1 %v10534_v25  ;;  %8534 = vmatprep.mubr.msk.bf16.mxu1 %vm9716_vm0, %v9714_v45 }
 0x6d4   : > { %8528 = vmatprep.subr.bf16.mxu1 %v9714_v45  ;;  %8507 = vmatpush3.bf16.msra.mxu0 %v9356_v20 }
 0x6d5   : > { %8508 = vmatprep.subr.bf16.mxu0 %v9714_v45  ;;  %8522 = vmatprep.mubr.msk.bf16.mxu0 %vm9716_vm0, %v9714_v45 }
 0x6d7   : > { %8529 = vmatpush3.bf16.msra.mxu1 %v10530_v59 }
 0x6d8   : > { %8530 = vmatprep.subr.bf16.mxu1 %v9714_v45  ;;  %8509 = vmatpush3.bf16.msra.mxu0 %v9357_v22 }
 0x6d9   : > { %8510 = vmatprep.subr.bf16.mxu0 %v9714_v45 }
 0x6db   : > { %8531 = vmatpush3.bf16.msra.mxu1 %v10546_v35 }
 0x6dc   : > { %8532 = vmatprep.subr.bf16.mxu1 %v9714_v45  ;;  %8511 = vmatpush3.bf16.msra.mxu0 %v9358_v23 }
 0x6dd   : > { %8512 = vmatprep.subr.bf16.mxu0 %v9714_v45 }
 0x6df   : > { %8533 = vmatpush3.bf16.msra.mxu1 %v10552_v41 }
 0x6e0   : > { %8538 = vmatprep.subr.bf16.mxu1 %v9714_v45  ;;  %8513 = vmatpush3.bf16.msra.mxu0 %v9359_v26 }
 0x6e1   : > { %8514 = vmatprep.subr.bf16.mxu0 %v9714_v45 }
 0x6e2   : > { %8535 = vmatmul.mubr.msk.bf16.vlgmr.msra.gmra.mrb[160].mxu1 %vm3042_vm9, %v9355_v24  ;;  %v7130_v24 = vld [vmem:[%s11163_s10 + $0x1] ss:$0 sm:$0xff] }
 0x6e3   : > { %8554 = vmatprep.mubr.msk.bf16.mxu1 %vm9716_vm0, %v9714_v45  ;;  %8539 = vmatpush3.bf16.msra.mxu1 %v9361_v28 }
 0x6e4   : > { %8515 = vmatpush3.bf16.msra.mxu0 %v9360_v27  ;;  %8540 = vmatprep.subr.bf16.mxu1 %v9714_v45 }
 0x6e5   : > { %8516 = vmatprep.subr.bf16.mxu0 %v9714_v45 }
 0x6e7   : > { %8541 = vmatpush3.bf16.msra.mxu1 %v9363_v30 }
 0x6e8   : > { %8517 = vmatpush3.bf16.msra.mxu0 %v9362_v29  ;;  %8542 = vmatprep.subr.bf16.mxu1 %v9714_v45 }
 0x6e9   : > { %8518 = vmatprep.subr.bf16.mxu0 %v9714_v45 }
 0x6eb   : > { %8543 = vmatpush3.bf16.msra.mxu1 %v9365_v32 }
 0x6ec   : > { %8519 = vmatpush3.bf16.msra.mxu0 %v9364_v31  ;;  %8544 = vmatprep.subr.bf16.mxu1 %v9714_v45 }
 0x6ed   : > { %8520 = vmatprep.subr.bf16.mxu0 %v9714_v45 }
 0x6ef   : > { %8545 = vmatpush3.bf16.msra.mxu1 %v9367_v34  ;;  %v9382_v34 = vld [vmem:[#allocation8 + $0x8] sm:$0xff]  }
 0x6f0   : > { %8521 = vmatpush3.bf16.msra.mxu0 %v9366_v33  ;;  %8546 = vmatprep.subr.bf16.mxu1 %v9714_v45  ;;  %v9381_v33 = vld [vmem:[#allocation8] sm:$0xff]  }
 0x6f1   : > { %8558 = vmatprep.subr.bf16.mxu0 %v9714_v45 }
 0x6f3   : > { %8547 = vmatpush3.bf16.msra.mxu1 %v9368_v36  ;;  %v9384_v36 = vld [vmem:[#allocation8 + $0x10] sm:$0xff]  }
 0x6f4   : > { %8548 = vmatprep.subr.bf16.mxu1 %v9714_v45 }
 0x6f7   : > { %8549 = vmatpush3.bf16.msra.mxu1 %v9369_v37  ;;  %v9386_v37 = vld [vmem:[#allocation8 + $0x18] sm:$0xff]  }
 0x6f8   : > { %8550 = vmatprep.subr.bf16.mxu1 %v9714_v45 }
 0x6fb   : > { %8551 = vmatpush3.bf16.msra.mxu1 %v9370_v38  ;;  %v9388_v38 = vld [vmem:[#allocation8 + $0x20] sm:$0xff]  }
 0x6fc   : > { %8552 = vmatprep.subr.bf16.mxu1 %v9714_v45 }
 0x6ff   : > { %8553 = vmatpush3.bf16.msra.mxu1 %v9371_v39  ;;  %v9390_v39 = vld [vmem:[#allocation8 + $0x28] sm:$0xff]  }
 0x700   : > { %8590 = vmatprep.subr.bf16.mxu1 %v9714_v45 }
 0x795   : > { %v3826_v40 = vpop.f32.mrb[36].mxu0 }
 0x796   : > { %v3833_v42 = vadd.f32 %v3826_v40, %v10689_v9  ;;  %v8460_v43 = vpop.f32.mrb[37].mxu0  ;;  %v9392_v40 = vld [vmem:[#allocation8 + $0x30] sm:$0xff]  }
 0x797   : > { %v3829_v44 = vpop.f32.mrb[38].mxu0  ;;  %v4492_v43 = vstv %s7131_s26  ;;  %s11192_s26 = sld [smem:[#allocation17_spill]] }
 0x798   : > { %v3834_v46 = vadd.f32 %v3829_v44, %v10691_v7  ;;  %v8461_v47 = vpop.f32.mrb[39].mxu0 }
 0x7a5   : > { %v4041_v49 = vpop.f32.mrb[40].mxu0  ;;  %v3987_v50 = vpop.f32.mrb[156].mxu1 }
 0x7a6   : > { %v3994_v51 = vadd.f32 %v3987_v50, %v3833_v42  ;;  %v8504_v52 = vpop.f32.mrb[41].mxu0  ;;  %v8492_v54 = vpop.f32.mrb[157].mxu1  ;;  %v9394_v42 = vld [vmem:[#allocation8 + $0x38] sm:$0xff]  }
 0x7a7   : > { %v4044_v56 = vpop.f32.mrb[42].mxu0  ;;  %v3990_v57 = vpop.f32.mrb[158].mxu1 }
 0x7a8   : > { %v4048_v58 = vpack.c.bf16 %v4044_v56, %v4041_v49  ;;  %v3995_v48 = vadd.f32 %v3990_v57, %v3834_v46  ;;  %v8505_v53 = vpop.f32.mrb[43].mxu0  ;;  %v8493_v55 = vpop.f32.mrb[159].mxu1  ;;  %v4504_v57 = vld [vmem:[#allocation2] sm:$0x3] }
 0x7a9   : > { %v9385_v53 = vld [vmem:[#allocation8 + $0x48] sm:$0xff]   ;;  %v9387_v55 = vld [vmem:[#allocation8 + $0x50] sm:$0xff]  }
 0x7aa   : > { %8523 = vmatmul.mubr.bf16.vlgmr.msra.gmra.mrb[44].mxu0 %v4048_v58  ;;  %v4567_v58 = vld [vmem:[#allocation2 + $0x2] sm:$0x3] }
 0x7ab   : > { %8559 = vmatpush3.bf16.msra.mxu0 %v10534_v25  ;;  %8566 = vmatprep.mubr.msk.bf16.mxu0 %vm9716_vm0, %v9714_v45 }
 0x7ac   : > { %8560 = vmatprep.subr.bf16.mxu0 %v9714_v45 }
 0x7af   : > { %8561 = vmatpush3.bf16.msra.mxu0 %v10530_v59 }
 0x7b0   : > { %8562 = vmatprep.subr.bf16.mxu0 %v9714_v45 }
 0x7b3   : > { %8563 = vmatpush3.bf16.msra.mxu0 %v10546_v35  ;;  %v9374_v35 = vld [vmem:[#allocation7 + $0x208] sm:$0xff]  }
 0x7b4   : > { %8564 = vmatprep.subr.bf16.mxu0 %v9714_v45 }
 0x7b5   : > { %v4202_v60 = vpop.f32.mrb[160].mxu1 }
 0x7b6   : > { %v8536_v61 = vpop.f32.mrb[161].mxu1 }
 0x7b7   : > { %8565 = vmatpush3.bf16.msra.mxu0 %v10552_v41  ;;  %v4205_v25 = vpop.f32.mrb[162].mxu1  ;;  %v9375_v41 = vld [vmem:[#allocation7 + $0x210] sm:$0xff]   ;;  %v9391_v61 = vld [vmem:[#allocation8 + $0x60] sm:$0xff]  }
 0x7b8   : > { %v4209_v0 = vpack.c.bf16 %v4205_v25, %v4202_v60  ;;  %8570 = vmatprep.subr.bf16.mxu0 %v9714_v45  ;;  %v8537_v59 = vpop.f32.mrb[163].mxu1  ;;  %v9389_v60 = vld [vmem:[#allocation8 + $0x58] sm:$0xff]   ;;  %v9395_v25 = vld [vmem:[#allocation8 + $0x70] sm:$0xff]  }
 0x7ba   : > { %8567 = vmatmul.mubr.msk.bf16.vlgmr.msra.gmra.mrb[48].mxu0 %vm3042_vm9, %v9372_v62  ;;  %8555 = vmatmul.mubr.bf16.vlgmr.msra.gmra.mrb[164].mxu1 %v4209_v0  ;;  %v9393_v62 = vld [vmem:[#allocation8 + $0x68] sm:$0xff]  }
 0x7bb   : > { %8571 = vmatpush3.bf16.msra.mxu0 %v9373_v63  ;;  %8586 = vmatprep.mubr.msk.bf16.mxu0 %vm9716_vm0, %v9714_v45  ;;  %v9396_v63 = vld [vmem:[#allocation8 + $0x78] sm:$0xff]  }
 0x7bc   : > { %8572 = vmatprep.subr.bf16.mxu0 %v9714_v45  ;;  %8592 = vmatprep.mubr.msk.bf16.mxu1 %vm9716_vm0, %v9714_v45 }
 0x7bf   : > { %8573 = vmatpush3.bf16.msra.mxu0 %v9374_v35 }
 0x7c0   : > { %8574 = vmatprep.subr.bf16.mxu0 %v9714_v45 }
 0x7c3   : > { %8575 = vmatpush3.bf16.msra.mxu0 %v9375_v41 }
 0x7c4   : > { %8576 = vmatprep.subr.bf16.mxu0 %v9714_v45 }
 0x7c7   : > { %8577 = vmatpush3.bf16.msra.mxu0 %v9376_v2 }
 0x7c8   : > { %8578 = vmatprep.subr.bf16.mxu0 %v9714_v45 }
 0x7cb   : > { %8579 = vmatpush3.bf16.msra.mxu0 %v9377_v4 }
 0x7cc   : > { %8580 = vmatprep.subr.bf16.mxu0 %v9714_v45 }
 0x7cf   : > { %8581 = vmatpush3.bf16.msra.mxu0 %v9378_v5  ;;  %v4958_v5 = vld [vmem:[#allocation2 + $0x6] sm:$0x3] }
 0x7d0   : > { %8582 = vmatprep.subr.bf16.mxu0 %v9714_v45 }
 0x7d3   : > { %8583 = vmatpush3.bf16.msra.mxu0 %v9379_v6 }
 0x7d4   : > { %8584 = vmatprep.subr.bf16.mxu0 %v9714_v45 }
 0x7d7   : > { %8585 = vmatpush3.bf16.msra.mxu0 %v9380_v8 }
 0x7d8   : > { %8622 = vmatprep.subr.bf16.mxu0 %v9714_v45 }
 0x87d   : > { %v4148_v9 = vpop.f32.mrb[44].mxu0 }
 0x87e   : > { %v4155_v11 = vadd.f32 %v4148_v9, %v3994_v51  ;;  %v8524_v12 = vpop.f32.mrb[45].mxu0  ;;  %v9397_v9 = vld [vmem:[#allocation8 + $0xc0] sm:$0xff]  }
 0x87f   : > { %v4151_v3 = vpop.f32.mrb[46].mxu0 }
 0x880   : > { %v4156_v13 = vadd.f32 %v4151_v3, %v3995_v48  ;;  %v8525_v1 = vpop.f32.mrb[47].mxu0  ;;  %v9383_v48 = vld [vmem:[#allocation8 + $0x40] sm:$0xff]   ;;  %v9398_v3 = vld [vmem:[#allocation8 + $0xc8] sm:$0xff]  }
 0x881   : > { %v9399_v1 = vld [vmem:[#allocation8 + $0x80] sm:$0xff]  }
 0x88d   : > { %v4363_v7 = vpop.f32.mrb[48].mxu0  ;;  %v4309_v10 = vpop.f32.mrb[164].mxu1 }
 0x88e   : > { %v4316_v14 = vadd.f32 %v4309_v10, %v4155_v11  ;;  %v8568_v15 = vpop.f32.mrb[49].mxu0  ;;  %v8556_v16 = vpop.f32.mrb[165].mxu1  ;;  %v9401_v10 = vld [vmem:[#allocation8 + $0x88] sm:$0xff]  }
 0x88f   : > { %v4366_v17 = vpop.f32.mrb[50].mxu0  ;;  %v4312_v18 = vpop.f32.mrb[166].mxu1  ;;  %v9403_v15 = vld [vmem:[#allocation8 + $0x90] sm:$0xff]   ;;  %v9404_v16 = vld [vmem:[#allocation8 + $0xe0] sm:$0xff]  }
 0x890   : > { %v4370_v19 = vpack.c.bf16 %v4366_v17, %v4363_v7  ;;  %v4317_v20 = vadd.f32 %v4312_v18, %v4156_v13  ;;  %v8569_v21 = vpop.f32.mrb[51].mxu0  ;;  %v8557_v22 = vpop.f32.mrb[167].mxu1  ;;  %v4806_v13 = vld [vmem:[#allocation2 + $0x4] sm:$0x3]  ;;  %v9405_v17 = vld [vmem:[#allocation8 + $0x98] sm:$0xff]   ;;  %v9406_v18 = vld [vmem:[#allocation8 + $0xe8] sm:$0xff]  }
 0x891   : > { %v9400_v7 = vld [vmem:[#allocation8 + $0xd0] sm:$0xff]   ;;  %v9409_v21 = vld [vmem:[#allocation8 + $0xa8] sm:$0xff]   ;;  %v9410_v22 = vld [vmem:[#allocation8 + $0xf8] sm:$0xff]  }
 0x892   : > { %8587 = vmatmul.mubr.bf16.vlgmr.msra.gmra.mrb[52].mxu0 %v4370_v19  ;;  %v9407_v19 = vld [vmem:[#allocation8 + $0xa0] sm:$0xff]  }
 0x893   : > { %8638 = vmatprep.mubr.msk.bf16.mxu0 %vm9716_vm0, %v9714_v45  ;;  %8623 = vmatpush3.bf16.msra.mxu0 %v9381_v33 }
 0x894   : > { %8624 = vmatprep.subr.bf16.mxu0 %v9714_v45 }
 0x897   : > { %8625 = vmatpush3.bf16.msra.mxu0 %v9382_v34 }
 0x898   : > { %8626 = vmatprep.subr.bf16.mxu0 %v9714_v45 }
 0x89b   : > { %8627 = vmatpush3.bf16.msra.mxu0 %v9384_v36 }
 0x89c   : > { %8628 = vmatprep.subr.bf16.mxu0 %v9714_v45 }
 0x89f   : > { %8629 = vmatpush3.bf16.msra.mxu0 %v9386_v37 }
 0x8a0   : > { %8630 = vmatprep.subr.bf16.mxu0 %v9714_v45 }
 0x8a3   : > { %8631 = vmatpush3.bf16.msra.mxu0 %v9388_v38 }
 0x8a4   : > { %8632 = vmatprep.subr.bf16.mxu0 %v9714_v45 }
 0x8a7   : > { %8633 = vmatpush3.bf16.msra.mxu0 %v9390_v39 }
 0x8a8   : > { %8634 = vmatprep.subr.bf16.mxu0 %v9714_v45 }
 0x8ab   : > { %8635 = vmatpush3.bf16.msra.mxu0 %v9392_v40 }
 0x8ac   : > { %8636 = vmatprep.subr.bf16.mxu0 %v9714_v45 }
 0x8af   : > { %8637 = vmatpush3.bf16.msra.mxu0 %v9394_v42 }
 0x8b0   : > { %8668 = vmatprep.subr.bf16.mxu0 %v9714_v45 }
 0x965   : > { %v4470_v23 = vpop.f32.mrb[52].mxu0 }
 0x966   : > { %v4477_v26 = vadd.f32 %v4470_v23, %v4316_v14  ;;  %v8588_v27 = vpop.f32.mrb[53].mxu0  ;;  %v9402_v14 = vld [vmem:[#allocation8 + $0xd8] sm:$0xff]   ;;  %v9411_v23 = vld [vmem:[#allocation8 + $0xb0] sm:$0xff]  }
 0x967   : > { %v4473_v28 = vpop.f32.mrb[54].mxu0 }
 0x968   : > { %v4487_v29 = vadd.f32 %v7130_v24, %v4477_v26  ;;  %v4478_v30 = vadd.f32 %v4473_v28, %v4317_v20  ;;  %v8589_v31 = vpop.f32.mrb[55].mxu0  ;;  %v9408_v20 = vld [vmem:[#allocation8 + $0xf0] sm:$0xff]  }
 0x96a   : > { %v4488_v32 = vadd.f32 %v7130_v24, %v4478_v30  ;;  %4497 = vrot.lane.b32.xlu0 %v4487_v29, %s9715_s28  ;;  %v4493_v44 = vmul.f32 %v4492_v43, %v4487_v29  ;;  %vm4490_vm10 = vcmp.gt.f32.partialorder %v4487_v29, 0.0  ;;  %v9412_v24 = vld [vmem:[#allocation8 + $0xb8] sm:$0xff]  }
 0x96c   : > { %4499 = vrot.lane.b32.xlu1 %v4488_v32, %s9715_s28  ;;  %v4494_v46 = vmul.f32 %v4492_v43, %v4488_v32  ;;  %vm4491_vm11 = vcmp.gt.f32.partialorder %v4488_v32, 0.0  ;;  %v4495_v49 = vsel %vm4490_vm10, %v4487_v29, %v4493_v44  ;;  %v5262_v43 = vld [vmem:[#allocation2 + $0xa] sm:$0x3] }
 0x96e   : > { %v4496_v51 = vsel %vm4491_vm11, %v4488_v32, %v4494_v46 }
 0x9dc   : > { %v4498_v47 = vpop.permute.xlu0 %4497 }
 0x9dd   : > { %v4501_v52 = vadd.f32 %v4498_v47, %v4495_v49  ;;  %v9413_v47 = vld [vmem:[#allocation8 + $0x140] sm:$0xff]  }
 0x9de   : > { %v4500_v50 = vpop.permute.xlu1 %4499 }
 0x9df   : > { %v4502_v54 = vadd.f32 %v4500_v50, %v4496_v51  ;;  %v9414_v51 = vld [vmem:[#allocation8 + $0x148] sm:$0xff]  }
 0x9e1   : > { %v10784_v56 = vpack.c.bf16 %v4502_v54, %v4501_v52  ;;  %v5110_v52 = vld [vmem:[#allocation2 + $0x8] sm:$0x3]  ;;  %v9415_v54 = vld [vmem:[#allocation8 + $0x100] sm:$0xff]  }
 0x9e3   : > { %8591 = vmatpush3.bf16.msra.mxu1 %v10784_v56 }
 0x9e4   : > { %8596 = vmatprep.subr.bf16.mxu1 %v9714_v45 }
 0x9e6   : > { %8593 = vmatmul.mubr.msk.bf16.vlgmr.msra.gmra.mrb[168].mxu1 %vm4505_vm12, %v4504_v57  ;;  %v9416_v57 = vld [vmem:[#allocation8 + $0x150] sm:$0xff]  }
 0x9e7   : > { %8597 = vmatpush3.bf16.msra.mxu1 %v10784_v56  ;;  %8598 = vmatprep.mubr.msk.bf16.mxu1 %vm9716_vm0, %v9714_v45 }
 0x9e8   : > { %8602 = vmatprep.subr.bf16.mxu1 %v9714_v45 }
 0x9ee   : > { %8599 = vmatmul.mubr.msk.bf16.vlgmr.msra.gmra.mrb[172].mxu1 %vm4505_vm12, %v4567_v58  ;;  %v9417_v58 = vld [vmem:[#allocation8 + $0x108] sm:$0xff]  }
 0x9ef   : > { %8603 = vmatpush3.bf16.msra.mxu1 %v9383_v48  ;;  %8618 = vmatprep.mubr.msk.bf16.mxu1 %vm9716_vm0, %v9714_v45  ;;  %v9418_v48 = vld [vmem:[#allocation8 + $0x158] sm:$0xff]  }
 0x9f0   : > { %8604 = vmatprep.subr.bf16.mxu1 %v9714_v45 }
 0x9f3   : > { %8605 = vmatpush3.bf16.msra.mxu1 %v9385_v53  ;;  %v9419_v53 = vld [vmem:[#allocation8 + $0x110] sm:$0xff]  }
 0x9f4   : > { %8606 = vmatprep.subr.bf16.mxu1 %v9714_v45 }
 0x9f7   : > { %8607 = vmatpush3.bf16.msra.mxu1 %v9387_v55  ;;  %v9420_v55 = vld [vmem:[#allocation8 + $0x160] sm:$0xff]  }
 0x9f8   : > { %8608 = vmatprep.subr.bf16.mxu1 %v9714_v45 }
 0x9fb   : > { %8609 = vmatpush3.bf16.msra.mxu1 %v9389_v60  ;;  %v9421_v60 = vld [vmem:[#allocation8 + $0x118] sm:$0xff]  }
 0x9fc   : > { %8610 = vmatprep.subr.bf16.mxu1 %v9714_v45 }
 0x9ff   : > { %8611 = vmatpush3.bf16.msra.mxu1 %v9391_v61  ;;  %v9422_v61 = vld [vmem:[#allocation8 + $0x168] sm:$0xff]  }
 0xa00   : > { %8612 = vmatprep.subr.bf16.mxu1 %v9714_v45 }
 0xa03   : > { %8613 = vmatpush3.bf16.msra.mxu1 %v9393_v62  ;;  %v9423_v62 = vld [vmem:[#allocation8 + $0x120] sm:$0xff]  }
 0xa04   : > { %8614 = vmatprep.subr.bf16.mxu1 %v9714_v45 }
 0xa07   : > { %8615 = vmatpush3.bf16.msra.mxu1 %v9395_v25  ;;  %v9424_v25 = vld [vmem:[#allocation8 + $0x170] sm:$0xff]  }
 0xa08   : > { %8616 = vmatprep.subr.bf16.mxu1 %v9714_v45 }
 0xa0b   : > { %8617 = vmatpush3.bf16.msra.mxu1 %v9396_v63  ;;  %v9425_v63 = vld [vmem:[#allocation8 + $0x128] sm:$0xff]  }
 0xa0c   : > { %8642 = vmatprep.subr.bf16.mxu1 %v9714_v45 }
 0xab9   : > { %v4543_v0 = vpop.f32.mrb[168].mxu1 }
 0xaba   : > { %v4549_v59 = vpack.c.bf16 %v4543_v0, %v4543_v0  ;;  %v8594_v35 = vpop.f32.mrb[169].mxu1  ;;  %v9426_v0 = vld [vmem:[#allocation8 + $0x178] sm:$0xff]  }
 0xabb   : > { %v4546_v41 = vpop.f32.mrb[170].mxu1  ;;  %v9428_v35 = vld [vmem:[#allocation8 + $0x138] sm:$0xff]  }
 0xabc   : > { %8639 = vmatmul.mubr.bf16.vlgmr.msra.gmra.mrb[56].mxu0 %v4549_v59  ;;  %v8595_v2 = vpop.f32.mrb[171].mxu1  ;;  %v9427_v59 = vld [vmem:[#allocation8 + $0x130] sm:$0xff]  }
 0xabd   : > { %8669 = vmatpush3.bf16.msra.mxu0 %v10784_v56  ;;  %8670 = vmatprep.mubr.msk.bf16.mxu0 %vm9716_vm0, %v9714_v45 }
 0xabe   : > { %8674 = vmatprep.subr.bf16.mxu0 %v9714_v45 }
 0xac1   : > { %v4605_v4 = vpop.f32.mrb[172].mxu1 }
 0xac2   : > { %v4611_v6 = vpack.c.bf16 %v4605_v4, %v4605_v4  ;;  %v8600_v8 = vpop.f32.mrb[173].mxu1 }
 0xac3   : > { %v4608_v11 = vpop.f32.mrb[174].mxu1 }
 0xac4   : > { %8619 = vmatmul.mubr.bf16.vlgmr.msra.gmra.mrb[176].mxu1 %v4611_v6  ;;  %8671 = vmatmul.mubr.msk.bf16.vlgmr.msra.gmra.mrb[60].mxu0 %vm4505_vm12, %v4958_v5  ;;  %v8601_v12 = vpop.f32.mrb[175].mxu1 }
 0xac5   : > { %8643 = vmatpush3.bf16.msra.mxu1 %v10784_v56  ;;  %8644 = vmatprep.mubr.msk.bf16.mxu1 %vm9716_vm0, %v9714_v45 }
 0xac6   : > { %8675 = vmatpush3.bf16.msra.mxu0 %v9397_v9  ;;  %8648 = vmatprep.subr.bf16.mxu1 %v9714_v45 }
 0xac7   : > { %8676 = vmatprep.subr.bf16.mxu0 %v9714_v45  ;;  %8690 = vmatprep.mubr.msk.bf16.mxu0 %vm9716_vm0, %v9714_v45 }
 0xaca   : > { %8677 = vmatpush3.bf16.msra.mxu0 %v9398_v3 }
 0xacb   : > { %8678 = vmatprep.subr.bf16.mxu0 %v9714_v45 }
 0xacc   : > { %8645 = vmatmul.mubr.msk.bf16.vlgmr.msra.gmra.mrb[180].mxu1 %vm4505_vm12, %v4806_v13 }
 0xacd   : > { %8649 = vmatpush3.bf16.msra.mxu1 %v9399_v1  ;;  %8664 = vmatprep.mubr.msk.bf16.mxu1 %vm9716_vm0, %v9714_v45 }
 0xace   : > { %8679 = vmatpush3.bf16.msra.mxu0 %v9400_v7  ;;  %8650 = vmatprep.subr.bf16.mxu1 %v9714_v45 }
 0xacf   : > { %8680 = vmatprep.subr.bf16.mxu0 %v9714_v45 }
 0xad1   : > { %8651 = vmatpush3.bf16.msra.mxu1 %v9401_v10 }
 0xad2   : > { %8681 = vmatpush3.bf16.msra.mxu0 %v9402_v14  ;;  %8652 = vmatprep.subr.bf16.mxu1 %v9714_v45 }
 0xad3   : > { %8682 = vmatprep.subr.bf16.mxu0 %v9714_v45 }
 0xad5   : > { %8653 = vmatpush3.bf16.msra.mxu1 %v9403_v15 }
 0xad6   : > { %8683 = vmatpush3.bf16.msra.mxu0 %v9404_v16  ;;  %8654 = vmatprep.subr.bf16.mxu1 %v9714_v45  ;;  %v5566_v16 = vld [vmem:[#allocation2 + $0xe] sm:$0x3] }
 0xad7   : > { %8684 = vmatprep.subr.bf16.mxu0 %v9714_v45 }
 0xad9   : > { %8655 = vmatpush3.bf16.msra.mxu1 %v9405_v17 }
 0xada   : > { %8685 = vmatpush3.bf16.msra.mxu0 %v9406_v18  ;;  %8656 = vmatprep.subr.bf16.mxu1 %v9714_v45 }
 0xadb   : > { %8686 = vmatprep.subr.bf16.mxu0 %v9714_v45 }
 0xadd   : > { %8657 = vmatpush3.bf16.msra.mxu1 %v9407_v19  ;;  %v9430_v19 = vld [vmem:[#allocation8 + $0x1c0] sm:$0xff]  }
 0xade   : > { %8687 = vmatpush3.bf16.msra.mxu0 %v9408_v20  ;;  %8658 = vmatprep.subr.bf16.mxu1 %v9714_v45 }
 0xadf   : > { %8688 = vmatprep.subr.bf16.mxu0 %v9714_v45 }
 0xae1   : > { %8659 = vmatpush3.bf16.msra.mxu1 %v9409_v21 }
 0xae2   : > { %8689 = vmatpush3.bf16.msra.mxu0 %v9410_v22  ;;  %8660 = vmatprep.subr.bf16.mxu1 %v9714_v45  ;;  %v9432_v22 = vld [vmem:[#allocation8 + $0x1c8] sm:$0xff]  }
 0xae3   : > { %8720 = vmatprep.subr.bf16.mxu0 %v9714_v45 }
 0xae5   : > { %8661 = vmatpush3.bf16.msra.mxu1 %v9411_v23  ;;  %v5414_v23 = vld [vmem:[#allocation2 + $0xc] sm:$0x3] }
 0xae6   : > { %8662 = vmatprep.subr.bf16.mxu1 %v9714_v45 }
 0xae9   : > { %8663 = vmatpush3.bf16.msra.mxu1 %v9412_v24  ;;  %v9429_v24 = vld [vmem:[#allocation8 + $0x180] sm:$0xff]  }
 0xaea   : > { %8694 = vmatprep.subr.bf16.mxu1 %v9714_v45 }
 0xb8f   : > { %v4799_v26 = vpop.f32.mrb[56].mxu0 }
 0xb90   : > { %v8640_v27 = vpop.f32.mrb[57].mxu0 }
 0xb91   : > { %v4802_v28 = vpop.f32.mrb[58].mxu0  ;;  %v9431_v27 = vld [vmem:[#allocation8 + $0x188] sm:$0xff]  }
 0xb92   : > { %v8641_v29 = vpop.f32.mrb[59].mxu0  ;;  %v9436_v28 = vld [vmem:[#allocation8 + $0x1d8] sm:$0xff]  }
 0xb93   : > { %v9433_v29 = vld [vmem:[#allocation8 + $0x190] sm:$0xff]  }
 0xb97   : > { %v4996_v30 = vpop.f32.mrb[60].mxu0  ;;  %v4711_v31 = vpop.f32.mrb[176].mxu1 }
 0xb98   : > { %v5002_v32 = vpack.c.bf16 %v4996_v30, %v4996_v30  ;;  %v10834_v33 = vadd.f32 %v4799_v26, %v4711_v31  ;;  %v8620_v34 = vpop.f32.mrb[177].mxu1  ;;  %v8672_v36 = vpop.f32.mrb[61].mxu0  ;;  %v9434_v26 = vld [vmem:[#allocation8 + $0x1d0] sm:$0xff]   ;;  %v9438_v30 = vld [vmem:[#allocation8 + $0x1e0] sm:$0xff]   ;;  %v9435_v31 = vld [vmem:[#allocation8 + $0x198] sm:$0xff]  }
 0xb99   : > { %v4714_v37 = vpop.f32.mrb[178].mxu1  ;;  %v4999_v38 = vpop.f32.mrb[62].mxu0  ;;  %v9440_v34 = vld [vmem:[#allocation8 + $0x1e8] sm:$0xff]   ;;  %v9441_v36 = vld [vmem:[#allocation8 + $0x1b0] sm:$0xff]  }
 0xb9a   : > { %8691 = vmatmul.mubr.bf16.vlgmr.msra.gmra.mrb[64].mxu0 %v5002_v32  ;;  %v8621_v39 = vpop.f32.mrb[179].mxu1  ;;  %v8673_v40 = vpop.f32.mrb[63].mxu0  ;;  %v9437_v32 = vld [vmem:[#allocation8 + $0x1a0] sm:$0xff]   ;;  %v9442_v37 = vld [vmem:[#allocation8 + $0x1f0] sm:$0xff]   ;;  %v9443_v38 = vld [vmem:[#allocation8 + $0x1b8] sm:$0xff]  }
 0xb9b   : > { %8721 = vmatpush3.bf16.msra.mxu0 %v10784_v56  ;;  %8722 = vmatprep.mubr.msk.bf16.mxu0 %vm9716_vm0, %v9714_v45  ;;  %v9444_v39 = vld [vmem:[#allocation8 + $0x1f8] sm:$0xff]  }
 0xb9c   : > { %8726 = vmatprep.subr.bf16.mxu0 %v9714_v45 }
 0xb9f   : > { %v4844_v42 = vpop.f32.mrb[180].mxu1 }
 0xba0   : > { %v4850_v44 = vpack.c.bf16 %v4844_v42, %v4844_v42  ;;  %v8646_v46 = vpop.f32.mrb[181].mxu1 }
 0xba1   : > { %v4847_v49 = vpop.f32.mrb[182].mxu1 }
 0xba2   : > { %8665 = vmatmul.mubr.bf16.vlgmr.msra.gmra.mrb[184].mxu1 %v4850_v44  ;;  %8723 = vmatmul.mubr.msk.bf16.vlgmr.msra.gmra.mrb[68].mxu0 %vm4505_vm12, %v5262_v43  ;;  %v8647_v50 = vpop.f32.mrb[183].mxu1 }
 0xba3   : > { %8695 = vmatpush3.bf16.msra.mxu1 %v10784_v56  ;;  %8696 = vmatprep.mubr.msk.bf16.mxu1 %vm9716_vm0, %v9714_v45 }
 0xba4   : > { %8727 = vmatpush3.bf16.msra.mxu0 %v9413_v47  ;;  %8700 = vmatprep.subr.bf16.mxu1 %v9714_v45 }
 0xba5   : > { %8728 = vmatprep.subr.bf16.mxu0 %v9714_v45  ;;  %8742 = vmatprep.mubr.msk.bf16.mxu0 %vm9716_vm0, %v9714_v45 }
 0xba8   : > { %8729 = vmatpush3.bf16.msra.mxu0 %v9414_v51 }
 0xba9   : > { %8730 = vmatprep.subr.bf16.mxu0 %v9714_v45 }
 0xbaa   : > { %8697 = vmatmul.mubr.msk.bf16.vlgmr.msra.gmra.mrb[188].mxu1 %vm4505_vm12, %v5110_v52 }
 0xbab   : > { %8701 = vmatpush3.bf16.msra.mxu1 %v9415_v54  ;;  %8716 = vmatprep.mubr.msk.bf16.mxu1 %vm9716_vm0, %v9714_v45 }
 0xbac   : > { %8731 = vmatpush3.bf16.msra.mxu0 %v9416_v57  ;;  %8702 = vmatprep.subr.bf16.mxu1 %v9714_v45 }
 0xbad   : > { %8732 = vmatprep.subr.bf16.mxu0 %v9714_v45 }
 0xbaf   : > { %8703 = vmatpush3.bf16.msra.mxu1 %v9417_v58 }
 0xbb0   : > { %8733 = vmatpush3.bf16.msra.mxu0 %v9418_v48  ;;  %8704 = vmatprep.subr.bf16.mxu1 %v9714_v45 }
 0xbb1   : > { %8734 = vmatprep.subr.bf16.mxu0 %v9714_v45 }
 0xbb3   : > { %8705 = vmatpush3.bf16.msra.mxu1 %v9419_v53 }
 0xbb4   : > { %8735 = vmatpush3.bf16.msra.mxu0 %v9420_v55  ;;  %8706 = vmatprep.subr.bf16.mxu1 %v9714_v45 }
 0xbb5   : > { %8736 = vmatprep.subr.bf16.mxu0 %v9714_v45 }
 0xbb7   : > { %8707 = vmatpush3.bf16.msra.mxu1 %v9421_v60 }
 0xbb8   : > { %8737 = vmatpush3.bf16.msra.mxu0 %v9422_v61  ;;  %8708 = vmatprep.subr.bf16.mxu1 %v9714_v45 }
 0xbb9   : > { %8738 = vmatprep.subr.bf16.mxu0 %v9714_v45 }
 0xbbb   : > { %8709 = vmatpush3.bf16.msra.mxu1 %v9423_v62 }
 0xbbc   : > { %8739 = vmatpush3.bf16.msra.mxu0 %v9424_v25  ;;  %8710 = vmatprep.subr.bf16.mxu1 %v9714_v45 }
 0xbbd   : > { %8740 = vmatprep.subr.bf16.mxu0 %v9714_v45 }
 0xbbf   : > { %8711 = vmatpush3.bf16.msra.mxu1 %v9425_v63  ;;  %v5718_v63 = vld [vmem:[#allocation2 + $0x10] sm:$0x3] }
 0xbc0   : > { %8741 = vmatpush3.bf16.msra.mxu0 %v9426_v0  ;;  %8712 = vmatprep.subr.bf16.mxu1 %v9714_v45  ;;  %v9445_v0 = vld [vmem:[#allocation8 + $0x200] sm:$0xff]  }
 0xbc1   : > { %8772 = vmatprep.subr.bf16.mxu0 %v9714_v45 }
 0xbc3   : > { %8713 = vmatpush3.bf16.msra.mxu1 %v9427_v59  ;;  %v9446_v59 = vld [vmem:[#allocation8 + $0x208] sm:$0xff]  }
 0xbc4   : > { %8714 = vmatprep.subr.bf16.mxu1 %v9714_v45 }
 0xbc7   : > { %8715 = vmatpush3.bf16.msra.mxu1 %v9428_v35  ;;  %v9447_v35 = vld [vmem:[#allocation8 + $0x210] sm:$0xff]  }
 0xbc8   : > { %8746 = vmatprep.subr.bf16.mxu1 %v9714_v45 }
 0xc6d   : > { %v5102_v41 = vpop.f32.mrb[64].mxu0 }
 0xc6e   : > { %v8692_v2 = vpop.f32.mrb[65].mxu0 }
 0xc6f   : > { %v5105_v4 = vpop.f32.mrb[66].mxu0  ;;  %v9450_v2 = vld [vmem:[#allocation8 + $0x228] sm:$0xff]  }
 0xc70   : > { %v8693_v5 = vpop.f32.mrb[67].mxu0  ;;  %v9451_v4 = vld [vmem:[#allocation8 + $0x230] sm:$0xff]  }
 0xc71   : > { %v9452_v5 = vld [vmem:[#allocation8 + $0x238] sm:$0xff]  }
 0xc75   : > { %v4950_v6 = vpop.f32.mrb[184].mxu1  ;;  %v5300_v8 = vpop.f32.mrb[68].mxu0 }
 0xc76   : > { %v4956_v9 = vadd.f32 %v4950_v6, %v10834_v33  ;;  %v5306_v11 = vpack.c.bf16 %v5300_v8, %v5300_v8  ;;  %v8666_v12 = vpop.f32.mrb[185].mxu1  ;;  %v8724_v3 = vpop.f32.mrb[69].mxu0  ;;  %v9439_v33 = vld [vmem:[#allocation8 + $0x1a8] sm:$0xff]  }
 0xc77   : > { %v4953_v13 = vpop.f32.mrb[186].mxu1  ;;  %v5303_v1 = vpop.f32.mrb[70].mxu0 }
 0xc78   : > { %8743 = vmatmul.mubr.bf16.vlgmr.msra.gmra.mrb[72].mxu0 %v5306_v11  ;;  %v8667_v7 = vpop.f32.mrb[187].mxu1  ;;  %v10867_v10 = vadd.f32 %v5102_v41, %v4956_v9  ;;  %v8725_v14 = vpop.f32.mrb[71].mxu0  ;;  %v9449_v41 = vld [vmem:[#allocation8 + $0x220] sm:$0xff]  }
 0xc79   : > { %8773 = vmatpush3.bf16.msra.mxu0 %v10784_v56  ;;  %8774 = vmatprep.mubr.msk.bf16.mxu0 %vm9716_vm0, %v9714_v45 }
 0xc7a   : > { %8778 = vmatprep.subr.bf16.mxu0 %v9714_v45 }
 0xc7d   : > { %v5148_v15 = vpop.f32.mrb[188].mxu1 }
 0xc7e   : > { %v5154_v17 = vpack.c.bf16 %v5148_v15, %v5148_v15  ;;  %v8698_v18 = vpop.f32.mrb[189].mxu1 }
 0xc7f   : > { %v5151_v20 = vpop.f32.mrb[190].mxu1 }
 0xc80   : > { %8717 = vmatmul.mubr.bf16.vlgmr.msra.gmra.mrb[192].mxu1 %v5154_v17  ;;  %8775 = vmatmul.mubr.msk.bf16.vlgmr.msra.gmra.mrb[76].mxu0 %vm4505_vm12, %v5566_v16  ;;  %v8699_v21 = vpop.f32.mrb[191].mxu1  ;;  %v9454_v20 = vld [vmem:[%s11160_s7 + $0x40] sm:$0xff]  }
 0xc81   : > { %8747 = vmatpush3.bf16.msra.mxu1 %v10784_v56  ;;  %8748 = vmatprep.mubr.msk.bf16.mxu1 %vm9716_vm0, %v9714_v45  ;;  %v9455_v21 = vld [vmem:[%s11160_s7 + $0x8] sm:$0xff]  }
 0xc82   : > { %8752 = vmatprep.subr.bf16.mxu1 %v9714_v45  ;;  %8779 = vmatpush3.bf16.msra.mxu0 %v9430_v19  ;;  %v9453_v19 = vld [vmem:[%s11160_s7] sm:$0xff]  }
 0xc83   : > { %8780 = vmatprep.subr.bf16.mxu0 %v9714_v45  ;;  %8794 = vmatprep.mubr.msk.bf16.mxu0 %vm9716_vm0, %v9714_v45 }
 0xc86   : > { %8781 = vmatpush3.bf16.msra.mxu0 %v9432_v22  ;;  %v9456_v22 = vld [vmem:[%s11160_s7 + $0x48] sm:$0xff]  }
 0xc87   : > { %8782 = vmatprep.subr.bf16.mxu0 %v9714_v45 }
 0xc88   : > { %8749 = vmatmul.mubr.msk.bf16.vlgmr.msra.gmra.mrb[196].mxu1 %vm4505_vm12, %v5414_v23  ;;  %v9457_v23 = vld [vmem:[%s11160_s7 + $0x10] sm:$0xff]  }
 0xc89   : > { %8753 = vmatpush3.bf16.msra.mxu1 %v9429_v24  ;;  %8768 = vmatprep.mubr.msk.bf16.mxu1 %vm9716_vm0, %v9714_v45  ;;  %v9458_v24 = vld [vmem:[%s11160_s7 + $0x50] sm:$0xff]  }
 0xc8a   : > { %8754 = vmatprep.subr.bf16.mxu1 %v9714_v45  ;;  %8783 = vmatpush3.bf16.msra.mxu0 %v9434_v26  ;;  %v9459_v26 = vld [vmem:[%s11160_s7 + $0x18] sm:$0xff]  }
 0xc8b   : > { %8784 = vmatprep.subr.bf16.mxu0 %v9714_v45 }
 0xc8d   : > { %8755 = vmatpush3.bf16.msra.mxu1 %v9431_v27  ;;  %v9460_v27 = vld [vmem:[%s11160_s7 + $0x58] sm:$0xff]  }
 0xc8e   : > { %8756 = vmatprep.subr.bf16.mxu1 %v9714_v45  ;;  %8785 = vmatpush3.bf16.msra.mxu0 %v9436_v28  ;;  %v9461_v28 = vld [vmem:[%s11160_s7 + $0x20] sm:$0xff]  }
 0xc8f   : > { %8786 = vmatprep.subr.bf16.mxu0 %v9714_v45 }
 0xc91   : > { %8757 = vmatpush3.bf16.msra.mxu1 %v9433_v29  ;;  %v9462_v29 = vld [vmem:[%s11160_s7 + $0x60] sm:$0xff]  }
 0xc92   : > { %8758 = vmatprep.subr.bf16.mxu1 %v9714_v45  ;;  %8787 = vmatpush3.bf16.msra.mxu0 %v9438_v30  ;;  %v9463_v30 = vld [vmem:[%s11160_s7 + $0x28] sm:$0xff]  }
 0xc93   : > { %8788 = vmatprep.subr.bf16.mxu0 %v9714_v45 }
 0xc95   : > { %8759 = vmatpush3.bf16.msra.mxu1 %v9435_v31  ;;  %v9464_v31 = vld [vmem:[%s11160_s7 + $0x68] sm:$0xff]  }
 0xc96   : > { %8760 = vmatprep.subr.bf16.mxu1 %v9714_v45  ;;  %8789 = vmatpush3.bf16.msra.mxu0 %v9440_v34  ;;  %v9467_v34 = vld [vmem:[%s11160_s7 + $0x38] sm:$0xff]  }
 0xc97   : > { %8790 = vmatprep.subr.bf16.mxu0 %v9714_v45 }
 0xc99   : > { %8761 = vmatpush3.bf16.msra.mxu1 %v9437_v32  ;;  %v9465_v32 = vld [vmem:[%s11160_s7 + $0x30] sm:$0xff]  }
 0xc9a   : > { %8762 = vmatprep.subr.bf16.mxu1 %v9714_v45  ;;  %8791 = vmatpush3.bf16.msra.mxu0 %v9442_v37 }
 0xc9b   : > { %8792 = vmatprep.subr.bf16.mxu0 %v9714_v45 }
 0xc9d   : > { %8763 = vmatpush3.bf16.msra.mxu1 %v9439_v33  ;;  %v9466_v33 = vld [vmem:[%s11160_s7 + $0x70] sm:$0xff]  }
 0xc9e   : > { %8764 = vmatprep.subr.bf16.mxu1 %v9714_v45  ;;  %8793 = vmatpush3.bf16.msra.mxu0 %v9444_v39 }
 0xc9f   : > { %8824 = vmatprep.subr.bf16.mxu0 %v9714_v45 }
 0xca1   : > { %8765 = vmatpush3.bf16.msra.mxu1 %v9441_v36  ;;  %v9468_v36 = vld [vmem:[%s11160_s7 + $0x78] sm:$0xff]  }
 0xca2   : > { %8766 = vmatprep.subr.bf16.mxu1 %v9714_v45 }
 0xca5   : > { %8767 = vmatpush3.bf16.msra.mxu1 %v9443_v38  ;;  %v7214_v38 = vld [vmem:[%s11163_s10 + $0x2] ss:$0 sm:$0xff] }
 0xca6   : > { %8798 = vmatprep.subr.bf16.mxu1 %v9714_v45 }
 0xd4b   : > { %v5406_v40 = vpop.f32.mrb[72].mxu0 }
 0xd4c   : > { %v8744_v42 = vpop.f32.mrb[73].mxu0 }
 0xd4d   : > { %v5409_v43 = vpop.f32.mrb[74].mxu0 }
 0xd4e   : > { %v8745_v44 = vpop.f32.mrb[75].mxu0 }
 0xd53   : > { %v5254_v46 = vpop.f32.mrb[192].mxu1  ;;  %v5604_v47 = vpop.f32.mrb[76].mxu0 }
 0xd54   : > { %v5260_v49 = vadd.f32 %v5254_v46, %v10867_v10  ;;  %v8718_v50 = vpop.f32.mrb[193].mxu1  ;;  %v5610_v51 = vpack.c.bf16 %v5604_v47, %v5604_v47  ;;  %v8776_v52 = vpop.f32.mrb[77].mxu0  ;;  %v5880_v46 = vstv %s7215_s12  ;;  %s550_s12 = scalar_lea.vmem %s11193_s15, %s11196_s16 }
 0xd55   : > { %v5257_v54 = vpop.f32.mrb[194].mxu1  ;;  %v5607_v57 = vpop.f32.mrb[78].mxu0  ;;  %v9469_v52 = vld [vmem:[%s11160_s7 + $0xc0] sm:$0xff]  }
 0xd56   : > { %v5412_v58 = vadd.f32 %v5406_v40, %v5260_v49  ;;  %v8719_v48 = vpop.f32.mrb[195].mxu1  ;;  %8795 = vmatmul.mubr.bf16.vlgmr.msra.gmra.mrb[80].mxu0 %v5610_v51  ;;  %v8777_v53 = vpop.f32.mrb[79].mxu0  ;;  %v9470_v57 = vld [vmem:[%s11160_s7 + $0x80] sm:$0xff]  }
 0xd57   : > { %8840 = vmatprep.mubr.msk.bf16.mxu0 %vm9716_vm0, %v9714_v45  ;;  %8825 = vmatpush3.bf16.msra.mxu0 %v9454_v20  ;;  %v9471_v48 = vld [vmem:[%s11160_s7 + $0xc8] sm:$0xff]   ;;  %v9492_v20 = vld [vmem:[%s11161_s8 + $0x38] sm:$0xff]  }
 0xd58   : > { %8826 = vmatprep.subr.bf16.mxu0 %v9714_v45  ;;  %v9472_v53 = vld [vmem:[%s11160_s7 + $0x88] sm:$0xff]  }
 0xd5b   : > { %v5452_v55 = vpop.f32.mrb[196].mxu1  ;;  %8827 = vmatpush3.bf16.msra.mxu0 %v9456_v22 }
 0xd5c   : > { %v5458_v60 = vpack.c.bf16 %v5452_v55, %v5452_v55  ;;  %v8750_v61 = vpop.f32.mrb[197].mxu1  ;;  %8828 = vmatprep.subr.bf16.mxu0 %v9714_v45  ;;  %v9473_v55 = vld [vmem:[%s11160_s7 + $0xd0] sm:$0xff]  }
 0xd5d   : > { %v5455_v62 = vpop.f32.mrb[198].mxu1  ;;  %v9475_v61 = vld [vmem:[%s11160_s7 + $0xd8] sm:$0xff]  }
 0xd5e   : > { %8769 = vmatmul.mubr.bf16.vlgmr.msra.gmra.mrb[200].mxu1 %v5458_v60  ;;  %v8751_v25 = vpop.f32.mrb[199].mxu1  ;;  %v9474_v60 = vld [vmem:[%s11160_s7 + $0x90] sm:$0xff]   ;;  %v9476_v62 = vld [vmem:[%s11160_s7 + $0x98] sm:$0xff]  }
 0xd5f   : > { %8799 = vmatpush3.bf16.msra.mxu1 %v10784_v56  ;;  %8800 = vmatprep.mubr.msk.bf16.mxu1 %vm9716_vm0, %v9714_v45  ;;  %v9448_v56 = vld [vmem:[#allocation8 + $0x218] sm:$0xff]   ;;  %v9477_v25 = vld [vmem:[%s11160_s7 + $0xe0] sm:$0xff]  }
 0xd60   : > { %8804 = vmatprep.subr.bf16.mxu1 %v9714_v45  ;;  %8829 = vmatpush3.bf16.msra.mxu0 %v9458_v24 }
 0xd61   : > { %8830 = vmatprep.subr.bf16.mxu0 %v9714_v45 }
 0xd64   : > { %8831 = vmatpush3.bf16.msra.mxu0 %v9460_v27 }
 0xd65   : > { %8832 = vmatprep.subr.bf16.mxu0 %v9714_v45 }
 0xd66   : > { %8801 = vmatmul.mubr.msk.bf16.vlgmr.msra.gmra.mrb[204].mxu1 %vm4505_vm12, %v5718_v63  ;;  %v9478_v63 = vld [vmem:[%s11160_s7 + $0xa0] sm:$0xff]  }
 0xd67   : > { %8805 = vmatpush3.bf16.msra.mxu1 %v9445_v0  ;;  %8820 = vmatprep.mubr.msk.bf16.mxu1 %vm9716_vm0, %v9714_v45  ;;  %v9479_v0 = vld [vmem:[%s11160_s7 + $0xe8] sm:$0xff]  }
 0xd68   : > { %8806 = vmatprep.subr.bf16.mxu1 %v9714_v45  ;;  %8833 = vmatpush3.bf16.msra.mxu0 %v9462_v29  ;;  %v7296_v29 = vld [vmem:[%s11163_s10 + $0x3] sm:$0x1] }
 0xd69   : > { %8834 = vmatprep.subr.bf16.mxu0 %v9714_v45 }
 0xd6b   : > { %8807 = vmatpush3.bf16.msra.mxu1 %v9446_v59  ;;  %v9480_v59 = vld [vmem:[%s11160_s7 + $0xa8] sm:$0xff]  }
 0xd6c   : > { %8808 = vmatprep.subr.bf16.mxu1 %v9714_v45  ;;  %8835 = vmatpush3.bf16.msra.mxu0 %v9464_v31 }
 0xd6d   : > { %8836 = vmatprep.subr.bf16.mxu0 %v9714_v45 }
 0xd6f   : > { %8809 = vmatpush3.bf16.msra.mxu1 %v9447_v35  ;;  %v9481_v35 = vld [vmem:[%s11160_s7 + $0xf0] sm:$0xff]  }
 0xd70   : > { %8810 = vmatprep.subr.bf16.mxu1 %v9714_v45  ;;  %8837 = vmatpush3.bf16.msra.mxu0 %v9466_v33 }
 0xd71   : > { %8838 = vmatprep.subr.bf16.mxu0 %v9714_v45 }
 0xd73   : > { %8811 = vmatpush3.bf16.msra.mxu1 %v9448_v56  ;;  %v9482_v56 = vld [vmem:[%s11160_s7 + $0xb0] sm:$0xff]  }
 0xd74   : > { %8812 = vmatprep.subr.bf16.mxu1 %v9714_v45  ;;  %8839 = vmatpush3.bf16.msra.mxu0 %v9468_v36 }
 0xd75   : > { %8864 = vmatprep.subr.bf16.mxu0 %v9714_v45 }
 0xd77   : > { %8813 = vmatpush3.bf16.msra.mxu1 %v9449_v41  ;;  %v9483_v41 = vld [vmem:[%s11160_s7 + $0xf8] sm:$0xff]  }
 0xd78   : > { %8814 = vmatprep.subr.bf16.mxu1 %v9714_v45 }
 0xd7b   : > { %8815 = vmatpush3.bf16.msra.mxu1 %v9450_v2  ;;  %v9484_v2 = vld [vmem:[%s11160_s7 + $0xb8] sm:$0xff]  }
 0xd7c   : > { %8816 = vmatprep.subr.bf16.mxu1 %v9714_v45 }
 0xd7f   : > { %8817 = vmatpush3.bf16.msra.mxu1 %v9451_v4 }
 0xd80   : > { %8818 = vmatprep.subr.bf16.mxu1 %v9714_v45 }
 0xd83   : > { %8819 = vmatpush3.bf16.msra.mxu1 %v9452_v5 }
 0xd84   : > { %8844 = vmatprep.subr.bf16.mxu1 %v9714_v45 }
 0xe29   : > { %v5710_v6 = vpop.f32.mrb[80].mxu0 }
 0xe2a   : > { %v8796_v8 = vpop.f32.mrb[81].mxu0 }
 0xe2b   : > { %v5713_v9 = vpop.f32.mrb[82].mxu0  ;;  %v9486_v8 = vld [vmem:[%s11161_s8 + $0x8] sm:$0xff]  }
 0xe2c   : > { %v8797_v11 = vpop.f32.mrb[83].mxu0  ;;  %v9487_v9 = vld [vmem:[%s11161_s8 + $0x10] sm:$0xff]  }
 0xe2d   : > { %v9488_v11 = vld [vmem:[%s11161_s8 + $0x18] sm:$0xff]  }
 0xe31   : > { %v5558_v12 = vpop.f32.mrb[200].mxu1 }
 0xe32   : > { %v5564_v3 = vadd.f32 %v5558_v12, %v5412_v58  ;;  %v8770_v13 = vpop.f32.mrb[201].mxu1  ;;  %v9489_v12 = vld [vmem:[%s11161_s8 + $0x20] sm:$0xff]  }
 0xe33   : > { %v5561_v1 = vpop.f32.mrb[202].mxu1  ;;  %v9491_v13 = vld [vmem:[%s11161_s8 + $0x30] sm:$0xff]  }
 0xe34   : > { %v5716_v7 = vadd.f32 %v5710_v6, %v5564_v3  ;;  %v8771_v10 = vpop.f32.mrb[203].mxu1  ;;  %v9485_v6 = vld [vmem:[%s11161_s8] sm:$0xff]   ;;  %v9490_v3 = vld [vmem:[%s11161_s8 + $0x28] sm:$0xff]  }
 0xe39   : > { %v5756_v14 = vpop.f32.mrb[204].mxu1 }
 0xe3a   : > { %v5762_v15 = vpack.c.bf16 %v5756_v14, %v5756_v14  ;;  %v8802_v16 = vpop.f32.mrb[205].mxu1 }
 0xe3b   : > { %v5759_v17 = vpop.f32.mrb[206].mxu1 }
 0xe3c   : > { %8821 = vmatmul.mubr.bf16.vlgmr.msra.gmra.mrb[208].mxu1 %v5762_v15  ;;  %v8803_v18 = vpop.f32.mrb[207].mxu1 }
 0xe3d   : > { %8860 = vmatprep.mubr.msk.bf16.mxu1 %vm9716_vm0, %v9714_v45  ;;  %8845 = vmatpush3.bf16.msra.mxu1 %v9453_v19 }
 0xe3e   : > { %8846 = vmatprep.subr.bf16.mxu1 %v9714_v45 }
 0xe41   : > { %8847 = vmatpush3.bf16.msra.mxu1 %v9455_v21 }
 0xe42   : > { %8848 = vmatprep.subr.bf16.mxu1 %v9714_v45 }
 0xe45   : > { %8849 = vmatpush3.bf16.msra.mxu1 %v9457_v23 }
 0xe46   : > { %8850 = vmatprep.subr.bf16.mxu1 %v9714_v45 }
 0xe49   : > { %8851 = vmatpush3.bf16.msra.mxu1 %v9459_v26 }
 0xe4a   : > { %8852 = vmatprep.subr.bf16.mxu1 %v9714_v45 }
 0xe4d   : > { %8853 = vmatpush3.bf16.msra.mxu1 %v9461_v28 }
 0xe4e   : > { %8854 = vmatprep.subr.bf16.mxu1 %v9714_v45 }
 0xe51   : > { %8855 = vmatpush3.bf16.msra.mxu1 %v9463_v30 }
 0xe52   : > { %8856 = vmatprep.subr.bf16.mxu1 %v9714_v45 }
 0xe55   : > { %8857 = vmatpush3.bf16.msra.mxu1 %v9465_v32 }
 0xe56   : > { %8858 = vmatprep.subr.bf16.mxu1 %v9714_v45 }
 0xe59   : > { %8859 = vmatpush3.bf16.msra.mxu1 %v9467_v34  ;;  %v6322_v34 = vstv %s7297_s27 }
 0xe5a   : > { %8884 = vmatprep.subr.bf16.mxu1 %v9714_v45 }
 0xf0f   : > { %v5862_v37 = vpop.f32.mrb[208].mxu1 }
 0xf10   : > { %v5868_v39 = vadd.f32 %v5862_v37, %v5716_v7  ;;  %v8822_v40 = vpop.f32.mrb[209].mxu1 }
 0xf11   : > { %v5865_v42 = vpop.f32.mrb[210].mxu1 }
 0xf12   : > { %v5877_v43 = vadd.f32 %v7214_v38, %v5868_v39  ;;  %v8823_v44 = vpop.f32.mrb[211].mxu1  ;;  %v9493_v42 = vld [vmem:[%s11162_s9] sm:$0xff]  }
 0xf13   : > { %v9495_v44 = vld [vmem:[%s11162_s9 + $0x10] sm:$0xff]  }
 0xf14   : > { %5883 = vrot.lane.b32.xlu0 %v5877_v43, %s9715_s28  ;;  %v5881_v47 = vmul.f32 %v5880_v46, %v5877_v43  ;;  %vm5879_vm13 = vcmp.gt.f32.partialorder %v5877_v43, 0.0  ;;  %v9496_v46 = vld [vmem:[%s11162_s9 + $0x18] sm:$0xff]  }
 0xf16   : > { %v5882_v50 = vsel %vm5879_vm13, %v5877_v43, %v5881_v47  ;;  %v9494_v43 = vld [vmem:[%s11162_s9 + $0x8] sm:$0xff]   ;;  %v9497_v47 = vld [vmem:[%s11162_s9 + $0x20] sm:$0xff]  }
 0xf86   : > { %v5884_v49 = vpop.permute.xlu0 %5883 }
 0xf87   : > { %v5885_v51 = vadd.f32 %v5884_v49, %v5882_v50  ;;  %v9498_v49 = vld [vmem:[%s11162_s9 + $0x28] sm:$0xff]   ;;  %v9499_v50 = vld [vmem:[%s11162_s9 + $0x30] sm:$0xff]  }
 0xf89   : > { %v5886_v54 = vpack.c.bf16 %v5885_v51, %v5885_v51  ;;  %v9500_v51 = vld [vmem:[%s11162_s9 + $0x38] sm:$0xff]  }
 0xf8b   : > { %v5921_v58 = vshrl.u32 %v5886_v54, 16  ;;  %8861 = vmatmul.mubr.bf16.vlgmr.msra.gmra.mrb[212].mxu1 %v5886_v54  ;;  %v6118_v5 = vrot.slane %v5886_v54, 1 }
 0xf8c   : > { %8885 = vmatpush3.bf16.msra.mxu1 %v9469_v52  ;;  %8900 = vmatprep.mubr.msk.bf16.mxu1 %vm9716_vm0, %v9714_v45  ;;  %v7298_v52 = vld [vmem:[%s11163_s10 + $0x4] sm:$0x1] }
 0xf8d   : > { %8841 = vmatmul.mubr.bf16.vlgmr.msra.gmra.mrb[84].mxu0 %v5921_v58  ;;  %8886 = vmatprep.subr.bf16.mxu1 %v9714_v45  ;;  %v6226_v4 = vrot.slane %v5921_v58, 1 }
 0xf8e   : > { %8865 = vmatpush3.bf16.msra.mxu0 %v9470_v57  ;;  %8880 = vmatprep.mubr.msk.bf16.mxu0 %vm9716_vm0, %v9714_v45 }
 0xf8f   : > { %8866 = vmatprep.subr.bf16.mxu0 %v9714_v45 }
 0xf90   : > { %8887 = vmatpush3.bf16.msra.mxu1 %v9471_v48 }
 0xf91   : > { %8888 = vmatprep.subr.bf16.mxu1 %v9714_v45 }
 0xf92   : > { %8867 = vmatpush3.bf16.msra.mxu0 %v9472_v53 }
 0xf93   : > { %8868 = vmatprep.subr.bf16.mxu0 %v9714_v45 }
 0xf94   : > { %8889 = vmatpush3.bf16.msra.mxu1 %v9473_v55  ;;  %v6437_v55 = vstv %s7307_s17 }
 0xf95   : > { %8890 = vmatprep.subr.bf16.mxu1 %v9714_v45 }
 0xf96   : > { %8869 = vmatpush3.bf16.msra.mxu0 %v9474_v60 }
 0xf97   : > { %8870 = vmatprep.subr.bf16.mxu0 %v9714_v45 }
 0xf98   : > { %8891 = vmatpush3.bf16.msra.mxu1 %v9475_v61 }
 0xf99   : > { %8892 = vmatprep.subr.bf16.mxu1 %v9714_v45 }
 0xf9a   : > { %8871 = vmatpush3.bf16.msra.mxu0 %v9476_v62 }
 0xf9b   : > { %8872 = vmatprep.subr.bf16.mxu0 %v9714_v45 }
 0xf9c   : > { %8893 = vmatpush3.bf16.msra.mxu1 %v9477_v25 }
 0xf9d   : > { %8894 = vmatprep.subr.bf16.mxu1 %v9714_v45 }
 0xf9e   : > { %8873 = vmatpush3.bf16.msra.mxu0 %v9478_v63 }
 0xf9f   : > { %8874 = vmatprep.subr.bf16.mxu0 %v9714_v45 }
 0xfa0   : > { %8895 = vmatpush3.bf16.msra.mxu1 %v9479_v0  ;;  %v9501_v0 = vld [vmem:[#allocation10] sm:$0xff]  }
 0xfa1   : > { %8896 = vmatprep.subr.bf16.mxu1 %v9714_v45 }
 0xfa2   : > { %8875 = vmatpush3.bf16.msra.mxu0 %v9480_v59  ;;  %v9502_v59 = vld [vmem:[#allocation10 + $0x8] sm:$0xff]  }
 0xfa3   : > { %8876 = vmatprep.subr.bf16.mxu0 %v9714_v45 }
 0xfa4   : > { %8897 = vmatpush3.bf16.msra.mxu1 %v9481_v35  ;;  %v9503_v35 = vld [vmem:[#allocation10 + $0x10] sm:$0xff]  }
 0xfa5   : > { %8898 = vmatprep.subr.bf16.mxu1 %v9714_v45 }
 0xfa6   : > { %8877 = vmatpush3.bf16.msra.mxu0 %v9482_v56  ;;  %v9504_v56 = vld [vmem:[#allocation10 + $0x18] sm:$0xff]  }
 0xfa7   : > { %8878 = vmatprep.subr.bf16.mxu0 %v9714_v45 }
 0xfa8   : > { %8899 = vmatpush3.bf16.msra.mxu1 %v9483_v41  ;;  %v9505_v41 = vld [vmem:[#allocation10 + $0x20] sm:$0xff]  }
 0xfa9   : > { %8924 = vmatprep.subr.bf16.mxu1 %v9714_v45 }
 0xfaa   : > { %8879 = vmatpush3.bf16.msra.mxu0 %v9484_v2  ;;  %v9506_v2 = vld [vmem:[#allocation10 + $0x28] sm:$0xff]  }
 0xfab   : > { %8901 = vmatmul.mubr.bf16.vlgmr.msra.gmra.mrb[216].mxu1 %v6226_v4  ;;  %8904 = vmatprep.subr.bf16.mxu0 %v9714_v45  ;;  %v9507_v4 = vld [vmem:[#allocation10 + $0x30] sm:$0xff]  }
 0xfac   : > { %8940 = vmatprep.mubr.msk.bf16.mxu1 %vm9716_vm0, %v9714_v45  ;;  %8925 = vmatpush3.bf16.msra.mxu1 %v9493_v42 }
 0xfad   : > { %8881 = vmatmul.mubr.bf16.vlgmr.msra.gmra.mrb[88].mxu0 %v6118_v5  ;;  %8926 = vmatprep.subr.bf16.mxu1 %v9714_v45  ;;  %v9508_v5 = vld [vmem:[#allocation10 + $0x38] sm:$0xff]  }
 0xfae   : > { %8920 = vmatprep.mubr.msk.bf16.mxu0 %vm9716_vm0, %v9714_v45  ;;  %8905 = vmatpush3.bf16.msra.mxu0 %v9485_v6  ;;  %v7308_v6 = vld [vmem:[%s11163_s10 + $0x5] sm:$0x1] }
 0xfaf   : > { %8906 = vmatprep.subr.bf16.mxu0 %v9714_v45 }
 0xfb0   : > { %8927 = vmatpush3.bf16.msra.mxu1 %v9494_v43 }
 0xfb1   : > { %8928 = vmatprep.subr.bf16.mxu1 %v9714_v45 }
 0xfb2   : > { %8907 = vmatpush3.bf16.msra.mxu0 %v9486_v8 }
 0xfb3   : > { %8908 = vmatprep.subr.bf16.mxu0 %v9714_v45 }
 0xfb4   : > { %8929 = vmatpush3.bf16.msra.mxu1 %v9495_v44 }
 0xfb5   : > { %8930 = vmatprep.subr.bf16.mxu1 %v9714_v45 }
 0xfb6   : > { %8909 = vmatpush3.bf16.msra.mxu0 %v9487_v9 }
 0xfb7   : > { %8910 = vmatprep.subr.bf16.mxu0 %v9714_v45 }
 0xfb8   : > { %8931 = vmatpush3.bf16.msra.mxu1 %v9496_v46 }
 0xfb9   : > { %8932 = vmatprep.subr.bf16.mxu1 %v9714_v45 }
 0xfba   : > { %8911 = vmatpush3.bf16.msra.mxu0 %v9488_v11 }
 0xfbb   : > { %8912 = vmatprep.subr.bf16.mxu0 %v9714_v45 }
 0xfbc   : > { %8933 = vmatpush3.bf16.msra.mxu1 %v9497_v47 }
 0xfbd   : > { %8934 = vmatprep.subr.bf16.mxu1 %v9714_v45 }
 0xfbe   : > { %8913 = vmatpush3.bf16.msra.mxu0 %v9489_v12 }
 0xfbf   : > { %8914 = vmatprep.subr.bf16.mxu0 %v9714_v45 }
 0xfc0   : > { %8935 = vmatpush3.bf16.msra.mxu1 %v9498_v49 }
 0xfc1   : > { %8936 = vmatprep.subr.bf16.mxu1 %v9714_v45 }
 0xfc2   : > { %8915 = vmatpush3.bf16.msra.mxu0 %v9490_v3 }
 0xfc3   : > { %8916 = vmatprep.subr.bf16.mxu0 %v9714_v45 }
 0xfc4   : > { %8937 = vmatpush3.bf16.msra.mxu1 %v9499_v50 }
 0xfc5   : > { %8938 = vmatprep.subr.bf16.mxu1 %v9714_v45 }
 0xfc6   : > { %8917 = vmatpush3.bf16.msra.mxu0 %v9491_v13  ;;  %v6552_v13 = vstv %s7317_s23 }
 0xfc7   : > { %8918 = vmatprep.subr.bf16.mxu0 %v9714_v45 }
 0xfc8   : > { %8939 = vmatpush3.bf16.msra.mxu1 %v9500_v51 }
 0xfca   : > { %8919 = vmatpush3.bf16.msra.mxu0 %v9492_v20 }
 0xfcb   : > { %8944 = vmatprep.subr.bf16.mxu0 %v9714_v45 }
0x105e   : > { %v6094_v1 = vpop.f32.mrb[212].mxu1 }
0x105f   : > { %v8862_v7 = vpop.f32.mrb[213].mxu1 }
0x1060   : > { %v6006_v10 = vpop.f32.mrb[84].mxu0  ;;  %v6097_v14 = vpop.f32.mrb[214].mxu1 }
0x1061   : > { %v6095_v15 = vadd.f32 %v6094_v1, %v6006_v10  ;;  %v8842_v16 = vpop.f32.mrb[85].mxu0  ;;  %v8863_v17 = vpop.f32.mrb[215].mxu1 }
0x1062   : > { %v6009_v18 = vpop.f32.mrb[86].mxu0  ;;  %v6666_v17 = vstv %s7326_s19 }
0x1063   : > { %v8843_v19 = vpop.f32.mrb[87].mxu0 }
0x107e   : > { %v6310_v21 = vpop.f32.mrb[216].mxu1 }
0x107f   : > { %v8902_v22 = vpop.f32.mrb[217].mxu1 }
0x1080   : > { %v6202_v23 = vpop.f32.mrb[88].mxu0  ;;  %v6313_v24 = vpop.f32.mrb[218].mxu1 }
0x1081   : > { %v6208_v26 = vadd.f32 %v6202_v23, %v6095_v15  ;;  %v8882_v27 = vpop.f32.mrb[89].mxu0  ;;  %v8903_v28 = vpop.f32.mrb[219].mxu1  ;;  %v6575_v15 = vld [vmem:[%s11192_s26] sm:$0x1] }
0x1082   : > { %v6205_v30 = vpop.f32.mrb[90].mxu0 }
0x1083   : > { %v6316_v31 = vadd.f32 %v6310_v21, %v6208_v26  ;;  %v8883_v32 = vpop.f32.mrb[91].mxu0 }
0x1085   : > { %v6319_v33 = vadd.f32 %v7296_v29, %v6316_v31 }
0x1087   : > { %6325 = vrot.lane.b32.xlu1 %v6319_v33, %s9715_s28  ;;  %v6323_v36 = vmul.f32 %v6322_v34, %v6319_v33  ;;  %vm6321_vm14 = vcmp.gt.f32.partialorder %v6319_v33, 0.0 }
0x1089   : > { %v6324_v38 = vsel %vm6321_vm14, %v6319_v33, %v6323_v36 }
0x10f9   : > { %v6326_v37 = vpop.permute.xlu1 %6325 }
0x10fa   : > { %v6327_v39 = vadd.f32 %v6326_v37, %v6324_v38 }
0x10fc   : > { %v6328_v40 = vpack.c.bf16 %v6327_v39, %v6327_v39 }
0x10fe   : > { %8921 = vmatmul.mubr.bf16.vlgmr.msra.gmra.mrb[92].mxu0 %v6328_v40 }
0x10ff   : > { %8960 = vmatprep.mubr.msk.bf16.mxu0 %vm9716_vm0, %v9714_v45  ;;  %8945 = vmatpush3.bf16.msra.mxu0 %v9501_v0 }
0x1100   : > { %8946 = vmatprep.subr.bf16.mxu0 %v9714_v45 }
0x1103   : > { %8947 = vmatpush3.bf16.msra.mxu0 %v9502_v59 }
0x1104   : > { %8948 = vmatprep.subr.bf16.mxu0 %v9714_v45 }
0x1107   : > { %8949 = vmatpush3.bf16.msra.mxu0 %v9503_v35 }
0x1108   : > { %8950 = vmatprep.subr.bf16.mxu0 %v9714_v45 }
0x110b   : > { %8951 = vmatpush3.bf16.msra.mxu0 %v9504_v56 }
0x110c   : > { %8952 = vmatprep.subr.bf16.mxu0 %v9714_v45 }
0x110f   : > { %8953 = vmatpush3.bf16.msra.mxu0 %v9505_v41 }
0x1110   : > { %8954 = vmatprep.subr.bf16.mxu0 %v9714_v45 }
0x1113   : > { %8955 = vmatpush3.bf16.msra.mxu0 %v9506_v2 }
0x1114   : > { %8956 = vmatprep.subr.bf16.mxu0 %v9714_v45 }
0x1117   : > { %8957 = vmatpush3.bf16.msra.mxu0 %v9507_v4 }
0x1118   : > { %8958 = vmatprep.subr.bf16.mxu0 %v9714_v45 }
0x111b   : > { %8959 = vmatpush3.bf16.msra.mxu0 %v9508_v5 }
0x11d1   : > { %v6429_v54 = vpop.f32.mrb[92].mxu0 }
0x11d2   : > { %v6430_v57 = vadd.f32 %v7298_v52, %v6429_v54  ;;  %v8922_v58 = vpop.f32.mrb[93].mxu0 }
0x11d3   : > { %v6432_v48 = vpop.f32.mrb[94].mxu0 }
0x11d4   : > { %6440 = vrot.lane.b32.xlu0 %v6430_v57, %s9715_s28  ;;  %v8923_v53 = vpop.f32.mrb[95].mxu0  ;;  %v6438_v60 = vmul.f32 %v6437_v55, %v6430_v57  ;;  %vm6436_vm15 = vcmp.gt.f32.partialorder %v6430_v57, 0.0 }
0x11d6   : > { %v6439_v62 = vsel %vm6436_vm15, %v6430_v57, %v6438_v60 }
0x1246   : > { %v6441_v61 = vpop.permute.xlu0 %6440 }
0x1247   : > { %v6442_v25 = vadd.f32 %v6441_v61, %v6439_v62 }
0x1249   : > { %v6443_v63 = vpack.c.bf16 %v6442_v25, %v6442_v25 }
0x124b   : > { %8941 = vmatmul.mubr.bf16.vlgmr.msra.gmra.mrb[220].mxu1 %v6443_v63 }
0x131e   : > { %v6544_v8 = vpop.f32.mrb[220].mxu1 }
0x131f   : > { %v6545_v9 = vadd.f32 %v7308_v6, %v6544_v8  ;;  %v8942_v11 = vpop.f32.mrb[221].mxu1 }
0x1320   : > { %v6547_v12 = vpop.f32.mrb[222].mxu1 }
0x1321   : > { %6555 = vrot.lane.b32.xlu1 %v6545_v9, %s9715_s28  ;;  %v8943_v3 = vpop.f32.mrb[223].mxu1  ;;  %v6553_v1 = vmul.f32 %v6552_v13, %v6545_v9  ;;  %vm6551_vm0 = vcmp.gt.f32.partialorder %v6545_v9, 0.0 }
0x1323   : > { %v6554_v45 = vsel %vm6551_vm0, %v6545_v9, %v6553_v1 }
0x1393   : > { %v6556_v7 = vpop.permute.xlu1 %6555 }
0x1394   : > { %v6557_v10 = vadd.f32 %v6556_v7, %v6554_v45 }
0x1396   : > { %v6558_v14 = vpack.c.bf16 %v6557_v10, %v6557_v10 }
0x1398   : > { %8961 = vmatmul.mubr.bf16.vlgmr.msra.gmra.mrb[96].mxu0 %v6558_v14 }
0x146b   : > { %v6658_v16 = vpop.f32.mrb[96].mxu0 }
0x146c   : > { %v6659_v18 = vadd.f32 %v6658_v16, %v6575_v15  ;;  %v8962_v19 = vpop.f32.mrb[97].mxu0 }
0x146d   : > { %v6661_v20 = vpop.f32.mrb[98].mxu0 }
0x146e   : > { %vm6665_vm1 = vcmp.gt.f32.partialorder %v6659_v18, 0.0  ;;  %v6667_v21 = vmul.f32 %v6666_v17, %v6659_v18  ;;  %v8963_v22 = vpop.f32.mrb[99].mxu0 }
0x1470   : > { %v6668_v23 = vsel %vm6665_vm1, %v6659_v18, %v6667_v21 }
0x1471   : > { %6669 = vst [vmem:[%s550_s12] sm:$0x1] %v6668_v23 }
0x1472 PF: > { %s11194_s29 = sld [smem:[#allocation16_spill]] }
0x1478   : > { %s28_s29 = sadd.s32 1, %s11194_s29  }
0x1479   : > { %p25_p0 = scmp.ge.s32.totalorder %s28_s29, 4  }
0x147b   :  { %27 = sbr.rel (!%p25_p0) target bundleno = 7 (0x7), region = 188 }
0x1482   :  { %6687 = vsyncpa [#allocation3], 1 }
0x1483   :  { %6689 = vsyncpa [#allocation3 + $0x1], 1 }
0x1484   :  { %6690 = vsyncpa [#allocation6], 1 }
0x1485   :  { %6691 = vsyncpa [#allocation9], 1 }
0x1486   :  { %6692 = vsyncpa [#allocation4], 1 }
0x1487   :  { %6694 = vsyncpa [#allocation4 + $0x1], 1 }

</bundles_post_ra>
